<compile_context>
chip_gen: v7x
topology: tpu7x:2x2x1
jax: 0.10.0
libtpu: 0.0.40
codegen_flags: <defaults>
</compile_context>

<pallas_src>
import jax
import jax.numpy as jnp
from jax import lax
from jax.experimental import pallas as pl
from jax.experimental.pallas import tpu as pltpu


def _sigmoid(v):
    # tanh form: EUP transcendental, no f32 divide on the VPU, overflow-safe.
    return 0.5 * jnp.tanh(0.5 * v) + 0.5


def _silu(v):
    return v * _sigmoid(v)


def _store_replicate_padded(apad_ref, a, H, W):
    """Write a (H, W, C) activation into the (H+2, W+2, C) VMEM scratch with
    replicate (edge) padding.  The five stores together cover every element of
    the scratch, so no separate initialization is needed."""
    apad_ref[1:H + 1, 1:W + 1, :] = a                 # interior
    apad_ref[0:1, 1:W + 1, :] = a[0:1]                # top row
    apad_ref[H + 1:H + 2, 1:W + 1, :] = a[H - 1:H]    # bottom row
    # Left / right columns (corners come from the already-written border rows).
    apad_ref[:, 0:1, :] = apad_ref[:, 1:2, :]
    apad_ref[:, W + 1:W + 2, :] = apad_ref[:, W:W + 1, :]


def _conv3x3_from_padded(apad_ref, w_ref, bias, H, W, C, cdt):
    """3x3 'valid' conv of the replicate-padded (H+2, W+2, C) f32 scratch.

    w_ref: (9, C_in, C_out) per-tap weights (tap k = dy*3 + dx) in the MXU
    dtype `cdt`.  The three dx shifts are hoisted out of the tap loop (one
    shifted load + reshape per dx instead of nine per-tap relayouts); the
    three dx columns keep independent f32 accumulators so MXU pops don't
    serialize pushes.  Returns (H, W, C) float32 (bias added).
    """
    col_accs = []
    for dx in range(3):
        col = apad_ref[:, dx:dx + W, :].astype(cdt).reshape((H + 2) * W, C)
        acc = None
        for dy in range(3):
            patch = col[dy * W:(dy + H) * W]          # leading-dim row slice
            d = jnp.dot(patch, w_ref[dy * 3 + dx],
                        preferred_element_type=jnp.float32)
            acc = d if acc is None else acc + d
        col_accs.append(acc)
    h = col_accs[0] + col_accs[1] + col_accs[2]
    return h.reshape(H, W, C) + bias


def _cell_kernel(x_ref, s1_ref, t1_ref, w1_ref, b1_ref,
                 s2_ref, t2_ref, w2_ref, b2_ref, sew1_ref, sew2_ref,
                 o_ref, apad_ref):
    _, H, W, C = o_ref.shape
    cdt = w1_ref.dtype                     # MXU operand dtype (bf16 by default)

    x = x_ref[0].astype(jnp.float32)       # (H, W, C)

    # ---- BN1 + SiLU, replicate-padded straight into VMEM scratch -----------
    a1 = _silu(x * s1_ref[...] + t1_ref[...])
    _store_replicate_padded(apad_ref, a1, H, W)

    # ---- conv1 (3x3, replicate padding) -------------------------------------
    h1 = _conv3x3_from_padded(apad_ref, w1_ref, b1_ref[...], H, W, C, cdt)

    # ---- BN2 + SiLU, re-pad into the same scratch (fully overwritten) -------
    a2 = _silu(h1 * s2_ref[...] + t2_ref[...])
    _store_replicate_padded(apad_ref, a2, H, W)

    # ---- conv2 ---------------------------------------------------------------
    h2 = _conv3x3_from_padded(apad_ref, w2_ref, b2_ref[...], H, W, C, cdt)

    # ---- SE block: global-average-pool as a ones-row MXU matmul -------------
    # (1/(H*W) is folded into sew1 in the wrapper, so this is a plain sum.)
    pooled = jnp.dot(jnp.ones((1, H * W), cdt),
                     h2.reshape(H * W, C).astype(cdt),
                     preferred_element_type=jnp.float32)            # (1, C)
    z = jnp.maximum(
        jnp.dot(pooled.astype(cdt), sew1_ref[...],
                preferred_element_type=jnp.float32), 0.0)           # (1, R)
    gate = _sigmoid(
        jnp.dot(z.astype(cdt), sew2_ref[...],
                preferred_element_type=jnp.float32))                # (1, C)

    # ---- residual add --------------------------------------------------------
    o_ref[0] = (x + h2 * gate.reshape(1, 1, C)).astype(o_ref.dtype)


def nvae_inference_residual_cell(x_nchw, params, *, bn_eps=1e-5,
                                 mxu_dtype=jnp.bfloat16):
    """x_nchw: (N, C, H, W).  params: PyTorch-layout parameters (see __main__).

    mxu_dtype: operand dtype for the in-kernel matmuls (accumulation is always
    f32).  bfloat16 is the MXU-native fast path; pass jnp.float32 for a
    bit-accurate (slower, emulated-f32-MXU) path.
    """
    N, C, H, W = x_nchw.shape
    R = params["se_w1"].shape[0]
    out_dtype = x_nchw.dtype
    mxu_dtype = jnp.dtype(mxu_dtype)

    # Fold eval-mode BatchNorm into per-channel scale/shift (f32).
    def fold_bn(gamma, beta, mean, var):
        s = gamma.astype(jnp.float32) * lax.rsqrt(var.astype(jnp.float32) + bn_eps)
        t = beta.astype(jnp.float32) - mean.astype(jnp.float32) * s
        return s.reshape(1, 1, C), t.reshape(1, 1, C)

    s1, t1 = fold_bn(params["bn1_gamma"], params["bn1_beta"],
                     params["bn1_mean"], params["bn1_var"])
    s2, t2 = fold_bn(params["bn2_gamma"], params["bn2_beta"],
                     params["bn2_mean"], params["bn2_var"])

    # Conv weight (C_out, C_in, 3, 3) -> per-tap (9, C_in, C_out), MXU dtype.
    def taps(w):
        return jnp.transpose(w, (2, 3, 1, 0)).reshape(9, C, C).astype(mxu_dtype)

    w1 = taps(params["conv1_w"])
    b1 = params["conv1_b"].reshape(1, 1, C).astype(jnp.float32)
    w2 = taps(params["conv2_w"])
    b2 = params["conv2_b"].reshape(1, 1, C).astype(jnp.float32)
    # SE weights; 1/(H*W) folded into sew1 so the in-kernel pool is a plain sum.
    sew1 = (jnp.transpose(params["se_w1"]).astype(jnp.float32)
            / float(H * W)).astype(mxu_dtype)                # (C, R)
    sew2 = jnp.transpose(params["se_w2"]).astype(mxu_dtype)  # (R, C)

    # NCHW -> NHWC: channels on the lane axis inside the kernel.
    # TODO(synk): for C < 128 a (H, W*C) lane-folded layout would use lanes /
    # MXU columns better; NHWC kept for generality across channel counts.
    x = jnp.transpose(x_nchw, (0, 2, 3, 1))

    def full_spec(shape):
        return pl.BlockSpec(shape, lambda n: (0,) * len(shape))

    img_spec = pl.BlockSpec((1, H, W, C), lambda n: (n, 0, 0, 0))

    inputs = (x, s1, t1, w1, b1, s2, t2, w2, b2, sew1, sew2)
    in_specs = [img_spec] + [full_spec(a.shape) for a in inputs[1:]]

    # Explicit VMEM budget: double-buffered image in/out blocks + (double-
    # buffered, grid-invariant) parameter blocks + the padded f32 scratch.
    # TODO(synk): the parameter blocks never change across grid steps;
    # pipeline_mode=pl.Buffered(1) on their specs would drop one buffer each.
    img_io = 2 * H * W * C * (x.dtype.itemsize + jnp.dtype(out_dtype).itemsize)
    param_bytes = 2 * sum(int(a.size) * a.dtype.itemsize for a in inputs[1:])
    scratch_bytes = (H + 2) * (W + 2) * C * 4
    vmem_limit = int(min(img_io + param_bytes + scratch_bytes + (16 << 20),
                         100 << 20))

    # TODO(synk): for very large H*W*C on v7x (64 MiB VMEM) an extra H-tiled
    # grid axis with 2-row halos would be needed; full-image-per-step kept here.
    out = pl.pallas_call(
        _cell_kernel,
        out_shape=jax.ShapeDtypeStruct((N, H, W, C), out_dtype),
        grid_spec=pltpu.PrefetchScalarGridSpec(
            num_scalar_prefetch=0,
            grid=(N,),
            in_specs=in_specs,
            out_specs=img_spec,
            scratch_shapes=[pltpu.VMEM((H + 2, W + 2, C), jnp.float32)],
        ),
        compiler_params=pltpu.CompilerParams(
            dimension_semantics=("parallel",),
            vmem_limit_bytes=vmem_limit,
        ),
    )(*inputs)

    return jnp.transpose(out, (0, 3, 1, 2))


def _reference(x, params, *, bn_eps=1e-5):
    """Pure-JAX reference (eval-mode BN, replicate padding)."""
    hi = lax.Precision.HIGHEST

    def bn(h, g, b, m, v):
        s = g * lax.rsqrt(v + bn_eps)
        return h * s[None, :, None, None] + (b - m * s)[None, :, None, None]

    def silu(h):
        return h * jax.nn.sigmoid(h)

    def conv3x3(h, w, b):
        hp = jnp.pad(h, ((0, 0), (0, 0), (1, 1), (1, 1)), mode="edge")
        out = lax.conv_general_dilated(
            hp, w, window_strides=(1, 1), padding="VALID",
            dimension_numbers=("NCHW", "OIHW", "NCHW"), precision=hi)
        return out + b[None, :, None, None]

    h = conv3x3(silu(bn(x, params["bn1_gamma"], params["bn1_beta"],
                        params["bn1_mean"], params["bn1_var"])),
                params["conv1_w"], params["conv1_b"])
    h = conv3x3(silu(bn(h, params["bn2_gamma"], params["bn2_beta"],
                        params["bn2_mean"], params["bn2_var"])),
                params["conv2_w"], params["conv2_b"])
    pooled = jnp.mean(h, axis=(2, 3))                                 # (N, C)
    z = jnp.maximum(jnp.dot(pooled, params["se_w1"].T, precision=hi), 0.0)
    gate = jax.nn.sigmoid(jnp.dot(z, params["se_w2"].T, precision=hi))
    return x + h * gate[:, :, None, None]


if __name__ == "__main__":
    key = jax.random.PRNGKey(0)
    N, C, H, W = 2, 4, 16, 16
    R = (C + 16 - 1) // 16          # SEBlock reduction=16 -> num_reduced
    ks = jax.random.split(key, 15)

    params = {
        "bn1_gamma": jax.random.uniform(ks[0], (C,), jnp.float32, 0.5, 1.5),
        "bn1_beta":  0.1 * jax.random.normal(ks[1], (C,), jnp.float32),
        "bn1_mean":  0.1 * jax.random.normal(ks[2], (C,), jnp.float32),
        "bn1_var":   jax.random.uniform(ks[3], (C,), jnp.float32, 0.5, 1.5),
        "conv1_w":   0.2 * jax.random.normal(ks[4], (C, C, 3, 3), jnp.float32),
        "conv1_b":   0.1 * jax.random.normal(ks[5], (C,), jnp.float32),
        "bn2_gamma": jax.random.uniform(ks[6], (C,), jnp.float32, 0.5, 1.5),
        "bn2_beta":  0.1 * jax.random.normal(ks[7], (C,), jnp.float32),
        "bn2_mean":  0.1 * jax.random.normal(ks[8], (C,), jnp.float32),
        "bn2_var":   jax.random.uniform(ks[9], (C,), jnp.float32, 0.5, 1.5),
        "conv2_w":   0.2 * jax.random.normal(ks[10], (C, C, 3, 3), jnp.float32),
        "conv2_b":   0.1 * jax.random.normal(ks[11], (C,), jnp.float32),
        "se_w1":     0.5 * jax.random.normal(ks[12], (R, C), jnp.float32),
        "se_w2":     0.5 * jax.random.normal(ks[13], (C, R), jnp.float32),
    }
    x = jax.random.normal(ks[14], (N, C, H, W), jnp.float32)

    y_ref = _reference(x, params)

    # f32-MXU path: tight check of the fused-kernel semantics.
    y32 = nvae_inference_residual_cell(x, params, mxu_dtype=jnp.float32)
    jax.block_until_ready(y32)
    assert y32.shape == x.shape and y32.dtype == x.dtype
    err32 = float(jnp.max(jnp.abs(y32 - y_ref)))
    assert jnp.allclose(y32, y_ref, atol=1e-3, rtol=1e-3), err32

    # bf16-MXU path (default perf mode, f32 accumulation): looser tolerance.
    ybf = nvae_inference_residual_cell(x, params)
    jax.block_until_ready(ybf)
    assert ybf.shape == x.shape and ybf.dtype == x.dtype
    errbf = float(jnp.max(jnp.abs(ybf - y_ref)))
    assert jnp.allclose(ybf, y_ref, atol=2e-2, rtol=2e-2), errbf

    print("KERNEL_OK")
</pallas_src>

<mosaic_0001>
module attributes {stable_mosaic.version = 11 : i64} {
  func.func @_cell_kernel(%arg0: i32, %arg1: memref<1x16x16x4xf32, #tpu.memory_space<vmem>>, %arg2: memref<1x1x4xf32, #tpu.memory_space<vmem>>, %arg3: memref<1x1x4xf32, #tpu.memory_space<vmem>>, %arg4: memref<9x4x4xf32, #tpu.memory_space<vmem>>, %arg5: memref<1x1x4xf32, #tpu.memory_space<vmem>>, %arg6: memref<1x1x4xf32, #tpu.memory_space<vmem>>, %arg7: memref<1x1x4xf32, #tpu.memory_space<vmem>>, %arg8: memref<9x4x4xf32, #tpu.memory_space<vmem>>, %arg9: memref<1x1x4xf32, #tpu.memory_space<vmem>>, %arg10: memref<4x1xf32, #tpu.memory_space<vmem>>, %arg11: memref<1x4xf32, #tpu.memory_space<vmem>>, %arg12: memref<1x16x16x4xf32, #tpu.memory_space<vmem>>, %arg13: memref<18x18x4xf32, #tpu.memory_space<vmem>>) attributes {dimension_semantics = [#tpu.dimension_semantics<parallel>], iteration_bounds = array<i64: 2>, scalar_prefetch = 0 : i64, scratch_operands = 1 : i64, tpu.core_type = #tpu.core_type<tc>, window_params = [{transform_indices = @transform_0, window_bounds = array<i64: 1, 16, 16, 4>}, {pipeline_mode = #tpu.pipeline_mode<synchronous>, transform_indices = @transform_1, window_bounds = array<i64: 1, 1, 4>}, {pipeline_mode = #tpu.pipeline_mode<synchronous>, transform_indices = @transform_2, window_bounds = array<i64: 1, 1, 4>}, {pipeline_mode = #tpu.pipeline_mode<synchronous>, transform_indices = @transform_3, window_bounds = array<i64: 9, 4, 4>}, {pipeline_mode = #tpu.pipeline_mode<synchronous>, transform_indices = @transform_4, window_bounds = array<i64: 1, 1, 4>}, {pipeline_mode = #tpu.pipeline_mode<synchronous>, transform_indices = @transform_5, window_bounds = array<i64: 1, 1, 4>}, {pipeline_mode = #tpu.pipeline_mode<synchronous>, transform_indices = @transform_6, window_bounds = array<i64: 1, 1, 4>}, {pipeline_mode = #tpu.pipeline_mode<synchronous>, transform_indices = @transform_7, window_bounds = array<i64: 9, 4, 4>}, {pipeline_mode = #tpu.pipeline_mode<synchronous>, transform_indices = @transform_8, window_bounds = array<i64: 1, 1, 4>}, {pipeline_mode = #tpu.pipeline_mode<synchronous>, transform_indices = @transform_9, window_bounds = array<i64: 4, 1>}, {pipeline_mode = #tpu.pipeline_mode<synchronous>, transform_indices = @transform_10, window_bounds = array<i64: 1, 4>}, {transform_indices = @transform_11, window_bounds = array<i64: 1, 16, 16, 4>}]} {
    %c0 = arith.constant 0 : index
    %c0_0 = arith.constant 0 : index
    %c0_1 = arith.constant 0 : index
    %c0_2 = arith.constant 0 : index
    %0 = vector.load %arg1[%c0, %c0_0, %c0_1, %c0_2] : memref<1x16x16x4xf32, #tpu.memory_space<vmem>>, vector<1x16x16x4xf32>
    %1 = vector.shape_cast %0 : vector<1x16x16x4xf32> to vector<16x16x4xf32>
    %c0_3 = arith.constant 0 : index
    %c0_4 = arith.constant 0 : index
    %c0_5 = arith.constant 0 : index
    %2 = vector.load %arg2[%c0_3, %c0_4, %c0_5] : memref<1x1x4xf32, #tpu.memory_space<vmem>>, vector<1x1x4xf32>
    %3 = vector.broadcast %2 : vector<1x1x4xf32> to vector<16x16x4xf32>
    %4 = arith.mulf %1, %3 : vector<16x16x4xf32>
    %c0_6 = arith.constant 0 : index
    %c0_7 = arith.constant 0 : index
    %c0_8 = arith.constant 0 : index
    %5 = vector.load %arg3[%c0_6, %c0_7, %c0_8] : memref<1x1x4xf32, #tpu.memory_space<vmem>>, vector<1x1x4xf32>
    %6 = vector.broadcast %5 : vector<1x1x4xf32> to vector<16x16x4xf32>
    %7 = arith.addf %4, %6 : vector<16x16x4xf32>
    %cst = arith.constant 5.000000e-01 : f32
    %8 = vector.broadcast %cst : f32 to vector<16x16x4xf32>
    %9 = arith.mulf %8, %7 : vector<16x16x4xf32>
    %10 = math.tanh %9 : vector<16x16x4xf32>
    %cst_9 = arith.constant 5.000000e-01 : f32
    %11 = vector.broadcast %cst_9 : f32 to vector<16x16x4xf32>
    %12 = arith.mulf %11, %10 : vector<16x16x4xf32>
    %cst_10 = arith.constant 5.000000e-01 : f32
    %13 = vector.broadcast %cst_10 : f32 to vector<16x16x4xf32>
    %14 = arith.addf %12, %13 : vector<16x16x4xf32>
    %15 = arith.mulf %7, %14 : vector<16x16x4xf32>
    %c1 = arith.constant 1 : index
    %c1_11 = arith.constant 1 : index
    %c0_12 = arith.constant 0 : index
    %16 = vector.load %arg13[%c1, %c1_11, %c0_12] : memref<18x18x4xf32, #tpu.memory_space<vmem>>, vector<16x16x4xf32>
    tpu.vector_store %arg13[%c1, %c1_11, %c0_12], %15 {strides = array<i32>} : memref<18x18x4xf32, #tpu.memory_space<vmem>>, vector<16x16x4xf32>,
    %17 = vector.extract_strided_slice %15 {offsets = [0, 0, 0], sizes = [1, 16, 4], strides = [1, 1, 1]} : vector<16x16x4xf32> to vector<1x16x4xf32>
    %c0_13 = arith.constant 0 : index
    %c1_14 = arith.constant 1 : index
    %c0_15 = arith.constant 0 : index
    %18 = vector.load %arg13[%c0_13, %c1_14, %c0_15] : memref<18x18x4xf32, #tpu.memory_space<vmem>>, vector<1x16x4xf32>
    tpu.vector_store %arg13[%c0_13, %c1_14, %c0_15], %17 {strides = array<i32>} : memref<18x18x4xf32, #tpu.memory_space<vmem>>, vector<1x16x4xf32>,
    %19 = vector.extract_strided_slice %15 {offsets = [15, 0, 0], sizes = [1, 16, 4], strides = [1, 1, 1]} : vector<16x16x4xf32> to vector<1x16x4xf32>
    %c17 = arith.constant 17 : index
    %c1_16 = arith.constant 1 : index
    %c0_17 = arith.constant 0 : index
    %20 = vector.load %arg13[%c17, %c1_16, %c0_17] : memref<18x18x4xf32, #tpu.memory_space<vmem>>, vector<1x16x4xf32>
    tpu.vector_store %arg13[%c17, %c1_16, %c0_17], %19 {strides = array<i32>} : memref<18x18x4xf32, #tpu.memory_space<vmem>>, vector<1x16x4xf32>,
    %c0_18 = arith.constant 0 : index
    %c1_19 = arith.constant 1 : index
    %c0_20 = arith.constant 0 : index
    %21 = vector.load %arg13[%c0_18, %c1_19, %c0_20] : memref<18x18x4xf32, #tpu.memory_space<vmem>>, vector<18x1x4xf32>
    %c0_21 = arith.constant 0 : index
    %c0_22 = arith.constant 0 : index
    %c0_23 = arith.constant 0 : index
    %22 = vector.load %arg13[%c0_21, %c0_22, %c0_23] : memref<18x18x4xf32, #tpu.memory_space<vmem>>, vector<18x1x4xf32>
    tpu.vector_store %arg13[%c0_21, %c0_22, %c0_23], %21 {strides = array<i32>} : memref<18x18x4xf32, #tpu.memory_space<vmem>>, vector<18x1x4xf32>,
    %c0_24 = arith.constant 0 : index
    %c16 = arith.constant 16 : index
    %c0_25 = arith.constant 0 : index
    %23 = vector.load %arg13[%c0_24, %c16, %c0_25] : memref<18x18x4xf32, #tpu.memory_space<vmem>>, vector<18x1x4xf32>
    %c0_26 = arith.constant 0 : index
    %c17_27 = arith.constant 17 : index
    %c0_28 = arith.constant 0 : index
    %24 = vector.load %arg13[%c0_26, %c17_27, %c0_28] : memref<18x18x4xf32, #tpu.memory_space<vmem>>, vector<18x1x4xf32>
    tpu.vector_store %arg13[%c0_26, %c17_27, %c0_28], %23 {strides = array<i32>} : memref<18x18x4xf32, #tpu.memory_space<vmem>>, vector<18x1x4xf32>,
    %c0_29 = arith.constant 0 : index
    %c0_30 = arith.constant 0 : index
    %c0_31 = arith.constant 0 : index
    %25 = vector.load %arg5[%c0_29, %c0_30, %c0_31] : memref<1x1x4xf32, #tpu.memory_space<vmem>>, vector<1x1x4xf32>
    %c0_32 = arith.constant 0 : index
    %c0_33 = arith.constant 0 : index
    %c0_34 = arith.constant 0 : index
    %26 = vector.load %arg13[%c0_32, %c0_33, %c0_34] : memref<18x18x4xf32, #tpu.memory_space<vmem>>, vector<18x16x4xf32>
    %27 = vector.shape_cast %26 : vector<18x16x4xf32> to vector<288x4xf32>
    %28 = vector.extract_strided_slice %27 {offsets = [0, 0], sizes = [256, 4], strides = [1, 1]} : vector<288x4xf32> to vector<256x4xf32>
    %c0_35 = arith.constant 0 : index
    %c0_36 = arith.constant 0 : index
    %c0_37 = arith.constant 0 : index
    %29 = vector.load %arg4[%c0_35, %c0_36, %c0_37] : memref<9x4x4xf32, #tpu.memory_space<vmem>>, vector<1x4x4xf32>
    %30 = vector.shape_cast %29 : vector<1x4x4xf32> to vector<4x4xf32>
    %cst_38 = arith.constant dense<0.000000e+00> : vector<256x4xf32>
    %31 = tpu.matmul %28, %30, %cst_38 {dimension_numbers = #tpu.dot_dimension_numbers<[1], [0], [0], [1], [0, 0, 1, 1], [], []>} : vector<256x4xf32>, vector<4x4xf32>, vector<256x4xf32> -> vector<256x4xf32>
    %32 = vector.extract_strided_slice %27 {offsets = [16, 0], sizes = [256, 4], strides = [1, 1]} : vector<288x4xf32> to vector<256x4xf32>
    %c3 = arith.constant 3 : index
    %c0_39 = arith.constant 0 : index
    %c0_40 = arith.constant 0 : index
    %33 = vector.load %arg4[%c3, %c0_39, %c0_40] : memref<9x4x4xf32, #tpu.memory_space<vmem>>, vector<1x4x4xf32>
    %34 = vector.shape_cast %33 : vector<1x4x4xf32> to vector<4x4xf32>
    %cst_41 = arith.constant dense<0.000000e+00> : vector<256x4xf32>
    %35 = tpu.matmul %32, %34, %cst_41 {dimension_numbers = #tpu.dot_dimension_numbers<[1], [0], [0], [1], [0, 0, 1, 1], [], []>} : vector<256x4xf32>, vector<4x4xf32>, vector<256x4xf32> -> vector<256x4xf32>
    %36 = arith.addf %31, %35 : vector<256x4xf32>
    %37 = vector.extract_strided_slice %27 {offsets = [32, 0], sizes = [256, 4], strides = [1, 1]} : vector<288x4xf32> to vector<256x4xf32>
    %c6 = arith.constant 6 : index
    %c0_42 = arith.constant 0 : index
    %c0_43 = arith.constant 0 : index
    %38 = vector.load %arg4[%c6, %c0_42, %c0_43] : memref<9x4x4xf32, #tpu.memory_space<vmem>>, vector<1x4x4xf32>
    %39 = vector.shape_cast %38 : vector<1x4x4xf32> to vector<4x4xf32>
    %cst_44 = arith.constant dense<0.000000e+00> : vector<256x4xf32>
    %40 = tpu.matmul %37, %39, %cst_44 {dimension_numbers = #tpu.dot_dimension_numbers<[1], [0], [0], [1], [0, 0, 1, 1], [], []>} : vector<256x4xf32>, vector<4x4xf32>, vector<256x4xf32> -> vector<256x4xf32>
    %41 = arith.addf %36, %40 : vector<256x4xf32>
    %c0_45 = arith.constant 0 : index
    %c1_46 = arith.constant 1 : index
    %c0_47 = arith.constant 0 : index
    %42 = vector.load %arg13[%c0_45, %c1_46, %c0_47] : memref<18x18x4xf32, #tpu.memory_space<vmem>>, vector<18x16x4xf32>
    %43 = vector.shape_cast %42 : vector<18x16x4xf32> to vector<288x4xf32>
    %44 = vector.extract_strided_slice %43 {offsets = [0, 0], sizes = [256, 4], strides = [1, 1]} : vector<288x4xf32> to vector<256x4xf32>
    %c1_48 = arith.constant 1 : index
    %c0_49 = arith.constant 0 : index
    %c0_50 = arith.constant 0 : index
    %45 = vector.load %arg4[%c1_48, %c0_49, %c0_50] : memref<9x4x4xf32, #tpu.memory_space<vmem>>, vector<1x4x4xf32>
    %46 = vector.shape_cast %45 : vector<1x4x4xf32> to vector<4x4xf32>
    %cst_51 = arith.constant dense<0.000000e+00> : vector<256x4xf32>
    %47 = tpu.matmul %44, %46, %cst_51 {dimension_numbers = #tpu.dot_dimension_numbers<[1], [0], [0], [1], [0, 0, 1, 1], [], []>} : vector<256x4xf32>, vector<4x4xf32>, vector<256x4xf32> -> vector<256x4xf32>
    %48 = vector.extract_strided_slice %43 {offsets = [16, 0], sizes = [256, 4], strides = [1, 1]} : vector<288x4xf32> to vector<256x4xf32>
    %c4 = arith.constant 4 : index
    %c0_52 = arith.constant 0 : index
    %c0_53 = arith.constant 0 : index
    %49 = vector.load %arg4[%c4, %c0_52, %c0_53] : memref<9x4x4xf32, #tpu.memory_space<vmem>>, vector<1x4x4xf32>
    %50 = vector.shape_cast %49 : vector<1x4x4xf32> to vector<4x4xf32>
    %cst_54 = arith.constant dense<0.000000e+00> : vector<256x4xf32>
    %51 = tpu.matmul %48, %50, %cst_54 {dimension_numbers = #tpu.dot_dimension_numbers<[1], [0], [0], [1], [0, 0, 1, 1], [], []>} : vector<256x4xf32>, vector<4x4xf32>, vector<256x4xf32> -> vector<256x4xf32>
    %52 = arith.addf %47, %51 : vector<256x4xf32>
    %53 = vector.extract_strided_slice %43 {offsets = [32, 0], sizes = [256, 4], strides = [1, 1]} : vector<288x4xf32> to vector<256x4xf32>
    %c7 = arith.constant 7 : index
    %c0_55 = arith.constant 0 : index
    %c0_56 = arith.constant 0 : index
    %54 = vector.load %arg4[%c7, %c0_55, %c0_56] : memref<9x4x4xf32, #tpu.memory_space<vmem>>, vector<1x4x4xf32>
    %55 = vector.shape_cast %54 : vector<1x4x4xf32> to vector<4x4xf32>
    %cst_57 = arith.constant dense<0.000000e+00> : vector<256x4xf32>
    %56 = tpu.matmul %53, %55, %cst_57 {dimension_numbers = #tpu.dot_dimension_numbers<[1], [0], [0], [1], [0, 0, 1, 1], [], []>} : vector<256x4xf32>, vector<4x4xf32>, vector<256x4xf32> -> vector<256x4xf32>
    %57 = arith.addf %52, %56 : vector<256x4xf32>
    %c0_58 = arith.constant 0 : index
    %c2 = arith.constant 2 : index
    %c0_59 = arith.constant 0 : index
    %58 = vector.load %arg13[%c0_58, %c2, %c0_59] : memref<18x18x4xf32, #tpu.memory_space<vmem>>, vector<18x16x4xf32>
    %59 = vector.shape_cast %58 : vector<18x16x4xf32> to vector<288x4xf32>
    %60 = vector.extract_strided_slice %59 {offsets = [0, 0], sizes = [256, 4], strides = [1, 1]} : vector<288x4xf32> to vector<256x4xf32>
    %c2_60 = arith.constant 2 : index
    %c0_61 = arith.constant 0 : index
    %c0_62 = arith.constant 0 : index
    %61 = vector.load %arg4[%c2_60, %c0_61, %c0_62] : memref<9x4x4xf32, #tpu.memory_space<vmem>>, vector<1x4x4xf32>
    %62 = vector.shape_cast %61 : vector<1x4x4xf32> to vector<4x4xf32>
    %cst_63 = arith.constant dense<0.000000e+00> : vector<256x4xf32>
    %63 = tpu.matmul %60, %62, %cst_63 {dimension_numbers = #tpu.dot_dimension_numbers<[1], [0], [0], [1], [0, 0, 1, 1], [], []>} : vector<256x4xf32>, vector<4x4xf32>, vector<256x4xf32> -> vector<256x4xf32>
    %64 = vector.extract_strided_slice %59 {offsets = [16, 0], sizes = [256, 4], strides = [1, 1]} : vector<288x4xf32> to vector<256x4xf32>
    %c5 = arith.constant 5 : index
    %c0_64 = arith.constant 0 : index
    %c0_65 = arith.constant 0 : index
    %65 = vector.load %arg4[%c5, %c0_64, %c0_65] : memref<9x4x4xf32, #tpu.memory_space<vmem>>, vector<1x4x4xf32>
    %66 = vector.shape_cast %65 : vector<1x4x4xf32> to vector<4x4xf32>
    %cst_66 = arith.constant dense<0.000000e+00> : vector<256x4xf32>
    %67 = tpu.matmul %64, %66, %cst_66 {dimension_numbers = #tpu.dot_dimension_numbers<[1], [0], [0], [1], [0, 0, 1, 1], [], []>} : vector<256x4xf32>, vector<4x4xf32>, vector<256x4xf32> -> vector<256x4xf32>
    %68 = arith.addf %63, %67 : vector<256x4xf32>
    %69 = vector.extract_strided_slice %59 {offsets = [32, 0], sizes = [256, 4], strides = [1, 1]} : vector<288x4xf32> to vector<256x4xf32>
    %c8 = arith.constant 8 : index
    %c0_67 = arith.constant 0 : index
    %c0_68 = arith.constant 0 : index
    %70 = vector.load %arg4[%c8, %c0_67, %c0_68] : memref<9x4x4xf32, #tpu.memory_space<vmem>>, vector<1x4x4xf32>
    %71 = vector.shape_cast %70 : vector<1x4x4xf32> to vector<4x4xf32>
    %cst_69 = arith.constant dense<0.000000e+00> : vector<256x4xf32>
    %72 = tpu.matmul %69, %71, %cst_69 {dimension_numbers = #tpu.dot_dimension_numbers<[1], [0], [0], [1], [0, 0, 1, 1], [], []>} : vector<256x4xf32>, vector<4x4xf32>, vector<256x4xf32> -> vector<256x4xf32>
    %73 = arith.addf %68, %72 : vector<256x4xf32>
    %74 = arith.addf %41, %57 : vector<256x4xf32>
    %75 = arith.addf %74, %73 : vector<256x4xf32>
    %76 = vector.shape_cast %75 : vector<256x4xf32> to vector<16x16x4xf32>
    %77 = vector.broadcast %25 : vector<1x1x4xf32> to vector<16x16x4xf32>
    %78 = arith.addf %76, %77 : vector<16x16x4xf32>
    %c0_70 = arith.constant 0 : index
    %c0_71 = arith.constant 0 : index
    %c0_72 = arith.constant 0 : index
    %79 = vector.load %arg6[%c0_70, %c0_71, %c0_72] : memref<1x1x4xf32, #tpu.memory_space<vmem>>, vector<1x1x4xf32>
    %80 = vector.broadcast %79 : vector<1x1x4xf32> to vector<16x16x4xf32>
    %81 = arith.mulf %78, %80 : vector<16x16x4xf32>
    %c0_73 = arith.constant 0 : index
    %c0_74 = arith.constant 0 : index
    %c0_75 = arith.constant 0 : index
    %82 = vector.load %arg7[%c0_73, %c0_74, %c0_75] : memref<1x1x4xf32, #tpu.memory_space<vmem>>, vector<1x1x4xf32>
    %83 = vector.broadcast %82 : vector<1x1x4xf32> to vector<16x16x4xf32>
    %84 = arith.addf %81, %83 : vector<16x16x4xf32>
    %cst_76 = arith.constant 5.000000e-01 : f32
    %85 = vector.broadcast %cst_76 : f32 to vector<16x16x4xf32>
    %86 = arith.mulf %85, %84 : vector<16x16x4xf32>
    %87 = math.tanh %86 : vector<16x16x4xf32>
    %cst_77 = arith.constant 5.000000e-01 : f32
    %88 = vector.broadcast %cst_77 : f32 to vector<16x16x4xf32>
    %89 = arith.mulf %88, %87 : vector<16x16x4xf32>
    %cst_78 = arith.constant 5.000000e-01 : f32
    %90 = vector.broadcast %cst_78 : f32 to vector<16x16x4xf32>
    %91 = arith.addf %89, %90 : vector<16x16x4xf32>
    %92 = arith.mulf %84, %91 : vector<16x16x4xf32>
    %c1_79 = arith.constant 1 : index
    %c1_80 = arith.constant 1 : index
    %c0_81 = arith.constant 0 : index
    %93 = vector.load %arg13[%c1_79, %c1_80, %c0_81] : memref<18x18x4xf32, #tpu.memory_space<vmem>>, vector<16x16x4xf32>
    tpu.vector_store %arg13[%c1_79, %c1_80, %c0_81], %92 {strides = array<i32>} : memref<18x18x4xf32, #tpu.memory_space<vmem>>, vector<16x16x4xf32>,
    %94 = vector.extract_strided_slice %92 {offsets = [0, 0, 0], sizes = [1, 16, 4], strides = [1, 1, 1]} : vector<16x16x4xf32> to vector<1x16x4xf32>
    %c0_82 = arith.constant 0 : index
    %c1_83 = arith.constant 1 : index
    %c0_84 = arith.constant 0 : index
    %95 = vector.load %arg13[%c0_82, %c1_83, %c0_84] : memref<18x18x4xf32, #tpu.memory_space<vmem>>, vector<1x16x4xf32>
    tpu.vector_store %arg13[%c0_82, %c1_83, %c0_84], %94 {strides = array<i32>} : memref<18x18x4xf32, #tpu.memory_space<vmem>>, vector<1x16x4xf32>,
    %96 = vector.extract_strided_slice %92 {offsets = [15, 0, 0], sizes = [1, 16, 4], strides = [1, 1, 1]} : vector<16x16x4xf32> to vector<1x16x4xf32>
    %c17_85 = arith.constant 17 : index
    %c1_86 = arith.constant 1 : index
    %c0_87 = arith.constant 0 : index
    %97 = vector.load %arg13[%c17_85, %c1_86, %c0_87] : memref<18x18x4xf32, #tpu.memory_space<vmem>>, vector<1x16x4xf32>
    tpu.vector_store %arg13[%c17_85, %c1_86, %c0_87], %96 {strides = array<i32>} : memref<18x18x4xf32, #tpu.memory_space<vmem>>, vector<1x16x4xf32>,
    %c0_88 = arith.constant 0 : index
    %c1_89 = arith.constant 1 : index
    %c0_90 = arith.constant 0 : index
    %98 = vector.load %arg13[%c0_88, %c1_89, %c0_90] : memref<18x18x4xf32, #tpu.memory_space<vmem>>, vector<18x1x4xf32>
    %c0_91 = arith.constant 0 : index
    %c0_92 = arith.constant 0 : index
    %c0_93 = arith.constant 0 : index
    %99 = vector.load %arg13[%c0_91, %c0_92, %c0_93] : memref<18x18x4xf32, #tpu.memory_space<vmem>>, vector<18x1x4xf32>
    tpu.vector_store %arg13[%c0_91, %c0_92, %c0_93], %98 {strides = array<i32>} : memref<18x18x4xf32, #tpu.memory_space<vmem>>, vector<18x1x4xf32>,
    %c0_94 = arith.constant 0 : index
    %c16_95 = arith.constant 16 : index
    %c0_96 = arith.constant 0 : index
    %100 = vector.load %arg13[%c0_94, %c16_95, %c0_96] : memref<18x18x4xf32, #tpu.memory_space<vmem>>, vector<18x1x4xf32>
    %c0_97 = arith.constant 0 : index
    %c17_98 = arith.constant 17 : index
    %c0_99 = arith.constant 0 : index
    %101 = vector.load %arg13[%c0_97, %c17_98, %c0_99] : memref<18x18x4xf32, #tpu.memory_space<vmem>>, vector<18x1x4xf32>
    tpu.vector_store %arg13[%c0_97, %c17_98, %c0_99], %100 {strides = array<i32>} : memref<18x18x4xf32, #tpu.memory_space<vmem>>, vector<18x1x4xf32>,
    %c0_100 = arith.constant 0 : index
    %c0_101 = arith.constant 0 : index
    %c0_102 = arith.constant 0 : index
    %102 = vector.load %arg9[%c0_100, %c0_101, %c0_102] : memref<1x1x4xf32, #tpu.memory_space<vmem>>, vector<1x1x4xf32>
    %c0_103 = arith.constant 0 : index
    %c0_104 = arith.constant 0 : index
    %c0_105 = arith.constant 0 : index
    %103 = vector.load %arg13[%c0_103, %c0_104, %c0_105] : memref<18x18x4xf32, #tpu.memory_space<vmem>>, vector<18x16x4xf32>
    %104 = vector.shape_cast %103 : vector<18x16x4xf32> to vector<288x4xf32>
    %105 = vector.extract_strided_slice %104 {offsets = [0, 0], sizes = [256, 4], strides = [1, 1]} : vector<288x4xf32> to vector<256x4xf32>
    %c0_106 = arith.constant 0 : index
    %c0_107 = arith.constant 0 : index
    %c0_108 = arith.constant 0 : index
    %106 = vector.load %arg8[%c0_106, %c0_107, %c0_108] : memref<9x4x4xf32, #tpu.memory_space<vmem>>, vector<1x4x4xf32>
    %107 = vector.shape_cast %106 : vector<1x4x4xf32> to vector<4x4xf32>
    %cst_109 = arith.constant dense<0.000000e+00> : vector<256x4xf32>
    %108 = tpu.matmul %105, %107, %cst_109 {dimension_numbers = #tpu.dot_dimension_numbers<[1], [0], [0], [1], [0, 0, 1, 1], [], []>} : vector<256x4xf32>, vector<4x4xf32>, vector<256x4xf32> -> vector<256x4xf32>
    %109 = vector.extract_strided_slice %104 {offsets = [16, 0], sizes = [256, 4], strides = [1, 1]} : vector<288x4xf32> to vector<256x4xf32>
    %c3_110 = arith.constant 3 : index
    %c0_111 = arith.constant 0 : index
    %c0_112 = arith.constant 0 : index
    %110 = vector.load %arg8[%c3_110, %c0_111, %c0_112] : memref<9x4x4xf32, #tpu.memory_space<vmem>>, vector<1x4x4xf32>
    %111 = vector.shape_cast %110 : vector<1x4x4xf32> to vector<4x4xf32>
    %cst_113 = arith.constant dense<0.000000e+00> : vector<256x4xf32>
    %112 = tpu.matmul %109, %111, %cst_113 {dimension_numbers = #tpu.dot_dimension_numbers<[1], [0], [0], [1], [0, 0, 1, 1], [], []>} : vector<256x4xf32>, vector<4x4xf32>, vector<256x4xf32> -> vector<256x4xf32>
    %113 = arith.addf %108, %112 : vector<256x4xf32>
    %114 = vector.extract_strided_slice %104 {offsets = [32, 0], sizes = [256, 4], strides = [1, 1]} : vector<288x4xf32> to vector<256x4xf32>
    %c6_114 = arith.constant 6 : index
    %c0_115 = arith.constant 0 : index
    %c0_116 = arith.constant 0 : index
    %115 = vector.load %arg8[%c6_114, %c0_115, %c0_116] : memref<9x4x4xf32, #tpu.memory_space<vmem>>, vector<1x4x4xf32>
    %116 = vector.shape_cast %115 : vector<1x4x4xf32> to vector<4x4xf32>
    %cst_117 = arith.constant dense<0.000000e+00> : vector<256x4xf32>
    %117 = tpu.matmul %114, %116, %cst_117 {dimension_numbers = #tpu.dot_dimension_numbers<[1], [0], [0], [1], [0, 0, 1, 1], [], []>} : vector<256x4xf32>, vector<4x4xf32>, vector<256x4xf32> -> vector<256x4xf32>
    %118 = arith.addf %113, %117 : vector<256x4xf32>
    %c0_118 = arith.constant 0 : index
    %c1_119 = arith.constant 1 : index
    %c0_120 = arith.constant 0 : index
    %119 = vector.load %arg13[%c0_118, %c1_119, %c0_120] : memref<18x18x4xf32, #tpu.memory_space<vmem>>, vector<18x16x4xf32>
    %120 = vector.shape_cast %119 : vector<18x16x4xf32> to vector<288x4xf32>
    %121 = vector.extract_strided_slice %120 {offsets = [0, 0], sizes = [256, 4], strides = [1, 1]} : vector<288x4xf32> to vector<256x4xf32>
    %c1_121 = arith.constant 1 : index
    %c0_122 = arith.constant 0 : index
    %c0_123 = arith.constant 0 : index
    %122 = vector.load %arg8[%c1_121, %c0_122, %c0_123] : memref<9x4x4xf32, #tpu.memory_space<vmem>>, vector<1x4x4xf32>
    %123 = vector.shape_cast %122 : vector<1x4x4xf32> to vector<4x4xf32>
    %cst_124 = arith.constant dense<0.000000e+00> : vector<256x4xf32>
    %124 = tpu.matmul %121, %123, %cst_124 {dimension_numbers = #tpu.dot_dimension_numbers<[1], [0], [0], [1], [0, 0, 1, 1], [], []>} : vector<256x4xf32>, vector<4x4xf32>, vector<256x4xf32> -> vector<256x4xf32>
    %125 = vector.extract_strided_slice %120 {offsets = [16, 0], sizes = [256, 4], strides = [1, 1]} : vector<288x4xf32> to vector<256x4xf32>
    %c4_125 = arith.constant 4 : index
    %c0_126 = arith.constant 0 : index
    %c0_127 = arith.constant 0 : index
    %126 = vector.load %arg8[%c4_125, %c0_126, %c0_127] : memref<9x4x4xf32, #tpu.memory_space<vmem>>, vector<1x4x4xf32>
    %127 = vector.shape_cast %126 : vector<1x4x4xf32> to vector<4x4xf32>
    %cst_128 = arith.constant dense<0.000000e+00> : vector<256x4xf32>
    %128 = tpu.matmul %125, %127, %cst_128 {dimension_numbers = #tpu.dot_dimension_numbers<[1], [0], [0], [1], [0, 0, 1, 1], [], []>} : vector<256x4xf32>, vector<4x4xf32>, vector<256x4xf32> -> vector<256x4xf32>
    %129 = arith.addf %124, %128 : vector<256x4xf32>
    %130 = vector.extract_strided_slice %120 {offsets = [32, 0], sizes = [256, 4], strides = [1, 1]} : vector<288x4xf32> to vector<256x4xf32>
    %c7_129 = arith.constant 7 : index
    %c0_130 = arith.constant 0 : index
    %c0_131 = arith.constant 0 : index
    %131 = vector.load %arg8[%c7_129, %c0_130, %c0_131] : memref<9x4x4xf32, #tpu.memory_space<vmem>>, vector<1x4x4xf32>
    %132 = vector.shape_cast %131 : vector<1x4x4xf32> to vector<4x4xf32>
    %cst_132 = arith.constant dense<0.000000e+00> : vector<256x4xf32>
    %133 = tpu.matmul %130, %132, %cst_132 {dimension_numbers = #tpu.dot_dimension_numbers<[1], [0], [0], [1], [0, 0, 1, 1], [], []>} : vector<256x4xf32>, vector<4x4xf32>, vector<256x4xf32> -> vector<256x4xf32>
    %134 = arith.addf %129, %133 : vector<256x4xf32>
    %c0_133 = arith.constant 0 : index
    %c2_134 = arith.constant 2 : index
    %c0_135 = arith.constant 0 : index
    %135 = vector.load %arg13[%c0_133, %c2_134, %c0_135] : memref<18x18x4xf32, #tpu.memory_space<vmem>>, vector<18x16x4xf32>
    %136 = vector.shape_cast %135 : vector<18x16x4xf32> to vector<288x4xf32>
    %137 = vector.extract_strided_slice %136 {offsets = [0, 0], sizes = [256, 4], strides = [1, 1]} : vector<288x4xf32> to vector<256x4xf32>
    %c2_136 = arith.constant 2 : index
    %c0_137 = arith.constant 0 : index
    %c0_138 = arith.constant 0 : index
    %138 = vector.load %arg8[%c2_136, %c0_137, %c0_138] : memref<9x4x4xf32, #tpu.memory_space<vmem>>, vector<1x4x4xf32>
    %139 = vector.shape_cast %138 : vector<1x4x4xf32> to vector<4x4xf32>
    %cst_139 = arith.constant dense<0.000000e+00> : vector<256x4xf32>
    %140 = tpu.matmul %137, %139, %cst_139 {dimension_numbers = #tpu.dot_dimension_numbers<[1], [0], [0], [1], [0, 0, 1, 1], [], []>} : vector<256x4xf32>, vector<4x4xf32>, vector<256x4xf32> -> vector<256x4xf32>
    %141 = vector.extract_strided_slice %136 {offsets = [16, 0], sizes = [256, 4], strides = [1, 1]} : vector<288x4xf32> to vector<256x4xf32>
    %c5_140 = arith.constant 5 : index
    %c0_141 = arith.constant 0 : index
    %c0_142 = arith.constant 0 : index
    %142 = vector.load %arg8[%c5_140, %c0_141, %c0_142] : memref<9x4x4xf32, #tpu.memory_space<vmem>>, vector<1x4x4xf32>
    %143 = vector.shape_cast %142 : vector<1x4x4xf32> to vector<4x4xf32>
    %cst_143 = arith.constant dense<0.000000e+00> : vector<256x4xf32>
    %144 = tpu.matmul %141, %143, %cst_143 {dimension_numbers = #tpu.dot_dimension_numbers<[1], [0], [0], [1], [0, 0, 1, 1], [], []>} : vector<256x4xf32>, vector<4x4xf32>, vector<256x4xf32> -> vector<256x4xf32>
    %145 = arith.addf %140, %144 : vector<256x4xf32>
    %146 = vector.extract_strided_slice %136 {offsets = [32, 0], sizes = [256, 4], strides = [1, 1]} : vector<288x4xf32> to vector<256x4xf32>
    %c8_144 = arith.constant 8 : index
    %c0_145 = arith.constant 0 : index
    %c0_146 = arith.constant 0 : index
    %147 = vector.load %arg8[%c8_144, %c0_145, %c0_146] : memref<9x4x4xf32, #tpu.memory_space<vmem>>, vector<1x4x4xf32>
    %148 = vector.shape_cast %147 : vector<1x4x4xf32> to vector<4x4xf32>
    %cst_147 = arith.constant dense<0.000000e+00> : vector<256x4xf32>
    %149 = tpu.matmul %146, %148, %cst_147 {dimension_numbers = #tpu.dot_dimension_numbers<[1], [0], [0], [1], [0, 0, 1, 1], [], []>} : vector<256x4xf32>, vector<4x4xf32>, vector<256x4xf32> -> vector<256x4xf32>
    %150 = arith.addf %145, %149 : vector<256x4xf32>
    %151 = arith.addf %118, %134 : vector<256x4xf32>
    %152 = arith.addf %151, %150 : vector<256x4xf32>
    %153 = vector.shape_cast %152 : vector<256x4xf32> to vector<16x16x4xf32>
    %154 = vector.broadcast %102 : vector<1x1x4xf32> to vector<16x16x4xf32>
    %155 = arith.addf %153, %154 : vector<16x16x4xf32>
    %cst_148 = arith.constant 1.000000e+00 : f32
    %156 = vector.broadcast %cst_148 : f32 to vector<1x256xf32>
    %157 = vector.shape_cast %155 : vector<16x16x4xf32> to vector<256x4xf32>
    %cst_149 = arith.constant dense<0.000000e+00> : vector<1x4xf32>
    %158 = tpu.matmul %156, %157, %cst_149 {dimension_numbers = #tpu.dot_dimension_numbers<[1], [0], [0], [1], [0, 0, 1, 1], [], []>} : vector<1x256xf32>, vector<256x4xf32>, vector<1x4xf32> -> vector<1x4xf32>
    %c0_150 = arith.constant 0 : index
    %c0_151 = arith.constant 0 : index
    %159 = vector.load %arg10[%c0_150, %c0_151] : memref<4x1xf32, #tpu.memory_space<vmem>>, vector<4x1xf32>
    %cst_152 = arith.constant dense<0.000000e+00> : vector<1x1xf32>
    %160 = tpu.matmul %158, %159, %cst_152 {dimension_numbers = #tpu.dot_dimension_numbers<[1], [0], [0], [1], [0, 0, 1, 1], [], []>} : vector<1x4xf32>, vector<4x1xf32>, vector<1x1xf32> -> vector<1x1xf32>
    %cst_153 = arith.constant 0.000000e+00 : f32
    %161 = vector.broadcast %cst_153 : f32 to vector<1x1xf32>
    %162 = arith.maximumf %160, %161 : vector<1x1xf32>
    %c0_154 = arith.constant 0 : index
    %c0_155 = arith.constant 0 : index
    %163 = vector.load %arg11[%c0_154, %c0_155] : memref<1x4xf32, #tpu.memory_space<vmem>>, vector<1x4xf32>
    %cst_156 = arith.constant dense<0.000000e+00> : vector<1x4xf32>
    %164 = tpu.matmul %162, %163, %cst_156 {dimension_numbers = #tpu.dot_dimension_numbers<[1], [0], [0], [1], [0, 0, 1, 1], [], []>} : vector<1x1xf32>, vector<1x4xf32>, vector<1x4xf32> -> vector<1x4xf32>
    %cst_157 = arith.constant 5.000000e-01 : f32
    %165 = vector.broadcast %cst_157 : f32 to vector<1x4xf32>
    %166 = arith.mulf %165, %164 : vector<1x4xf32>
    %167 = math.tanh %166 : vector<1x4xf32>
    %cst_158 = arith.constant 5.000000e-01 : f32
    %168 = vector.broadcast %cst_158 : f32 to vector<1x4xf32>
    %169 = arith.mulf %168, %167 : vector<1x4xf32>
    %cst_159 = arith.constant 5.000000e-01 : f32
    %170 = vector.broadcast %cst_159 : f32 to vector<1x4xf32>
    %171 = arith.addf %169, %170 : vector<1x4xf32>
    %172 = vector.shape_cast %171 : vector<1x4xf32> to vector<1x1x4xf32>
    %173 = vector.broadcast %172 : vector<1x1x4xf32> to vector<16x16x4xf32>
    %174 = arith.mulf %155, %173 : vector<16x16x4xf32>
    %175 = arith.addf %1, %174 : vector<16x16x4xf32>
    %c0_160 = arith.constant 0 : index
    %c0_161 = arith.constant 0 : index
    %c0_162 = arith.constant 0 : index
    %c0_163 = arith.constant 0 : index
    %176 = vector.load %arg12[%c0_160, %c0_161, %c0_162, %c0_163] : memref<1x16x16x4xf32, #tpu.memory_space<vmem>>, vector<1x16x16x4xf32>
    %177 = vector.shape_cast %176 : vector<1x16x16x4xf32> to vector<16x16x4xf32>
    %178 = vector.shape_cast %175 : vector<16x16x4xf32> to vector<1x16x16x4xf32>
    tpu.vector_store %arg12[%c0_160, %c0_161, %c0_162, %c0_163], %178 {strides = array<i32>} : memref<1x16x16x4xf32, #tpu.memory_space<vmem>>, vector<1x16x16x4xf32>,
    return
  }
  func.func @transform_0(%arg0: i32) -> (i32, i32, i32, i32) {
    %c0_i32 = arith.constant 0 : i32
    %c0_i32_0 = arith.constant 0 : i32
    %c0_i32_1 = arith.constant 0 : i32
    %c0_i32_2 = arith.constant 0 : i32
    return %arg0, %c0_i32, %c0_i32_0, %c0_i32_1 : i32, i32, i32, i32
  }
  func.func @transform_1(%arg0: i32) -> (i32, i32, i32) {
    %c0_i32 = arith.constant 0 : i32
    %c0_i32_0 = arith.constant 0 : i32
    %c0_i32_1 = arith.constant 0 : i32
    %c0_i32_2 = arith.constant 0 : i32
    return %c0_i32, %c0_i32_0, %c0_i32_1 : i32, i32, i32
  }
  func.func @transform_2(%arg0: i32) -> (i32, i32, i32) {
    %c0_i32 = arith.constant 0 : i32
    %c0_i32_0 = arith.constant 0 : i32
    %c0_i32_1 = arith.constant 0 : i32
    %c0_i32_2 = arith.constant 0 : i32
    return %c0_i32, %c0_i32_0, %c0_i32_1 : i32, i32, i32
  }
  func.func @transform_3(%arg0: i32) -> (i32, i32, i32) {
    %c0_i32 = arith.constant 0 : i32
    %c0_i32_0 = arith.constant 0 : i32
    %c0_i32_1 = arith.constant 0 : i32
    %c0_i32_2 = arith.constant 0 : i32
    return %c0_i32, %c0_i32_0, %c0_i32_1 : i32, i32, i32
  }
  func.func @transform_4(%arg0: i32) -> (i32, i32, i32) {
    %c0_i32 = arith.constant 0 : i32
    %c0_i32_0 = arith.constant 0 : i32
    %c0_i32_1 = arith.constant 0 : i32
    %c0_i32_2 = arith.constant 0 : i32
    return %c0_i32, %c0_i32_0, %c0_i32_1 : i32, i32, i32
  }
  func.func @transform_5(%arg0: i32) -> (i32, i32, i32) {
    %c0_i32 = arith.constant 0 : i32
    %c0_i32_0 = arith.constant 0 : i32
    %c0_i32_1 = arith.constant 0 : i32
    %c0_i32_2 = arith.constant 0 : i32
    return %c0_i32, %c0_i32_0, %c0_i32_1 : i32, i32, i32
  }
  func.func @transform_6(%arg0: i32) -> (i32, i32, i32) {
    %c0_i32 = arith.constant 0 : i32
    %c0_i32_0 = arith.constant 0 : i32
    %c0_i32_1 = arith.constant 0 : i32
    %c0_i32_2 = arith.constant 0 : i32
    return %c0_i32, %c0_i32_0, %c0_i32_1 : i32, i32, i32
  }
  func.func @transform_7(%arg0: i32) -> (i32, i32, i32) {
    %c0_i32 = arith.constant 0 : i32
    %c0_i32_0 = arith.constant 0 : i32
    %c0_i32_1 = arith.constant 0 : i32
    %c0_i32_2 = arith.constant 0 : i32
    return %c0_i32, %c0_i32_0, %c0_i32_1 : i32, i32, i32
  }
  func.func @transform_8(%arg0: i32) -> (i32, i32, i32) {
    %c0_i32 = arith.constant 0 : i32
    %c0_i32_0 = arith.constant 0 : i32
    %c0_i32_1 = arith.constant 0 : i32
    %c0_i32_2 = arith.constant 0 : i32
    return %c0_i32, %c0_i32_0, %c0_i32_1 : i32, i32, i32
  }
  func.func @transform_9(%arg0: i32) -> (i32, i32) {
    %c0_i32 = arith.constant 0 : i32
    %c0_i32_0 = arith.constant 0 : i32
    %c0_i32_1 = arith.constant 0 : i32
    return %c0_i32, %c0_i32_0 : i32, i32
  }
  func.func @transform_10(%arg0: i32) -> (i32, i32) {
    %c0_i32 = arith.constant 0 : i32
    %c0_i32_0 = arith.constant 0 : i32
    %c0_i32_1 = arith.constant 0 : i32
    return %c0_i32, %c0_i32_0 : i32, i32
  }
  func.func @transform_11(%arg0: i32) -> (i32, i32, i32, i32) {
    %c0_i32 = arith.constant 0 : i32
    %c0_i32_0 = arith.constant 0 : i32
    %c0_i32_1 = arith.constant 0 : i32
    %c0_i32_2 = arith.constant 0 : i32
    return %arg0, %c0_i32, %c0_i32_0, %c0_i32_1 : i32, i32, i32, i32
  }
}

</mosaic_0001>

<bundles_post_ra>
// kernel: tpu_custom_call.1
= control target key start
LH: loop header
LB: loop body
LE: loop exit
PB: predicated region body
PF: predicated region fallthrough
CT: control target
= control target key end

     0   :  { %s9866_s17 = smov 0   ;;  %s12456_s0 = inlined_call_operand.vmem [shape: f32[2,16,16,4], index: 0, kind: input, shape index: {}]   ;;  %s12457_s1 = inlined_call_operand.vmem [shape: f32[1,1,4], index: 1, kind: input, shape index: {}]   ;;  %s12458_s2 = inlined_call_operand.vmem [shape: f32[1,1,4], index: 2, kind: input, shape index: {}]   ;;  %s12459_s3 = inlined_call_operand.vmem [shape: f32[9,4,4], index: 3, kind: input, shape index: {}]   ;;  %s12460_s4 = inlined_call_operand.vmem [shape: f32[1,1,4], index: 4, kind: input, shape index: {}]   ;;  %s12461_s5 = inlined_call_operand.vmem [shape: f32[1,1,4], index: 5, kind: input, shape index: {}]   ;;  %s12462_s6 = inlined_call_operand.vmem [shape: f32[1,1,4], index: 6, kind: input, shape index: {}]   ;;  %s12463_s7 = inlined_call_operand.vmem [shape: f32[9,4,4], index: 7, kind: input, shape index: {}]   ;;  %s12464_s8 = inlined_call_operand.vmem [shape: f32[1,1,4], index: 8, kind: input, shape index: {}]   ;;  %s12465_s9 = inlined_call_operand.vmem [shape: f32[4,1], index: 9, kind: input, shape index: {}]   ;;  %s12466_s10 = inlined_call_operand.vmem [shape: f32[1,4], index: 10, kind: input, shape index: {}]   ;;  %s12467_s11 = inlined_call_operand.vmem [shape: f32[2,16,16,4], index: 11, kind: output, shape index: {}]  }
   0x1 LB: > { %s6902_s18 = sadd.s32 4294967295, %s9801_s17   ;;  %p6906_p0 = scmp.ge.s32.totalorder %s9801_s17, 1  ;;  %s9801_s17 = sphi %s9866_s17, %s21_s17  }
   0x2   : > { %p337_p1 = scmp.lt.s32.totalorder %s9801_s17, 3 }
   0x4   : > { %p338_p2 = pnand %p6906_p0, %p337_p1 }
   0x5   : > { %v6913_v0 = vld [vmem:[%s12459_s3 + $0xc] sm:$0xf] (!%p338_p2)  ;;  %vm905_vm0 = vcmask (!%p338_p2), 1043456   ;;  %p377_p3 = scmp.lt.s32.totalorder (!%p338_p2), %s6902_s18, 1  ;;  %v9881_v1 = vld [vmem:[%s12459_s3] sm:$0xf] (!%p338_p2) }
   0x6   : > { %341 = sbr.rel (%p338_p2) target bundleno = 2308 (0x904), region = 64  ;;  %8168 = vmatprep.subr.msk.mxu0 (!%p338_p2), %vm905_vm0, %v6913_v0  ;;  %v9892_v2 = vld [vmem:[%s12457_s1] ss:$0 sm:$0xff] (!%p338_p2)  ;;  %vm658_vm1 = vcmask (!%p338_p2), 31744   ;;  %vm714_vm2 = vcmask (!%p338_p2), 24576   ;;  %vm9805_vm3 = vmmov (!%p338_p2), 0  }
   0x7   : > { %8169 = vmatpush3.msk.msra.mxu0 (!%p338_p2), %vm905_vm0, %v6913_v0  ;;  %v9904_v3 = vld [vmem:[%s12458_s2] ss:$0 sm:$0xff] (!%p338_p2)  ;;  %vm6669_vm4 = vcmask (!%p338_p2), 1040384   ;;  %vm6665_vm5 = vcmask (!%p338_p2), 7168  }
   0x8   : > { %8218 = vmatprep.subr.msk.mxu0 (!%p338_p2), %vm905_vm0, %v9881_v1 }
   0xd   : > { %s12469_s18 = smov (!%p377_p3, %s6902_s18), 1 }
   0xe   : > { %s7533_s23 = sshll.u32 %s12469_s18, 8 }
   0xf   : > { %s9899_s28 = scalar_lea.vmem %s12456_s0, %s7533_s23  ;;  %s12331_s13 = scalar_lea.vmem %s12467_s11, %s7533_s23 }
  0x10   : > { %v387_v4 = vld [vmem:[%s9899_s28] sm:$0xff]  ;;  %v388_v5 = vld [vmem:[%s9899_s28 + $0x8] sm:$0xff]  ;;  %v389_v6 = vld [vmem:[%s9899_s28 + $0x10] sm:$0xff] }
  0x11   : > { %v426_v7 = vmul.f32 %v9892_v2, %v387_v4  ;;  %v427_v8 = vmul.f32 %v9892_v2, %v388_v5  ;;  %v428_v9 = vmul.f32 %v9892_v2, %v389_v6  ;;  %v390_v10 = vld [vmem:[%s9899_s28 + $0x18] sm:$0xff]  ;;  %v391_v11 = vld [vmem:[%s9899_s28 + $0x20] sm:$0xff]  ;;  %v392_v12 = vld [vmem:[%s9899_s28 + $0x28] sm:$0xff] }
  0x12   : > { %v429_v13 = vmul.f32 %v9892_v2, %v390_v10  ;;  %v430_v14 = vmul.f32 %v9892_v2, %v391_v11  ;;  %v431_v15 = vmul.f32 %v9892_v2, %v392_v12  ;;  %v393_v16 = vld [vmem:[%s9899_s28 + $0x30] sm:$0xff]  ;;  %v394_v17 = vld [vmem:[%s9899_s28 + $0x38] sm:$0xff]  ;;  %v395_v26 = vld [vmem:[%s9899_s28 + $0x40] sm:$0xff] }
  0x13   : > { %v9921_v18 = vadd.f32 %v9904_v3, %v426_v7  ;;  %v9924_v19 = vadd.f32 %v9904_v3, %v427_v8  ;;  %v9927_v20 = vadd.f32 %v9904_v3, %v428_v9  ;;  %v432_v21 = vmul.f32 %v9892_v2, %v393_v16  ;;  %v396_v27 = vld [vmem:[%s9899_s28 + $0x48] sm:$0xff]  ;;  %v397_v32 = vld [vmem:[%s9899_s28 + $0x50] sm:$0xff]  ;;  %v398_v33 = vld [vmem:[%s9899_s28 + $0x58] sm:$0xff] }
  0x14   : > { %v9931_v22 = vadd.f32 %v9904_v3, %v429_v13  ;;  %v9934_v23 = vadd.f32 %v9904_v3, %v430_v14  ;;  %v9937_v24 = vadd.f32 %v9904_v3, %v431_v15  ;;  %v433_v25 = vmul.f32 %v9892_v2, %v394_v17  ;;  %v399_v38 = vld [vmem:[%s9899_s28 + $0x60] sm:$0xff]  ;;  %v400_v42 = vld [vmem:[%s9899_s28 + $0x68] sm:$0xff]  ;;  %v401_v52 = vld [vmem:[%s9899_s28 + $0x70] sm:$0xff] }
  0x15   : > { %v497_v28 = vmul.f32 0.5, %v9921_v18  ;;  %v498_v29 = vmul.f32 0.5, %v9924_v19  ;;  %v499_v30 = vmul.f32 0.5, %v9927_v20  ;;  %v9946_v31 = vadd.f32 %v9904_v3, %v432_v21  ;;  %v402_v53 = vld [vmem:[%s9899_s28 + $0x78] sm:$0xff]  ;;  %v403_v57 = vld [vmem:[%s9899_s28 + $0x80] sm:$0xff]  ;;  %v404_v58 = vld [vmem:[%s9899_s28 + $0x88] sm:$0xff] }
  0x16   : > { %v500_v34 = vmul.f32 0.5, %v9931_v22  ;;  %v501_v35 = vmul.f32 0.5, %v9934_v23  ;;  %v502_v36 = vmul.f32 0.5, %v9937_v24  ;;  %v9954_v37 = vadd.f32 %v9904_v3, %v433_v25  ;;  %v405_v62 = vld [vmem:[%s9899_s28 + $0x90] sm:$0xff]  ;;  %v406_v5 = vld [vmem:[%s9899_s28 + $0x98] sm:$0xff]  ;;  %v407_v25 = vld [vmem:[%s9899_s28 + $0xa0] sm:$0xff] }
  0x17   : > { %9633 = vtanh.f32 %v497_v28  ;;  %v503_v39 = vmul.f32 0.5, %v9946_v31  ;;  %v434_v40 = vmul.f32 %v9892_v2, %v395_v26  ;;  %v435_v41 = vmul.f32 %v9892_v2, %v396_v27 }
  0x18   : > { %9635 = vtanh.f32 %v498_v29  ;;  %v504_v43 = vmul.f32 0.5, %v9954_v37  ;;  %v436_v44 = vmul.f32 %v9892_v2, %v397_v32  ;;  %v437_v45 = vmul.f32 %v9892_v2, %v398_v33 }
  0x19   : > { %9637 = vtanh.f32 %v499_v30  ;;  %v9965_v46 = vadd.f32 %v9904_v3, %v434_v40  ;;  %v9968_v47 = vadd.f32 %v9904_v3, %v435_v41  ;;  %v438_v48 = vmul.f32 %v9892_v2, %v399_v38 }
  0x1a   : > { %9639 = vtanh.f32 %v500_v34  ;;  %v9972_v49 = vadd.f32 %v9904_v3, %v436_v44  ;;  %v9975_v50 = vadd.f32 %v9904_v3, %v437_v45  ;;  %v439_v51 = vmul.f32 %v9892_v2, %v400_v42 }
  0x1b   : > { %9641 = vtanh.f32 %v501_v35  ;;  %v505_v54 = vmul.f32 0.5, %v9965_v46  ;;  %v506_v55 = vmul.f32 0.5, %v9968_v47  ;;  %v9983_v56 = vadd.f32 %v9904_v3, %v438_v48 }
  0x1c   : > { %9643 = vtanh.f32 %v502_v36  ;;  %v507_v59 = vmul.f32 0.5, %v9972_v49  ;;  %v508_v60 = vmul.f32 0.5, %v9975_v50  ;;  %v9990_v61 = vadd.f32 %v9904_v3, %v439_v51 }
  0x1d   : > { %9645 = vtanh.f32 %v503_v39  ;;  %v509_v63 = vmul.f32 0.5, %v9983_v56  ;;  %v440_v0 = vmul.f32 %v9892_v2, %v401_v52  ;;  %v441_v4 = vmul.f32 %v9892_v2, %v402_v53 }
  0x1e   : > { %9647 = vtanh.f32 %v504_v43  ;;  %v510_v6 = vmul.f32 0.5, %v9990_v61  ;;  %v442_v7 = vmul.f32 %v9892_v2, %v403_v57  ;;  %v443_v8 = vmul.f32 %v9892_v2, %v404_v58 }
  0x1f   : > { %9649 = vtanh.f32 %v505_v54  ;;  %v10001_v9 = vadd.f32 %v9904_v3, %v440_v0  ;;  %v10004_v10 = vadd.f32 %v9904_v3, %v441_v4  ;;  %v444_v11 = vmul.f32 %v9892_v2, %v405_v62  ;;  %v408_v0 = vld [vmem:[%s9899_s28 + $0xa8] sm:$0xff] }
  0x20   : > { %9651 = vtanh.f32 %v506_v55  ;;  %v10008_v12 = vadd.f32 %v9904_v3, %v442_v7  ;;  %v10011_v13 = vadd.f32 %v9904_v3, %v443_v8  ;;  %v445_v14 = vmul.f32 %v9892_v2, %v406_v5 }
  0x21   : > { %v9634_v15 = vpop.eup %9633  ;;  %9653 = vtanh.f32 %v507_v59  ;;  %v511_v16 = vmul.f32 0.5, %v10001_v9  ;;  %v512_v17 = vmul.f32 0.5, %v10004_v10  ;;  %v10017_v21 = vadd.f32 %v9904_v3, %v444_v11 }
  0x22   : > { %v9636_v26 = vpop.eup %9635  ;;  %v561_v27 = vmul.f32 0.5, %v9634_v15  ;;  %9655 = vtanh.f32 %v508_v60  ;;  %v513_v28 = vmul.f32 0.5, %v10008_v12  ;;  %v514_v29 = vmul.f32 0.5, %v10011_v13 }
  0x23   : > { %v9638_v30 = vpop.eup %9637  ;;  %v562_v32 = vmul.f32 0.5, %v9636_v26  ;;  %9657 = vtanh.f32 %v509_v63  ;;  %v515_v33 = vmul.f32 0.5, %v10017_v21  ;;  %v10024_v34 = vadd.f32 %v9904_v3, %v445_v14 }
  0x24   : > { %v9640_v35 = vpop.eup %9639  ;;  %v593_v36 = vadd.f32 0.5, %v561_v27  ;;  %v563_v38 = vmul.f32 0.5, %v9638_v30  ;;  %9659 = vtanh.f32 %v510_v6  ;;  %v446_v39 = vmul.f32 %v9892_v2, %v407_v25 }
  0x25   : > { %v9642_v40 = vpop.eup %9641  ;;  %v594_v41 = vadd.f32 0.5, %v562_v32  ;;  %v564_v42 = vmul.f32 0.5, %v9640_v35  ;;  %9661 = vtanh.f32 %v511_v16  ;;  %v516_v43 = vmul.f32 0.5, %v10024_v34 }
  0x26   : > { %v9644_v44 = vpop.eup %9643  ;;  %v625_v45 = vmul.f32 %v593_v36, %v9921_v18  ;;  %v595_v48 = vadd.f32 0.5, %v563_v38  ;;  %v565_v51 = vmul.f32 0.5, %v9642_v40  ;;  %9663 = vtanh.f32 %v512_v17  ;;  %v409_v36 = vld [vmem:[%s9899_s28 + $0xb0] sm:$0xff] }
  0x27   : > { %v9646_v52 = vpop.eup %9645  ;;  %v626_v53 = vmul.f32 %v594_v41, %v9924_v19  ;;  %v596_v54 = vadd.f32 0.5, %v564_v42  ;;  %v566_v55 = vmul.f32 0.5, %v9644_v44  ;;  %9665 = vtanh.f32 %v513_v28 }
  0x28   : > { %v9648_v57 = vpop.eup %9647  ;;  %659 = vst.msk [vmem:[#allocation2 + $0x19] sm:$0xff] %vm658_vm1, %v625_v45  ;;  %691 = vst.msk [vmem:[#allocation2 + $0x1] sm:$0xff] %vm658_vm1, %v625_v45  ;;  %v627_v58 = vmul.f32 %v595_v48, %v9927_v20  ;;  %v597_v59 = vadd.f32 0.5, %v565_v51  ;;  %v567_v60 = vmul.f32 0.5, %v9646_v52  ;;  %9667 = vtanh.f32 %v514_v29 }
  0x29   : > { %v9650_v18 = vpop.eup %9649  ;;  %660 = vst.msk [vmem:[#allocation2 + $0x21] sm:$0xff] %vm658_vm1, %v626_v53  ;;  %692 = vst.msk [vmem:[#allocation2 + $0x9] sm:$0xff] %vm658_vm1, %v626_v53  ;;  %v628_v19 = vmul.f32 %v596_v54, %v9931_v22  ;;  %v598_v62 = vadd.f32 0.5, %v566_v55  ;;  %v568_v63 = vmul.f32 0.5, %v9648_v57  ;;  %9669 = vtanh.f32 %v515_v33  ;;  %v410_v57 = vld [vmem:[%s9899_s28 + $0xb8] sm:$0xff] }
  0x2a   : > { %v9652_v4 = vpop.eup %9651  ;;  %661 = vst.msk [vmem:[#allocation2 + $0x31] sm:$0xff] %vm658_vm1, %v627_v58  ;;  %v629_v5 = vmul.f32 %v597_v59, %v9934_v23  ;;  %v599_v20 = vadd.f32 0.5, %v567_v60  ;;  %v569_v6 = vmul.f32 0.5, %v9650_v18  ;;  %9671 = vtanh.f32 %v516_v43 }
  0x2b   : > { %v9654_v7 = vpop.eup %9653  ;;  %662 = vst.msk [vmem:[#allocation2 + $0x39] sm:$0xff] %vm658_vm1, %v628_v19  ;;  %v630_v8 = vmul.f32 %v598_v62, %v9937_v24  ;;  %v600_v11 = vadd.f32 0.5, %v568_v63  ;;  %v570_v14 = vmul.f32 0.5, %v9652_v4  ;;  %v10042_v22 = vadd.f32 %v9904_v3, %v446_v39  ;;  %v411_v4 = vld [vmem:[%s9899_s28 + $0xc0] sm:$0xff] }
  0x2c   : > { %v9656_v15 = vpop.eup %9655  ;;  %663 = vst.msk [vmem:[#allocation2 + $0x49] sm:$0xff] %vm658_vm1, %v629_v5  ;;  %v631_v16 = vmul.f32 %v599_v20, %v9946_v31  ;;  %v601_v23 = vadd.f32 0.5, %v569_v6  ;;  %v571_v17 = vmul.f32 0.5, %v9654_v7  ;;  %v447_v25 = vmul.f32 %v9892_v2, %v408_v0 }
  0x2d   : > { %v9658_v26 = vpop.eup %9657  ;;  %664 = vst.msk [vmem:[#allocation2 + $0x51] sm:$0xff] %vm658_vm1, %v630_v8  ;;  %v632_v24 = vmul.f32 %v600_v11, %v9954_v37  ;;  %v602_v27 = vadd.f32 0.5, %v570_v14  ;;  %v572_v28 = vmul.f32 0.5, %v9656_v15  ;;  %v517_v29 = vmul.f32 0.5, %v10042_v22 }
  0x2e   : > { %v9660_v30 = vpop.eup %9659  ;;  %665 = vst.msk [vmem:[#allocation2 + $0x61] sm:$0xff] %vm658_vm1, %v631_v16  ;;  %v633_v32 = vmul.f32 %v601_v23, %v9965_v46  ;;  %v603_v31 = vadd.f32 0.5, %v571_v17  ;;  %v573_v33 = vmul.f32 0.5, %v9658_v26  ;;  %v10053_v35 = vadd.f32 %v9904_v3, %v447_v25  ;;  %v413_v23 = vld [vmem:[%s9899_s28 + $0xd0] sm:$0xff] }
  0x2f   : > { %v9662_v38 = vpop.eup %9661  ;;  %v697_v39 = vld [vmem:[#allocation2 + $0x19] sm:$0x1]  ;;  %666 = vst.msk [vmem:[#allocation2 + $0x69] sm:$0xff] %vm658_vm1, %v632_v24  ;;  %v634_v37 = vmul.f32 %v602_v27, %v9968_v47  ;;  %v604_v40 = vadd.f32 0.5, %v572_v28  ;;  %v574_v41 = vmul.f32 0.5, %v9660_v30  ;;  %9673 = vtanh.f32 %v517_v29  ;;  %v415_v27 = vld [vmem:[%s9899_s28 + $0xe0] sm:$0xff] }
  0x30   : > { %v696_v42 = vld [vmem:[#allocation2 + $0x1] sm:$0x1]  ;;  %v9664_v43 = vpop.eup %9663  ;;  %716 = vst.msk [vmem:[#allocation2 + $0x18] sm:$0x1] %vm714_vm2, %v697_v39  ;;  %v635_v46 = vmul.f32 %v603_v31, %v9972_v49  ;;  %v605_v44 = vadd.f32 0.5, %v573_v33  ;;  %v575_v45 = vmul.f32 0.5, %v9662_v38  ;;  %v448_v55 = vmul.f32 %v9892_v2, %v409_v36 }
  0x31   : > { %667 = vst.msk [vmem:[#allocation2 + $0x79] sm:$0xff] %vm658_vm1, %v633_v32  ;;  %v518_v48 = vmul.f32 0.5, %v10053_v35  ;;  %v9666_v51 = vpop.eup %9665  ;;  %v698_v47 = vld [vmem:[#allocation2 + $0x31] sm:$0x1]  ;;  %668 = vst.msk [vmem:[#allocation2 + $0x81] sm:$0xff] %vm658_vm1, %v634_v37  ;;  %v636_v52 = vmul.f32 %v604_v40, %v9975_v50  ;;  %v606_v53 = vadd.f32 0.5, %v574_v41  ;;  %v449_v7 = vmul.f32 %v9892_v2, %v410_v57 }
  0x32   : > { %715 = vst.msk [vmem:[#allocation2] sm:$0x1] %vm714_vm2, %v696_v42  ;;  %v576_v54 = vmul.f32 0.5, %v9664_v43  ;;  %v9668_v58 = vpop.eup %9667  ;;  %717 = vst.msk [vmem:[#allocation2 + $0x30] sm:$0x1] %vm714_vm2, %v698_v47  ;;  %v637_v49 = vmul.f32 %v605_v44, %v9983_v56  ;;  %v607_v59 = vadd.f32 0.5, %v575_v45  ;;  %v10073_v0 = vadd.f32 %v9904_v3, %v448_v55 }
  0x33   : > { %669 = vst.msk [vmem:[#allocation2 + $0x91] sm:$0xff] %vm658_vm1, %v635_v46  ;;  %v577_v60 = vmul.f32 0.5, %v9666_v51  ;;  %9675 = vtanh.f32 %v518_v48  ;;  %v9670_v18 = vpop.eup %9669  ;;  %v699_v19 = vld [vmem:[#allocation2 + $0x49] sm:$0x1]  ;;  %670 = vst.msk [vmem:[#allocation2 + $0x99] sm:$0xff] %vm658_vm1, %v636_v52  ;;  %v638_v50 = vmul.f32 %v606_v53, %v9990_v61  ;;  %v578_v63 = vmul.f32 0.5, %v9668_v58 }
  0x34   : > { %v608_v62 = vadd.f32 0.5, %v576_v54  ;;  %v9672_v5 = vpop.eup %9671  ;;  %718 = vst.msk [vmem:[#allocation2 + $0x48] sm:$0x1] %vm714_vm2, %v699_v19  ;;  %v639_v56 = vmul.f32 %v607_v59, %v10001_v9  ;;  %v579_v6 = vmul.f32 0.5, %v9670_v18  ;;  %v412_v61 = vld [vmem:[%s9899_s28 + $0xc8] sm:$0xff]  ;;  %v519_v16 = vmul.f32 0.5, %v10073_v0 }
  0x35   : > { %671 = vst.msk [vmem:[#allocation2 + $0xa9] sm:$0xff] %vm658_vm1, %v637_v49  ;;  %v609_v20 = vadd.f32 0.5, %v577_v60  ;;  %v700_v8 = vld [vmem:[#allocation2 + $0x61] sm:$0x1]  ;;  %672 = vst.msk [vmem:[#allocation2 + $0xb1] sm:$0xff] %vm658_vm1, %v638_v50  ;;  %v610_v14 = vadd.f32 0.5, %v578_v63  ;;  %v10091_v26 = vadd.f32 %v9904_v3, %v449_v7  ;;  %v450_v24 = vmul.f32 %v9892_v2, %v411_v4 }
  0x36   : > { %v640_v11 = vmul.f32 %v608_v62, %v10004_v10  ;;  %v580_v15 = vmul.f32 0.5, %v9672_v5  ;;  %v10085_v17 = vld [vmem:[#allocation2 + $0x20] sm:$0xff]  ;;  %719 = vst.msk [vmem:[#allocation2 + $0x60] sm:$0x1] %vm714_vm2, %v700_v8  ;;  %v611_v25 = vadd.f32 0.5, %v579_v6  ;;  %v414_v10 = vld [vmem:[%s9899_s28 + $0xd8] sm:$0xff]  ;;  %9677 = vtanh.f32 %v519_v16 }
  0x37   : > { %673 = vst.msk [vmem:[#allocation2 + $0xc1] sm:$0xff] %vm658_vm1, %v639_v56  ;;  %v641_v9 = vmul.f32 %v609_v20, %v10008_v12  ;;  %v10096_v28 = vld [vmem:[#allocation2 + $0x18] sm:$0xff]  ;;  %v642_v30 = vmul.f32 %v610_v14, %v10011_v13  ;;  %v451_v12 = vmul.f32 %v9892_v2, %v412_v61  ;;  %v520_v33 = vmul.f32 0.5, %v10091_v26  ;;  %v416_v38 = vld [vmem:[%s9899_s28 + $0xe8] sm:$0xff]  ;;  %v417_v44 = vld [vmem:[%s9899_s28 + $0xf0] sm:$0xff] }
  0x38   : > { %v701_v29 = vld [vmem:[#allocation2 + $0x79] sm:$0x1]  ;;  %674 = vst.msk [vmem:[#allocation2 + $0xc9] sm:$0xff] %vm658_vm1, %v640_v11  ;;  %v612_v32 = vadd.f32 0.5, %v580_v15  ;;  %8170 = vmatprep.mubr.msk.f32.mxu0 %vm658_vm1, %v10096_v28  ;;  %v643_v31 = vmul.f32 %v611_v25, %v10017_v21  ;;  %v10108_v36 = vadd.f32 %v9904_v3, %v450_v24  ;;  %v452_v13 = vmul.f32 %v9892_v2, %v413_v23  ;;  %v10164_v63 = vld [vmem:[#allocation2 + $0x50] sm:$0xff] }
  0x39   : > { %720 = vst.msk [vmem:[#allocation2 + $0x78] sm:$0x1] %vm714_vm2, %v701_v29  ;;  %v10115_v39 = vld [vmem:[%s12459_s3 + $0x18] sm:$0xf]  ;;  %v9674_v37 = vpop.eup %9673  ;;  %8171 = vmatmul.mubr.msk.f32.vlgmr.msra.gmra.mrb[0].mxu0 %vm658_vm1, %v10085_v17  ;;  %v10119_v40 = vld [vmem:[#allocation2 + $0x30] sm:$0xff]  ;;  %v10124_v42 = vadd.f32 %v9904_v3, %v451_v12  ;;  %v453_v43 = vmul.f32 %v9892_v2, %v414_v10  ;;  %v454_v46 = vmul.f32 %v9892_v2, %v415_v27  ;;  %9679 = vtanh.f32 %v520_v33  ;;  %v10200_v27 = vld [vmem:[#allocation2 + $0x80] sm:$0xff] }
  0x3a   : > { %675 = vst.msk [vmem:[#allocation2 + $0xd9] sm:$0xff] %vm658_vm1, %v641_v9  ;;  %v702_v21 = vld [vmem:[#allocation2 + $0x91] sm:$0x1]  ;;  %676 = vst.msk [vmem:[#allocation2 + $0xe1] sm:$0xff] %vm658_vm1, %v642_v30  ;;  %v644_v41 = vmul.f32 %v612_v32, %v10024_v34  ;;  %8173 = vmatprep.mubr.msk.f32.mxu0 %vm658_vm1, %v10119_v40  ;;  %v10131_v45 = vld [vmem:[#allocation2 + $0x38] sm:$0xff]  ;;  %8219 = vmatpush3.msk.msra.mxu0 %vm905_vm0, %v9881_v1  ;;  %v581_v34 = vmul.f32 0.5, %v9674_v37  ;;  %v10139_v51 = vadd.f32 %v9904_v3, %v452_v13 }
  0x3b   : > { %721 = vst.msk [vmem:[#allocation2 + $0x90] sm:$0x1] %vm714_vm2, %v702_v21  ;;  %v521_v48 = vmul.f32 0.5, %v10108_v36  ;;  %v10141_v47 = vld [vmem:[#allocation2 + $0x48] sm:$0xff]  ;;  %v522_v53 = vmul.f32 0.5, %v10124_v42  ;;  %v10146_v54 = vadd.f32 %v9904_v3, %v453_v43  ;;  %v10149_v1 = vadd.f32 %v9904_v3, %v454_v46  ;;  %8268 = vmatprep.subr.msk.mxu0 %vm905_vm0, %v10115_v39  ;;  %v418_v60 = vld [vmem:[%s9899_s28 + $0xf8] sm:$0xff] }
  0x3c   : > { %677 = vst.msk [vmem:[#allocation2 + $0xf1] sm:$0xff] %vm658_vm1, %v643_v31  ;;  %v703_v52 = vld [vmem:[#allocation2 + $0xa9] sm:$0x1]  ;;  %678 = vst.msk [vmem:[#allocation2 + $0xf9] sm:$0xff] %vm658_vm1, %v644_v41  ;;  %v455_v55 = vmul.f32 %v9892_v2, %v416_v38  ;;  %v613_v58 = vadd.f32 0.5, %v581_v34  ;;  %v523_v49 = vmul.f32 0.5, %v10139_v51  ;;  %v456_v59 = vmul.f32 %v9892_v2, %v417_v44 }
  0x3d   : > { %v9676_v57 = vpop.eup %9675  ;;  %722 = vst.msk [vmem:[#allocation2 + $0xa8] sm:$0x1] %vm714_vm2, %v703_v52  ;;  %9681 = vtanh.f32 %v521_v48  ;;  %8174 = vmatmul.mubr.msk.f32.gmra.mrb[2].mxu0 %vm658_vm1, %v10131_v45  ;;  %v524_v50 = vmul.f32 0.5, %v10146_v54  ;;  %v525_v62 = vmul.f32 0.5, %v10149_v1  ;;  %v10174_v20 = vld [vmem:[#allocation2 + $0x60] sm:$0xff]  ;;  %v457_v61 = vmul.f32 %v9892_v2, %v418_v60  ;;  %v10189_v2 = vld [vmem:[#allocation2 + $0x68] sm:$0xff] }
  0x3e   : > { %v704_v18 = vld [vmem:[#allocation2 + $0xc1] sm:$0x1]  ;;  %v582_v19 = vmul.f32 0.5, %v9676_v57  ;;  %9683 = vtanh.f32 %v522_v53  ;;  %8176 = vmatprep.mubr.msk.f32.mxu0 %vm658_vm1, %v10141_v47  ;;  %v645_v4 = vmul.f32 %v613_v58, %v10042_v22  ;;  %v10169_v5 = vadd.f32 %v9904_v3, %v455_v55  ;;  %v10212_v46 = vld [vmem:[#allocation2 + $0x98] sm:$0xff] }
  0x3f   : > { %723 = vst.msk [vmem:[#allocation2 + $0xc0] sm:$0x1] %vm714_vm2, %v704_v18  ;;  %9685 = vtanh.f32 %v523_v49  ;;  %v10172_v56 = vadd.f32 %v9904_v3, %v456_v59  ;;  %v10185_v16 = vadd.f32 %v9904_v3, %v457_v61 }
  0x40   : > { %v614_v7 = vadd.f32 0.5, %v582_v19  ;;  %9687 = vtanh.f32 %v524_v50  ;;  %679 = vst.msk [vmem:[#allocation2 + $0x109] sm:$0xff] %vm658_vm1, %v645_v4  ;;  %v526_v22 = vmul.f32 0.5, %v10169_v5  ;;  %v9678_v11 = vpop.eup %9677  ;;  %v10192_v9 = vld [vmem:[#allocation2 + $0x78] sm:$0xff] }
  0x41   : > { %v705_v6 = vld [vmem:[#allocation2 + $0xd9] sm:$0x1]  ;;  %9689 = vtanh.f32 %v525_v62  ;;  %v527_v8 = vmul.f32 0.5, %v10172_v56  ;;  %8177 = vmatmul.mubr.msk.f32.gmra.mrb[4].mxu0 %vm658_vm1, %v10164_v63  ;;  %v583_v23 = vmul.f32 0.5, %v9678_v11  ;;  %v528_v25 = vmul.f32 0.5, %v10185_v16 }
  0x42   : > { %724 = vst.msk [vmem:[#allocation2 + $0xd8] sm:$0x1] %vm714_vm2, %v705_v6  ;;  %v646_v15 = vmul.f32 %v614_v7, %v10053_v35  ;;  %8179 = vmatprep.mubr.msk.f32.mxu0 %vm658_vm1, %v10174_v20  ;;  %9691 = vtanh.f32 %v526_v22  ;;  %v10203_v32 = vld [vmem:[#allocation2 + $0x90] sm:$0xff]  ;;  %v10241_v22 = vld [vmem:[#allocation2 + $0xc8] sm:$0xff] }
  0x43   : > { %v706_v14 = vld [vmem:[#allocation2 + $0xf1] sm:$0x1]  ;;  %9693 = vtanh.f32 %v527_v8  ;;  %v9680_v35 = vpop.eup %9679  ;;  %v615_v24 = vadd.f32 0.5, %v583_v23 }
  0x44   : > { %725 = vst.msk [vmem:[#allocation2 + $0xf0] sm:$0x1] %vm714_vm2, %v706_v14  ;;  %v584_v3 = vmul.f32 0.5, %v9680_v35  ;;  %9695 = vtanh.f32 %v528_v25  ;;  %v10214_v48 = vld [vmem:[#allocation2 + $0xa8] sm:$0xff]  ;;  %v10267_v25 = vld [vmem:[#allocation2 + $0xf8] sm:$0xff] }
  0x45   : > { %680 = vst.msk [vmem:[#allocation2 + $0x111] sm:$0xff] %vm658_vm1, %v646_v15  ;;  %8180 = vmatmul.mubr.msk.f32.gmra.mrb[6].mxu0 %vm658_vm1, %v10189_v2  ;;  %v647_v29 = vmul.f32 %v615_v24, %v10073_v0 }
  0x46   : > { %8182 = vmatprep.mubr.msk.f32.mxu0 %vm658_vm1, %v10192_v9  ;;  %v616_v31 = vadd.f32 0.5, %v584_v3  ;;  %v10229_v62 = vld [vmem:[#allocation2 + $0xc0] sm:$0xff] }
  0x47   : > { %v9682_v10 = vpop.eup %9681  ;;  %v707_v12 = vld [vmem:[#allocation2 + $0x109] sm:$0x1]  ;;  %681 = vst.msk [vmem:[#allocation2 + $0x121] sm:$0xff] %vm658_vm1, %v647_v29 }
  0x48   : > { %v9684_v30 = vpop.eup %9683  ;;  %v585_v33 = vmul.f32 0.5, %v9682_v10  ;;  %726 = vst.msk [vmem:[#allocation2 + $0x108] sm:$0x1] %vm714_vm2, %v707_v12  ;;  %v648_v21 = vmul.f32 %v616_v31, %v10091_v26 }
  0x49   : > { %v9686_v13 = vpop.eup %9685  ;;  %v586_v38 = vmul.f32 0.5, %v9684_v30  ;;  %8183 = vmatmul.mubr.msk.f32.gmra.mrb[8].mxu0 %vm658_vm1, %v10200_v27  ;;  %v10244_v11 = vld [vmem:[#allocation2 + $0xd8] sm:$0xff] }
  0x4a   : > { %v9688_v37 = vpop.eup %9687  ;;  %v617_v41 = vadd.f32 0.5, %v585_v33  ;;  %v587_v0 = vmul.f32 0.5, %v9686_v13  ;;  %8185 = vmatprep.mubr.msk.f32.mxu0 %vm658_vm1, %v10203_v32  ;;  %682 = vst.msk [vmem:[#allocation2 + $0x129] sm:$0xff] %vm658_vm1, %v648_v21 }
  0x4b   : > { %v9690_v43 = vpop.eup %9689  ;;  %v618_v44 = vadd.f32 0.5, %v586_v38  ;;  %v588_v34 = vmul.f32 0.5, %v9688_v37  ;;  %v10259_v23 = vld [vmem:[#allocation2 + $0xf0] sm:$0xff] }
  0x4c   : > { %v649_v52 = vmul.f32 %v617_v41, %v10108_v36  ;;  %v619_v53 = vadd.f32 0.5, %v587_v0  ;;  %v589_v55 = vmul.f32 0.5, %v9690_v43  ;;  %v9692_v57 = vpop.eup %9691  ;;  %v10225_v36 = vld [vmem:[#allocation2 + $0xb0] sm:$0xff]  ;;  %v770_v0 = vld [vmem:[#allocation2] sm:$0xff]  ;;  %v771_v43 = vld [vmem:[#allocation2 + $0x8] sm:$0xff] }
  0x4d   : > { %v650_v26 = vmul.f32 %v618_v44, %v10124_v42  ;;  %v620_v58 = vadd.f32 0.5, %v588_v34  ;;  %v9694_v49 = vpop.eup %9693  ;;  %8186 = vmatmul.mubr.msk.f32.gmra.mrb[10].mxu0 %vm658_vm1, %v10212_v46  ;;  %v590_v18 = vmul.f32 0.5, %v9692_v57  ;;  %v10276_v3 = vld [vmem:[#allocation2 + $0x110] sm:$0xff]  ;;  %v10500_v34 = vld [vmem:[#allocation2 + $0x81] sm:$0xff] }
  0x4e   : > { %683 = vst.msk [vmem:[#allocation2 + $0x139] sm:$0xff] %vm658_vm1, %v649_v52  ;;  %v651_v59 = vmul.f32 %v619_v53, %v10139_v51  ;;  %v621_v60 = vadd.f32 0.5, %v589_v55  ;;  %8188 = vmatprep.mubr.msk.f32.mxu0 %vm658_vm1, %v10214_v48  ;;  %v591_v19 = vmul.f32 0.5, %v9694_v49  ;;  %v9696_v50 = vpop.eup %9695  ;;  %v708_v4 = vld [vmem:[#allocation2 + $0x121] sm:$0x1]  ;;  %v10508_v52 = vld [vmem:[#allocation2 + $0x99] sm:$0xff] }
  0x4f   : > { %684 = vst.msk [vmem:[#allocation2 + $0x141] sm:$0xff] %vm658_vm1, %v650_v26  ;;  %v652_v42 = vmul.f32 %v620_v58, %v10146_v54  ;;  %v622_v6 = vadd.f32 0.5, %v590_v18  ;;  %v592_v61 = vmul.f32 0.5, %v9696_v50  ;;  %v10269_v35 = vld [vmem:[#allocation2 + $0x108] sm:$0xff]  ;;  %v7015_v44 = vld [vmem:[%s12459_s3 + $0x10] sm:$0xf] }
  0x50   : > { %685 = vst.msk [vmem:[#allocation2 + $0x151] sm:$0xff] %vm658_vm1, %v651_v59  ;;  %v653_v51 = vmul.f32 %v621_v60, %v10149_v1  ;;  %v623_v7 = vadd.f32 0.5, %v591_v19  ;;  %v10510_v53 = vld [vmem:[#allocation2 + $0xa9] sm:$0xff]  ;;  %v10516_v55 = vld [vmem:[#allocation2 + $0xb1] sm:$0xff]  ;;  %v10518_v57 = vld [vmem:[#allocation2 + $0xc1] sm:$0xff] }
  0x51   : > { %727 = vst.msk [vmem:[#allocation2 + $0x120] sm:$0x1] %vm714_vm2, %v708_v4  ;;  %8189 = vmatmul.mubr.msk.f32.gmra.mrb[12].mxu0 %vm658_vm1, %v10225_v36  ;;  %v654_v54 = vmul.f32 %v622_v6, %v10169_v5  ;;  %v624_v8 = vadd.f32 0.5, %v592_v61  ;;  %v10255_v5 = vld [vmem:[#allocation2 + $0xe0] sm:$0xff]  ;;  %v10284_v29 = vld [vmem:[#allocation2 + $0x128] sm:$0xff]  ;;  %v10534_v59 = vld [vmem:[#allocation2 + $0xf1] sm:$0xff] }
  0x52   : > { %686 = vst.msk [vmem:[#allocation2 + $0x159] sm:$0xff] %vm658_vm1, %v652_v42  ;;  %687 = vst.msk [vmem:[#allocation2 + $0x169] sm:$0xff] %vm658_vm1, %v653_v51  ;;  %8191 = vmatprep.mubr.msk.f32.mxu0 %vm658_vm1, %v10229_v62  ;;  %v655_v1 = vmul.f32 %v623_v7, %v10172_v56  ;;  %v10524_v26 = vld [vmem:[#allocation2 + $0xc9] sm:$0xff]  ;;  %v10526_v58 = vld [vmem:[#allocation2 + $0xd9] sm:$0xff] }
  0x53   : > { %688 = vst.msk [vmem:[#allocation2 + $0x171] sm:$0xff] %vm658_vm1, %v654_v54  ;;  %v656_v15 = vmul.f32 %v624_v8, %v10185_v16  ;;  %v10532_v49 = vld [vmem:[#allocation2 + $0xe1] sm:$0xff]  ;;  %v10540_v60 = vld [vmem:[#allocation2 + $0xf9] sm:$0xff]  ;;  %v10542_v18 = vld [vmem:[#allocation2 + $0x109] sm:$0xff] }
  0x54   : > { %689 = vst.msk [vmem:[#allocation2 + $0x181] sm:$0xff] %vm658_vm1, %v655_v1  ;;  %694 = vst.msk [vmem:[#allocation2 + $0x199] sm:$0xff] %vm658_vm1, %v655_v1  ;;  %v10550_v42 = vld [vmem:[#allocation2 + $0x121] sm:$0xff]  ;;  %v10556_v19 = vld [vmem:[#allocation2 + $0x129] sm:$0xff] }
  0x55   : > { %v709_v14 = vld [vmem:[#allocation2 + $0x139] sm:$0x1]  ;;  %8192 = vmatmul.mubr.msk.f32.gmra.mrb[14].mxu0 %vm658_vm1, %v10241_v22  ;;  %690 = vst.msk [vmem:[#allocation2 + $0x189] sm:$0xff] %vm658_vm1, %v656_v15  ;;  %695 = vst.msk [vmem:[#allocation2 + $0x1a1] sm:$0xff] %vm658_vm1, %v656_v15  ;;  %v734_v54 = vld [vmem:[#allocation2 + $0x28] sm:$0x1] }
  0x56   : > { %728 = vst.msk [vmem:[#allocation2 + $0x138] sm:$0x1] %vm714_vm2, %v709_v14  ;;  %8194 = vmatprep.mubr.msk.f32.mxu0 %vm658_vm1, %v10244_v11  ;;  %v10292_v12 = vld [vmem:[#allocation2 + $0x140] sm:$0xff]  ;;  %752 = vst.msk [vmem:[#allocation2 + $0x29] sm:$0x1] %vm714_vm2, %v734_v54 }
  0x57   : > { %v710_v56 = vld [vmem:[#allocation2 + $0x151] sm:$0x1]  ;;  %v10558_v50 = vld [vmem:[#allocation2 + $0x139] sm:$0xff]  ;;  %v1636_v1 = vld [vmem:[#allocation2 + $0x1] sm:$0xff] }
  0x58   : > { %729 = vst.msk [vmem:[#allocation2 + $0x150] sm:$0x1] %vm714_vm2, %v710_v56  ;;  %v10278_v10 = vld [vmem:[#allocation2 + $0x120] sm:$0xff]  ;;  %v10566_v4 = vld [vmem:[#allocation2 + $0x151] sm:$0xff]  ;;  %v738_v56 = vld [vmem:[#allocation2 + $0x88] sm:$0x1] }
  0x59   : > { %v711_v16 = vld [vmem:[#allocation2 + $0x169] sm:$0x1]  ;;  %8195 = vmatmul.mubr.msk.f32.gmra.mrb[16].mxu0 %vm658_vm1, %v10255_v5  ;;  %v10300_v33 = vld [vmem:[#allocation2 + $0x158] sm:$0xff]  ;;  %v735_v8 = vld [vmem:[#allocation2 + $0x40] sm:$0x1] }
  0x5a   : > { %730 = vst.msk [vmem:[#allocation2 + $0x168] sm:$0x1] %vm714_vm2, %v711_v16  ;;  %8197 = vmatprep.mubr.msk.f32.mxu0 %vm658_vm1, %v10259_v23  ;;  %v10309_v37 = vld [vmem:[#allocation2 + $0x170] sm:$0xff]  ;;  %v10572_v51 = vld [vmem:[#allocation2 + $0x159] sm:$0xff]  ;;  %753 = vst.msk [vmem:[#allocation2 + $0x41] sm:$0x1] %vm714_vm2, %v735_v8 }
  0x5b   : > { %v712_v24 = vld [vmem:[#allocation2 + $0x181] sm:$0x1]  ;;  %v713_v38 = vld [vmem:[#allocation2 + $0x199] sm:$0x1]  ;;  %v10574_v6 = vld [vmem:[#allocation2 + $0x169] sm:$0xff] }
  0x5c   : > { %731 = vst.msk [vmem:[#allocation2 + $0x180] sm:$0x1] %vm714_vm2, %v712_v24  ;;  %732 = vst.msk [vmem:[#allocation2 + $0x198] sm:$0x1] %vm714_vm2, %v713_v38  ;;  %v10317_v41 = vld [vmem:[#allocation2 + $0x188] sm:$0xff]  ;;  %v10580_v7 = vld [vmem:[#allocation2 + $0x171] sm:$0xff] }
  0x5d   : > { %8198 = vmatmul.mubr.msk.f32.gmra.mrb[18].mxu0 %vm658_vm1, %v10267_v25  ;;  %v10286_v30 = vld [vmem:[#allocation2 + $0x138] sm:$0xff]  ;;  %v10582_v61 = vld [vmem:[#allocation2 + $0x181] sm:$0xff]  ;;  %v10598_v14 = vld [vmem:[%s12459_s3 + $0x14] sm:$0xf]  ;;  %756 = vst.msk [vmem:[#allocation2 + $0x89] sm:$0x1] %vm714_vm2, %v738_v56 }
  0x5e   : > { %8200 = vmatprep.mubr.msk.f32.mxu0 %vm658_vm1, %v10269_v35  ;;  %v736_v15 = vld [vmem:[#allocation2 + $0x58] sm:$0x1]  ;;  %v743_v24 = vld [vmem:[#allocation2 + $0x100] sm:$0x1] }
  0x5f   : > { %v10294_v31 = vld [vmem:[#allocation2 + $0x150] sm:$0xff]  ;;  %754 = vst.msk [vmem:[#allocation2 + $0x59] sm:$0x1] %vm714_vm2, %v736_v15  ;;  %v740_v16 = vld [vmem:[#allocation2 + $0xb8] sm:$0x1]  ;;  %v1670_v38 = vld [vmem:[#allocation2 + $0x199] sm:$0xff] }
  0x60   : > { %758 = vst.msk [vmem:[#allocation2 + $0xb9] sm:$0x1] %vm714_vm2, %v740_v16  ;;  %761 = vst.msk [vmem:[#allocation2 + $0x101] sm:$0x1] %vm714_vm2, %v743_v24  ;;  %v11026_v54 = vld [vmem:[%s12460_s4] ss:$0 sm:$0xff] }
  0x61   : > { %8201 = vmatmul.mubr.msk.f32.gmra.mrb[20].mxu0 %vm658_vm1, %v10276_v3  ;;  %v10302_v13 = vld [vmem:[#allocation2 + $0x168] sm:$0xff] }
  0x62   : > { %8203 = vmatprep.mubr.msk.f32.mxu0 %vm658_vm1, %v10278_v10 }
  0x63   : > { %v10311_v21 = vld [vmem:[#allocation2 + $0x180] sm:$0xff] }
  0x65   : > { %8204 = vmatmul.mubr.msk.f32.gmra.mrb[22].mxu0 %vm658_vm1, %v10284_v29 }
  0x66   : > { %8206 = vmatprep.mubr.msk.f32.mxu0 %vm658_vm1, %v10286_v30 }
  0x69   : > { %8207 = vmatmul.mubr.msk.f32.gmra.mrb[24].mxu0 %vm658_vm1, %v10292_v12 }
  0x6a   : > { %8209 = vmatprep.mubr.msk.f32.mxu0 %vm658_vm1, %v10294_v31 }
  0x6d   : > { %8210 = vmatmul.mubr.msk.f32.gmra.mrb[26].mxu0 %vm658_vm1, %v10300_v33 }
  0x6e   : > { %8212 = vmatprep.mubr.msk.f32.mxu0 %vm658_vm1, %v10302_v13 }
  0x71   : > { %8213 = vmatmul.mubr.msk.f32.gmra.mrb[28].mxu0 %vm658_vm1, %v10309_v37 }
  0x72   : > { %8215 = vmatprep.mubr.msk.f32.mxu0 %vm658_vm1, %v10311_v21 }
  0x75   : > { %8216 = vmatmul.mubr.msk.f32.gmra.mrb[30].mxu0 %vm658_vm1, %v10317_v41 }
  0x76   : > { %8220 = vmatprep.mubr.msk.f32.mxu0 %vm658_vm1, %v770_v0  ;;  %v10754_v0 = vld [vmem:[#allocation2 + $0x32] sm:$0xff] }
  0x79   : > { %8221 = vmatmul.mubr.msk.f32.vlgmr.msra.gmra.mrb[0].mxu0 %vm658_vm1, %v771_v43  ;;  %v10759_v43 = vld [vmem:[%s12459_s3 + $0x20] sm:$0xf] }
  0x7a   : > { %8223 = vmatprep.mubr.msk.f32.mxu0 %vm658_vm1, %v10096_v28  ;;  %8269 = vmatpush3.msk.msra.mxu0 %vm905_vm0, %v10115_v39  ;;  %v804_v28 = vld [vmem:[#allocation2 + $0x198] sm:$0xff]  ;;  %v805_v39 = vld [vmem:[#allocation2 + $0x1a0] sm:$0xff] }
  0x7b   : > { %8318 = vmatprep.subr.msk.mxu0 %vm905_vm0, %v7015_v44 }
  0x7d   : > { %8224 = vmatmul.mubr.msk.f32.gmra.mrb[2].mxu0 %vm658_vm1, %v10085_v17  ;;  %v7014_v17 = vld [vmem:[%s12459_s3 + $0x4] sm:$0xf] }
  0x7e   : > { %8226 = vmatprep.mubr.msk.f32.mxu0 %vm658_vm1, %v10119_v40 }
  0x81   : > { %8227 = vmatmul.mubr.msk.f32.gmra.mrb[4].mxu0 %vm658_vm1, %v10131_v45 }
  0x82   : > { %8229 = vmatprep.mubr.msk.f32.mxu0 %vm658_vm1, %v10141_v47 }
  0x85   : > { %8230 = vmatmul.mubr.msk.f32.gmra.mrb[6].mxu0 %vm658_vm1, %v10164_v63 }
  0x86   : > { %8232 = vmatprep.mubr.msk.f32.mxu0 %vm658_vm1, %v10174_v20 }
  0x89   : > { %8233 = vmatmul.mubr.msk.f32.gmra.mrb[8].mxu0 %vm658_vm1, %v10189_v2 }
  0x8a   : > { %8235 = vmatprep.mubr.msk.f32.mxu0 %vm658_vm1, %v10192_v9 }
  0x8d   : > { %8236 = vmatmul.mubr.msk.f32.gmra.mrb[10].mxu0 %vm658_vm1, %v10200_v27 }
  0x8e   : > { %8238 = vmatprep.mubr.msk.f32.mxu0 %vm658_vm1, %v10203_v32 }
  0x91   : > { %8239 = vmatmul.mubr.msk.f32.gmra.mrb[12].mxu0 %vm658_vm1, %v10212_v46 }
  0x92   : > { %8241 = vmatprep.mubr.msk.f32.mxu0 %vm658_vm1, %v10214_v48 }
  0x95   : > { %8242 = vmatmul.mubr.msk.f32.gmra.mrb[14].mxu0 %vm658_vm1, %v10225_v36 }
  0x96   : > { %8244 = vmatprep.mubr.msk.f32.mxu0 %vm658_vm1, %v10229_v62 }
  0x99   : > { %8245 = vmatmul.mubr.msk.f32.gmra.mrb[16].mxu0 %vm658_vm1, %v10241_v22 }
  0x9a   : > { %8247 = vmatprep.mubr.msk.f32.mxu0 %vm658_vm1, %v10244_v11 }
  0x9d   : > { %8248 = vmatmul.mubr.msk.f32.gmra.mrb[18].mxu0 %vm658_vm1, %v10255_v5 }
  0x9e   : > { %8250 = vmatprep.mubr.msk.f32.mxu0 %vm658_vm1, %v10259_v23 }
  0xa1   : > { %8251 = vmatmul.mubr.msk.f32.gmra.mrb[20].mxu0 %vm658_vm1, %v10267_v25 }
  0xa2   : > { %8253 = vmatprep.mubr.msk.f32.mxu0 %vm658_vm1, %v10269_v35 }
  0xa5   : > { %8254 = vmatmul.mubr.msk.f32.gmra.mrb[22].mxu0 %vm658_vm1, %v10276_v3 }
  0xa6   : > { %8256 = vmatprep.mubr.msk.f32.mxu0 %vm658_vm1, %v10278_v10 }
  0xa9   : > { %8257 = vmatmul.mubr.msk.f32.gmra.mrb[24].mxu0 %vm658_vm1, %v10284_v29 }
  0xaa   : > { %8259 = vmatprep.mubr.msk.f32.mxu0 %vm658_vm1, %v10286_v30 }
  0xad   : > { %8260 = vmatmul.mubr.msk.f32.gmra.mrb[26].mxu0 %vm658_vm1, %v10292_v12 }
  0xae   : > { %8262 = vmatprep.mubr.msk.f32.mxu0 %vm658_vm1, %v10294_v31 }
  0xb1   : > { %8263 = vmatmul.mubr.msk.f32.gmra.mrb[28].mxu0 %vm658_vm1, %v10300_v33 }
  0xb2   : > { %8265 = vmatprep.mubr.msk.f32.mxu0 %vm658_vm1, %v10302_v13 }
  0xb5   : > { %8266 = vmatmul.mubr.msk.f32.gmra.mrb[30].mxu0 %vm658_vm1, %v10309_v37 }
  0xb6   : > { %8270 = vmatprep.mubr.msk.f32.mxu0 %vm658_vm1, %v10119_v40  ;;  %v10455_v40 = vld [vmem:[#allocation2 + $0x19] sm:$0xff] }
  0xb9   : > { %8271 = vmatmul.mubr.msk.f32.vlgmr.msra.gmra.mrb[0].mxu0 %vm658_vm1, %v10131_v45  ;;  %v10460_v45 = vld [vmem:[#allocation2 + $0x21] sm:$0xff] }
  0xba   : > { %8273 = vmatprep.mubr.msk.f32.mxu0 %vm658_vm1, %v10141_v47  ;;  %8319 = vmatpush3.msk.msra.mxu0 %vm905_vm0, %v7015_v44  ;;  %v10462_v47 = vld [vmem:[#allocation2 + $0x31] sm:$0xff]  ;;  %v10765_v44 = vld [vmem:[#allocation2 + $0x3a] sm:$0xff] }
  0xbb   : > { %8368 = vmatprep.subr.msk.mxu0 %vm905_vm0, %v7014_v17 }
  0xbd   : > { %8274 = vmatmul.mubr.msk.f32.gmra.mrb[2].mxu0 %vm658_vm1, %v10164_v63  ;;  %v10467_v63 = vld [vmem:[%s12459_s3 + $0x1c] sm:$0xf] }
  0xbe   : > { %8276 = vmatprep.mubr.msk.f32.mxu0 %vm658_vm1, %v10174_v20  ;;  %v10473_v20 = vld [vmem:[#allocation2 + $0x39] sm:$0xff] }
  0xc1   : > { %8277 = vmatmul.mubr.msk.f32.gmra.mrb[4].mxu0 %vm658_vm1, %v10189_v2  ;;  %v10476_v2 = vld [vmem:[#allocation2 + $0x49] sm:$0xff] }
  0xc2   : > { %8279 = vmatprep.mubr.msk.f32.mxu0 %vm658_vm1, %v10192_v9  ;;  %v10484_v9 = vld [vmem:[#allocation2 + $0x51] sm:$0xff] }
  0xc5   : > { %8280 = vmatmul.mubr.msk.f32.gmra.mrb[6].mxu0 %vm658_vm1, %v10200_v27  ;;  %v10486_v27 = vld [vmem:[#allocation2 + $0x61] sm:$0xff] }
  0xc6   : > { %8282 = vmatprep.mubr.msk.f32.mxu0 %vm658_vm1, %v10203_v32  ;;  %v10492_v32 = vld [vmem:[#allocation2 + $0x69] sm:$0xff] }
  0xc9   : > { %8283 = vmatmul.mubr.msk.f32.gmra.mrb[8].mxu0 %vm658_vm1, %v10212_v46  ;;  %v10494_v46 = vld [vmem:[#allocation2 + $0x79] sm:$0xff] }
  0xca   : > { %8285 = vmatprep.mubr.msk.f32.mxu0 %vm658_vm1, %v10214_v48  ;;  %v10502_v48 = vld [vmem:[#allocation2 + $0x91] sm:$0xff] }
  0xcd   : > { %8286 = vmatmul.mubr.msk.f32.gmra.mrb[10].mxu0 %vm658_vm1, %v10225_v36  ;;  %v10548_v36 = vld [vmem:[#allocation2 + $0x111] sm:$0xff] }
  0xce   : > { %8288 = vmatprep.mubr.msk.f32.mxu0 %vm658_vm1, %v10229_v62  ;;  %v10564_v62 = vld [vmem:[#allocation2 + $0x141] sm:$0xff] }
  0xd1   : > { %8289 = vmatmul.mubr.msk.f32.gmra.mrb[12].mxu0 %vm658_vm1, %v10241_v22  ;;  %v10589_v22 = vld [vmem:[#allocation2 + $0x189] sm:$0xff] }
  0xd2   : > { %8291 = vmatprep.mubr.msk.f32.mxu0 %vm658_vm1, %v10244_v11  ;;  %v1637_v11 = vld [vmem:[#allocation2 + $0x9] sm:$0xff] }
  0xd5   : > { %8292 = vmatmul.mubr.msk.f32.gmra.mrb[14].mxu0 %vm658_vm1, %v10255_v5  ;;  %v737_v5 = vld [vmem:[#allocation2 + $0x70] sm:$0x1] }
  0xd6   : > { %8294 = vmatprep.mubr.msk.f32.mxu0 %vm658_vm1, %v10259_v23  ;;  %755 = vst.msk [vmem:[#allocation2 + $0x71] sm:$0x1] %vm714_vm2, %v737_v5  ;;  %v739_v23 = vld [vmem:[#allocation2 + $0xa0] sm:$0x1] }
  0xd7   : > { %757 = vst.msk [vmem:[#allocation2 + $0xa1] sm:$0x1] %vm714_vm2, %v739_v23 }
  0xd9   : > { %8295 = vmatmul.mubr.msk.f32.gmra.mrb[16].mxu0 %vm658_vm1, %v10267_v25  ;;  %v741_v25 = vld [vmem:[#allocation2 + $0xd0] sm:$0x1] }
  0xda   : > { %8297 = vmatprep.mubr.msk.f32.mxu0 %vm658_vm1, %v10269_v35  ;;  %759 = vst.msk [vmem:[#allocation2 + $0xd1] sm:$0x1] %vm714_vm2, %v741_v25  ;;  %v742_v35 = vld [vmem:[#allocation2 + $0xe8] sm:$0x1] }
  0xdb   : > { %760 = vst.msk [vmem:[#allocation2 + $0xe9] sm:$0x1] %vm714_vm2, %v742_v35 }
  0xdd   : > { %8298 = vmatmul.mubr.msk.f32.gmra.mrb[18].mxu0 %vm658_vm1, %v10276_v3  ;;  %v744_v3 = vld [vmem:[#allocation2 + $0x118] sm:$0x1] }
  0xde   : > { %8300 = vmatprep.mubr.msk.f32.mxu0 %vm658_vm1, %v10278_v10  ;;  %762 = vst.msk [vmem:[#allocation2 + $0x119] sm:$0x1] %vm714_vm2, %v744_v3  ;;  %v745_v10 = vld [vmem:[#allocation2 + $0x130] sm:$0x1] }
  0xdf   : > { %763 = vst.msk [vmem:[#allocation2 + $0x131] sm:$0x1] %vm714_vm2, %v745_v10 }
  0xe1   : > { %8301 = vmatmul.mubr.msk.f32.gmra.mrb[20].mxu0 %vm658_vm1, %v10284_v29  ;;  %v746_v29 = vld [vmem:[#allocation2 + $0x148] sm:$0x1] }
  0xe2   : > { %8303 = vmatprep.mubr.msk.f32.mxu0 %vm658_vm1, %v10286_v30  ;;  %764 = vst.msk [vmem:[#allocation2 + $0x149] sm:$0x1] %vm714_vm2, %v746_v29  ;;  %v747_v30 = vld [vmem:[#allocation2 + $0x160] sm:$0x1] }
  0xe3   : > { %765 = vst.msk [vmem:[#allocation2 + $0x161] sm:$0x1] %vm714_vm2, %v747_v30 }
  0xe5   : > { %8304 = vmatmul.mubr.msk.f32.gmra.mrb[22].mxu0 %vm658_vm1, %v10292_v12  ;;  %v748_v12 = vld [vmem:[#allocation2 + $0x178] sm:$0x1] }
  0xe6   : > { %8306 = vmatprep.mubr.msk.f32.mxu0 %vm658_vm1, %v10294_v31  ;;  %766 = vst.msk [vmem:[#allocation2 + $0x179] sm:$0x1] %vm714_vm2, %v748_v12  ;;  %v749_v31 = vld [vmem:[#allocation2 + $0x190] sm:$0x1] }
  0xe7   : > { %767 = vst.msk [vmem:[#allocation2 + $0x191] sm:$0x1] %vm714_vm2, %v749_v31 }
  0xe9   : > { %8307 = vmatmul.mubr.msk.f32.gmra.mrb[24].mxu0 %vm658_vm1, %v10300_v33  ;;  %v733_v33 = vld [vmem:[#allocation2 + $0x10] sm:$0x1] }
  0xea   : > { %8309 = vmatprep.mubr.msk.f32.mxu0 %vm658_vm1, %v10302_v13  ;;  %751 = vst.msk [vmem:[#allocation2 + $0x11] sm:$0x1] %vm714_vm2, %v733_v33  ;;  %v7116_v13 = vld [vmem:[%s12459_s3 + $0x8] sm:$0xf] }
  0xed   : > { %8310 = vmatmul.mubr.msk.f32.gmra.mrb[26].mxu0 %vm658_vm1, %v10309_v37  ;;  %v1671_v37 = vld [vmem:[#allocation2 + $0x1a1] sm:$0xff] }
  0xee   : > { %8312 = vmatprep.mubr.msk.f32.mxu0 %vm658_vm1, %v10311_v21  ;;  %v10747_v21 = vld [vmem:[#allocation2 + $0x1a] sm:$0xff] }
  0xf1   : > { %8313 = vmatmul.mubr.msk.f32.gmra.mrb[28].mxu0 %vm658_vm1, %v10317_v41  ;;  %v10752_v41 = vld [vmem:[#allocation2 + $0x22] sm:$0xff] }
  0xf2   : > { %8315 = vmatprep.mubr.msk.f32.mxu0 %vm658_vm1, %v804_v28  ;;  %v10776_v28 = vld [vmem:[#allocation2 + $0x52] sm:$0xff] }
  0xf5   : > { %8316 = vmatmul.mubr.msk.f32.gmra.mrb[30].mxu0 %vm658_vm1, %v805_v39  ;;  %v10778_v39 = vld [vmem:[#allocation2 + $0x62] sm:$0xff] }
  0xf6   : > { %8320 = vmatprep.mubr.msk.f32.mxu0 %vm658_vm1, %v10455_v40 }
  0xf9   : > { %8321 = vmatmul.mubr.msk.f32.vlgmr.msra.gmra.mrb[0].mxu0 %vm658_vm1, %v10460_v45 }
  0xfa   : > { %8323 = vmatprep.mubr.msk.f32.mxu0 %vm658_vm1, %v10462_v47  ;;  %8369 = vmatpush3.msk.msra.mxu0 %vm905_vm0, %v7014_v17  ;;  %v10768_v17 = vld [vmem:[#allocation2 + $0x4a] sm:$0xff] }
  0xfb   : > { %8418 = vmatprep.subr.msk.mxu0 %vm905_vm0, %v10467_v63 }
  0xfd   : > { %8324 = vmatmul.mubr.msk.f32.gmra.mrb[2].mxu0 %vm658_vm1, %v10473_v20 }
  0xfe   : > { %8326 = vmatprep.mubr.msk.f32.mxu0 %vm658_vm1, %v10476_v2 }
 0x101   : > { %8327 = vmatmul.mubr.msk.f32.gmra.mrb[4].mxu0 %vm658_vm1, %v10484_v9 }
 0x102   : > { %8329 = vmatprep.mubr.msk.f32.mxu0 %vm658_vm1, %v10486_v27 }
 0x105   : > { %8330 = vmatmul.mubr.msk.f32.gmra.mrb[6].mxu0 %vm658_vm1, %v10492_v32 }
 0x106   : > { %8332 = vmatprep.mubr.msk.f32.mxu0 %vm658_vm1, %v10494_v46 }
 0x109   : > { %8333 = vmatmul.mubr.msk.f32.gmra.mrb[8].mxu0 %vm658_vm1, %v10500_v34 }
 0x10a   : > { %8335 = vmatprep.mubr.msk.f32.mxu0 %vm658_vm1, %v10502_v48 }
 0x10d   : > { %8336 = vmatmul.mubr.msk.f32.gmra.mrb[10].mxu0 %vm658_vm1, %v10508_v52 }
 0x10e   : > { %8338 = vmatprep.mubr.msk.f32.mxu0 %vm658_vm1, %v10510_v53 }
 0x111   : > { %8339 = vmatmul.mubr.msk.f32.gmra.mrb[12].mxu0 %vm658_vm1, %v10516_v55 }
 0x112   : > { %8341 = vmatprep.mubr.msk.f32.mxu0 %vm658_vm1, %v10518_v57 }
 0x115   : > { %8342 = vmatmul.mubr.msk.f32.gmra.mrb[14].mxu0 %vm658_vm1, %v10524_v26 }
 0x116   : > { %8344 = vmatprep.mubr.msk.f32.mxu0 %vm658_vm1, %v10526_v58 }
 0x119   : > { %8345 = vmatmul.mubr.msk.f32.gmra.mrb[16].mxu0 %vm658_vm1, %v10532_v49 }
 0x11a   : > { %8347 = vmatprep.mubr.msk.f32.mxu0 %vm658_vm1, %v10534_v59 }
 0x11d   : > { %8348 = vmatmul.mubr.msk.f32.gmra.mrb[18].mxu0 %vm658_vm1, %v10540_v60 }
 0x11e   : > { %8350 = vmatprep.mubr.msk.f32.mxu0 %vm658_vm1, %v10542_v18 }
 0x121   : > { %8351 = vmatmul.mubr.msk.f32.gmra.mrb[20].mxu0 %vm658_vm1, %v10548_v36 }
 0x122   : > { %8353 = vmatprep.mubr.msk.f32.mxu0 %vm658_vm1, %v10550_v42 }
 0x125   : > { %8354 = vmatmul.mubr.msk.f32.gmra.mrb[22].mxu0 %vm658_vm1, %v10556_v19 }
 0x126   : > { %8356 = vmatprep.mubr.msk.f32.mxu0 %vm658_vm1, %v10558_v50 }
 0x129   : > { %8357 = vmatmul.mubr.msk.f32.gmra.mrb[24].mxu0 %vm658_vm1, %v10564_v62 }
 0x12a   : > { %8359 = vmatprep.mubr.msk.f32.mxu0 %vm658_vm1, %v10566_v4 }
 0x12d   : > { %8360 = vmatmul.mubr.msk.f32.gmra.mrb[26].mxu0 %vm658_vm1, %v10572_v51 }
 0x12e   : > { %8362 = vmatprep.mubr.msk.f32.mxu0 %vm658_vm1, %v10574_v6 }
 0x131   : > { %8363 = vmatmul.mubr.msk.f32.gmra.mrb[28].mxu0 %vm658_vm1, %v10580_v7 }
 0x132   : > { %8365 = vmatprep.mubr.msk.f32.mxu0 %vm658_vm1, %v10582_v61 }
 0x135   : > { %8366 = vmatmul.mubr.msk.f32.gmra.mrb[30].mxu0 %vm658_vm1, %v10589_v22 }
 0x136   : > { %8370 = vmatprep.mubr.msk.f32.mxu0 %vm658_vm1, %v1636_v1  ;;  %v11031_v1 = vld [vmem:[%s12461_s5] ss:$0 sm:$0xff] }
 0x139   : > { %8371 = vmatmul.mubr.msk.f32.vlgmr.msra.gmra.mrb[0].mxu0 %vm658_vm1, %v1637_v11 }
 0x13a   : > { %8373 = vmatprep.mubr.msk.f32.mxu0 %vm658_vm1, %v10455_v40  ;;  %8419 = vmatpush3.msk.msra.mxu0 %vm905_vm0, %v10467_v63  ;;  %v10784_v40 = vld [vmem:[#allocation2 + $0x6a] sm:$0xff]  ;;  %v10794_v63 = vld [vmem:[#allocation2 + $0x92] sm:$0xff] }
 0x13b   : > { %8468 = vmatprep.subr.msk.mxu0 %vm905_vm0, %v10598_v14 }
 0x13d   : > { %8374 = vmatmul.mubr.msk.f32.gmra.mrb[2].mxu0 %vm658_vm1, %v10460_v45  ;;  %v10786_v45 = vld [vmem:[#allocation2 + $0x7a] sm:$0xff] }
 0x13e   : > { %8376 = vmatprep.mubr.msk.f32.mxu0 %vm658_vm1, %v10462_v47 }
 0x141   : > { %8377 = vmatmul.mubr.msk.f32.gmra.mrb[4].mxu0 %vm658_vm1, %v10473_v20 }
 0x142   : > { %8379 = vmatprep.mubr.msk.f32.mxu0 %vm658_vm1, %v10476_v2 }
 0x145   : > { %8380 = vmatmul.mubr.msk.f32.gmra.mrb[6].mxu0 %vm658_vm1, %v10484_v9 }
 0x146   : > { %8382 = vmatprep.mubr.msk.f32.mxu0 %vm658_vm1, %v10486_v27 }
 0x149   : > { %8383 = vmatmul.mubr.msk.f32.gmra.mrb[8].mxu0 %vm658_vm1, %v10492_v32 }
 0x14a   : > { %8385 = vmatprep.mubr.msk.f32.mxu0 %vm658_vm1, %v10494_v46 }
 0x14d   : > { %8386 = vmatmul.mubr.msk.f32.gmra.mrb[10].mxu0 %vm658_vm1, %v10500_v34 }
 0x14e   : > { %8388 = vmatprep.mubr.msk.f32.mxu0 %vm658_vm1, %v10502_v48 }
 0x151   : > { %8389 = vmatmul.mubr.msk.f32.gmra.mrb[12].mxu0 %vm658_vm1, %v10508_v52 }
 0x152   : > { %8391 = vmatprep.mubr.msk.f32.mxu0 %vm658_vm1, %v10510_v53 }
 0x155   : > { %8392 = vmatmul.mubr.msk.f32.gmra.mrb[14].mxu0 %vm658_vm1, %v10516_v55 }
 0x156   : > { %8394 = vmatprep.mubr.msk.f32.mxu0 %vm658_vm1, %v10518_v57 }
 0x159   : > { %8395 = vmatmul.mubr.msk.f32.gmra.mrb[16].mxu0 %vm658_vm1, %v10524_v26 }
 0x15a   : > { %8397 = vmatprep.mubr.msk.f32.mxu0 %vm658_vm1, %v10526_v58 }
 0x15d   : > { %8398 = vmatmul.mubr.msk.f32.gmra.mrb[18].mxu0 %vm658_vm1, %v10532_v49 }
 0x15e   : > { %8400 = vmatprep.mubr.msk.f32.mxu0 %vm658_vm1, %v10534_v59 }
 0x161   : > { %8401 = vmatmul.mubr.msk.f32.gmra.mrb[20].mxu0 %vm658_vm1, %v10540_v60 }
 0x162   : > { %8403 = vmatprep.mubr.msk.f32.mxu0 %vm658_vm1, %v10542_v18 }
 0x165   : > { %8404 = vmatmul.mubr.msk.f32.gmra.mrb[22].mxu0 %vm658_vm1, %v10548_v36 }
 0x166   : > { %8406 = vmatprep.mubr.msk.f32.mxu0 %vm658_vm1, %v10550_v42 }
 0x169   : > { %8407 = vmatmul.mubr.msk.f32.gmra.mrb[24].mxu0 %vm658_vm1, %v10556_v19 }
 0x16a   : > { %8409 = vmatprep.mubr.msk.f32.mxu0 %vm658_vm1, %v10558_v50 }
 0x16d   : > { %8410 = vmatmul.mubr.msk.f32.gmra.mrb[26].mxu0 %vm658_vm1, %v10564_v62 }
 0x16e   : > { %8412 = vmatprep.mubr.msk.f32.mxu0 %vm658_vm1, %v10566_v4 }
 0x171   : > { %8413 = vmatmul.mubr.msk.f32.gmra.mrb[28].mxu0 %vm658_vm1, %v10572_v51 }
 0x172   : > { %8415 = vmatprep.mubr.msk.f32.mxu0 %vm658_vm1, %v10574_v6 }
 0x175   : > { %8416 = vmatmul.mubr.msk.f32.gmra.mrb[30].mxu0 %vm658_vm1, %v10580_v7 }
 0x176   : > { %8420 = vmatprep.mubr.msk.f32.mxu0 %vm658_vm1, %v10462_v47  ;;  %v10792_v47 = vld [vmem:[#allocation2 + $0x82] sm:$0xff] }
 0x179   : > { %8421 = vmatmul.mubr.msk.f32.vlgmr.msra.gmra.mrb[0].mxu0 %vm658_vm1, %v10473_v20  ;;  %v10800_v20 = vld [vmem:[#allocation2 + $0x9a] sm:$0xff] }
 0x17a   : > { %8423 = vmatprep.mubr.msk.f32.mxu0 %vm658_vm1, %v10476_v2  ;;  %8469 = vmatpush3.msk.msra.mxu0 %vm905_vm0, %v10598_v14  ;;  %v10802_v2 = vld [vmem:[#allocation2 + $0xaa] sm:$0xff]  ;;  %v11037_v14 = vld [vmem:[%s12462_s6] ss:$0 sm:$0xff] }
 0x17b   : > { %8518 = vmatprep.subr.msk.mxu0 %vm905_vm0, %v7116_v13 }
 0x17d   : > { %8424 = vmatmul.mubr.msk.f32.gmra.mrb[2].mxu0 %vm658_vm1, %v10484_v9  ;;  %v10808_v9 = vld [vmem:[#allocation2 + $0xb2] sm:$0xff] }
 0x17e   : > { %8426 = vmatprep.mubr.msk.f32.mxu0 %vm658_vm1, %v10486_v27  ;;  %v10810_v27 = vld [vmem:[#allocation2 + $0xc2] sm:$0xff] }
 0x181   : > { %8427 = vmatmul.mubr.msk.f32.gmra.mrb[4].mxu0 %vm658_vm1, %v10492_v32  ;;  %v10816_v32 = vld [vmem:[#allocation2 + $0xca] sm:$0xff] }
 0x182   : > { %8429 = vmatprep.mubr.msk.f32.mxu0 %vm658_vm1, %v10494_v46  ;;  %v10818_v46 = vld [vmem:[#allocation2 + $0xda] sm:$0xff] }
 0x185   : > { %8430 = vmatmul.mubr.msk.f32.gmra.mrb[6].mxu0 %vm658_vm1, %v10500_v34  ;;  %v10824_v34 = vld [vmem:[#allocation2 + $0xe2] sm:$0xff] }
 0x186   : > { %8432 = vmatprep.mubr.msk.f32.mxu0 %vm658_vm1, %v10502_v48  ;;  %v10826_v48 = vld [vmem:[#allocation2 + $0xf2] sm:$0xff] }
 0x189   : > { %8433 = vmatmul.mubr.msk.f32.gmra.mrb[8].mxu0 %vm658_vm1, %v10508_v52  ;;  %v10832_v52 = vld [vmem:[#allocation2 + $0xfa] sm:$0xff] }
 0x18a   : > { %8435 = vmatprep.mubr.msk.f32.mxu0 %vm658_vm1, %v10510_v53  ;;  %v10834_v53 = vld [vmem:[#allocation2 + $0x10a] sm:$0xff] }
 0x18d   : > { %8436 = vmatmul.mubr.msk.f32.gmra.mrb[10].mxu0 %vm658_vm1, %v10516_v55  ;;  %v10840_v55 = vld [vmem:[#allocation2 + $0x112] sm:$0xff] }
 0x18e   : > { %8438 = vmatprep.mubr.msk.f32.mxu0 %vm658_vm1, %v10518_v57  ;;  %v10842_v57 = vld [vmem:[#allocation2 + $0x122] sm:$0xff] }
 0x191   : > { %8439 = vmatmul.mubr.msk.f32.gmra.mrb[12].mxu0 %vm658_vm1, %v10524_v26  ;;  %v10848_v26 = vld [vmem:[#allocation2 + $0x12a] sm:$0xff] }
 0x192   : > { %8441 = vmatprep.mubr.msk.f32.mxu0 %vm658_vm1, %v10526_v58  ;;  %v10850_v58 = vld [vmem:[#allocation2 + $0x13a] sm:$0xff] }
 0x195   : > { %8442 = vmatmul.mubr.msk.f32.gmra.mrb[14].mxu0 %vm658_vm1, %v10532_v49  ;;  %v10856_v49 = vld [vmem:[#allocation2 + $0x142] sm:$0xff] }
 0x196   : > { %8444 = vmatprep.mubr.msk.f32.mxu0 %vm658_vm1, %v10534_v59  ;;  %v10858_v59 = vld [vmem:[#allocation2 + $0x152] sm:$0xff] }
 0x199   : > { %8445 = vmatmul.mubr.msk.f32.gmra.mrb[16].mxu0 %vm658_vm1, %v10540_v60  ;;  %v10864_v60 = vld [vmem:[#allocation2 + $0x15a] sm:$0xff] }
 0x19a   : > { %8447 = vmatprep.mubr.msk.f32.mxu0 %vm658_vm1, %v10542_v18  ;;  %v10866_v18 = vld [vmem:[#allocation2 + $0x16a] sm:$0xff] }
 0x19d   : > { %8448 = vmatmul.mubr.msk.f32.gmra.mrb[18].mxu0 %vm658_vm1, %v10548_v36  ;;  %v750_v36 = vld [vmem:[#allocation2 + $0x1a8] sm:$0x1] }
 0x19e   : > { %8450 = vmatprep.mubr.msk.f32.mxu0 %vm658_vm1, %v10550_v42  ;;  %768 = vst.msk [vmem:[#allocation2 + $0x1a9] sm:$0x1] %vm714_vm2, %v750_v36  ;;  %v10873_v42 = vld [vmem:[#allocation2 + $0x172] sm:$0xff] }
 0x1a1   : > { %8451 = vmatmul.mubr.msk.f32.gmra.mrb[20].mxu0 %vm658_vm1, %v10556_v19  ;;  %v10875_v19 = vld [vmem:[#allocation2 + $0x182] sm:$0xff] }
 0x1a2   : > { %8453 = vmatprep.mubr.msk.f32.mxu0 %vm658_vm1, %v10558_v50  ;;  %v10881_v50 = vld [vmem:[#allocation2 + $0x18a] sm:$0xff] }
 0x1a5   : > { %8454 = vmatmul.mubr.msk.f32.gmra.mrb[22].mxu0 %vm658_vm1, %v10564_v62  ;;  %v2502_v62 = vld [vmem:[#allocation2 + $0x2] sm:$0xff] }
 0x1a6   : > { %8456 = vmatprep.mubr.msk.f32.mxu0 %vm658_vm1, %v10566_v4  ;;  %v2503_v4 = vld [vmem:[#allocation2 + $0xa] sm:$0xff] }
 0x1a9   : > { %8457 = vmatmul.mubr.msk.f32.gmra.mrb[24].mxu0 %vm658_vm1, %v10572_v51  ;;  %v2536_v51 = vld [vmem:[#allocation2 + $0x19a] sm:$0xff] }
 0x1aa   : > { %8459 = vmatprep.mubr.msk.f32.mxu0 %vm658_vm1, %v10574_v6  ;;  %v2537_v6 = vld [vmem:[#allocation2 + $0x1a2] sm:$0xff] }
 0x1ad   : > { %8460 = vmatmul.mubr.msk.f32.gmra.mrb[26].mxu0 %vm658_vm1, %v10580_v7  ;;  %v7221_v7 = vld [vmem:[%s12463_s7 + $0xc] sm:$0xf] }
 0x1ae   : > { %8462 = vmatprep.mubr.msk.f32.mxu0 %vm658_vm1, %v10582_v61  ;;  %8618 = vmatprep.subr.msk.mxu1 %vm905_vm0, %v7221_v7  ;;  %v11019_v61 = vld [vmem:[%s12463_s7] sm:$0xf] }
 0x1af   : > { %8619 = vmatpush3.msk.msra.mxu1 %vm905_vm0, %v7221_v7 }
 0x1b0   : > { %8668 = vmatprep.subr.msk.mxu1 %vm905_vm0, %v11019_v61 }
 0x1b1   : > { %8463 = vmatmul.mubr.msk.f32.gmra.mrb[28].mxu0 %vm658_vm1, %v10589_v22 }
 0x1b2   : > { %8465 = vmatprep.mubr.msk.f32.mxu0 %vm658_vm1, %v1670_v38 }
 0x1b5   : > { %8466 = vmatmul.mubr.msk.f32.gmra.mrb[30].mxu0 %vm658_vm1, %v1671_v37 }
 0x1b6   : > { %8470 = vmatprep.mubr.msk.f32.mxu0 %vm658_vm1, %v10747_v21 }
 0x1b9   : > { %8471 = vmatmul.mubr.msk.f32.vlgmr.msra.gmra.mrb[0].mxu0 %vm658_vm1, %v10752_v41 }
 0x1ba   : > { %8473 = vmatprep.mubr.msk.f32.mxu0 %vm658_vm1, %v10754_v0  ;;  %8519 = vmatpush3.msk.msra.mxu0 %vm905_vm0, %v7116_v13 }
 0x1bb   : > { %8568 = vmatprep.subr.msk.mxu0 %vm905_vm0, %v10759_v43 }
 0x1bd   : > { %8474 = vmatmul.mubr.msk.f32.gmra.mrb[2].mxu0 %vm658_vm1, %v10765_v44 }
 0x1be   : > { %8476 = vmatprep.mubr.msk.f32.mxu0 %vm658_vm1, %v10768_v17 }
 0x1c1   : > { %8477 = vmatmul.mubr.msk.f32.gmra.mrb[4].mxu0 %vm658_vm1, %v10776_v28 }
 0x1c2   : > { %8479 = vmatprep.mubr.msk.f32.mxu0 %vm658_vm1, %v10778_v39 }
 0x1c5   : > { %8480 = vmatmul.mubr.msk.f32.gmra.mrb[6].mxu0 %vm658_vm1, %v10784_v40 }
 0x1c6   : > { %8482 = vmatprep.mubr.msk.f32.mxu0 %vm658_vm1, %v10786_v45 }
 0x1c9   : > { %8483 = vmatmul.mubr.msk.f32.gmra.mrb[8].mxu0 %vm658_vm1, %v10792_v47 }
 0x1ca   : > { %8485 = vmatprep.mubr.msk.f32.mxu0 %vm658_vm1, %v10794_v63 }
 0x1cd   : > { %8486 = vmatmul.mubr.msk.f32.gmra.mrb[10].mxu0 %vm658_vm1, %v10800_v20 }
 0x1ce   : > { %8488 = vmatprep.mubr.msk.f32.mxu0 %vm658_vm1, %v10802_v2 }
 0x1d1   : > { %8489 = vmatmul.mubr.msk.f32.gmra.mrb[12].mxu0 %vm658_vm1, %v10808_v9 }
 0x1d2   : > { %8491 = vmatprep.mubr.msk.f32.mxu0 %vm658_vm1, %v10810_v27 }
 0x1d5   : > { %8492 = vmatmul.mubr.msk.f32.gmra.mrb[14].mxu0 %vm658_vm1, %v10816_v32 }
 0x1d6   : > { %8494 = vmatprep.mubr.msk.f32.mxu0 %vm658_vm1, %v10818_v46 }
 0x1d9   : > { %8495 = vmatmul.mubr.msk.f32.gmra.mrb[16].mxu0 %vm658_vm1, %v10824_v34 }
 0x1da   : > { %8497 = vmatprep.mubr.msk.f32.mxu0 %vm658_vm1, %v10826_v48 }
 0x1dd   : > { %8498 = vmatmul.mubr.msk.f32.gmra.mrb[18].mxu0 %vm658_vm1, %v10832_v52 }
 0x1de   : > { %8500 = vmatprep.mubr.msk.f32.mxu0 %vm658_vm1, %v10834_v53 }
 0x1e1   : > { %8501 = vmatmul.mubr.msk.f32.gmra.mrb[20].mxu0 %vm658_vm1, %v10840_v55 }
 0x1e2   : > { %8503 = vmatprep.mubr.msk.f32.mxu0 %vm658_vm1, %v10842_v57 }
 0x1e5   : > { %8504 = vmatmul.mubr.msk.f32.gmra.mrb[22].mxu0 %vm658_vm1, %v10848_v26 }
 0x1e6   : > { %8506 = vmatprep.mubr.msk.f32.mxu0 %vm658_vm1, %v10850_v58 }
 0x1e9   : > { %8507 = vmatmul.mubr.msk.f32.gmra.mrb[24].mxu0 %vm658_vm1, %v10856_v49 }
 0x1ea   : > { %8509 = vmatprep.mubr.msk.f32.mxu0 %vm658_vm1, %v10858_v59 }
 0x1ed   : > { %8510 = vmatmul.mubr.msk.f32.gmra.mrb[26].mxu0 %vm658_vm1, %v10864_v60 }
 0x1ee   : > { %8512 = vmatprep.mubr.msk.f32.mxu0 %vm658_vm1, %v10866_v18 }
 0x1f1   : > { %8513 = vmatmul.mubr.msk.f32.gmra.mrb[28].mxu0 %vm658_vm1, %v10873_v42 }
 0x1f2   : > { %8515 = vmatprep.mubr.msk.f32.mxu0 %vm658_vm1, %v10875_v19 }
 0x1f5   : > { %8516 = vmatmul.mubr.msk.f32.gmra.mrb[30].mxu0 %vm658_vm1, %v10881_v50 }
 0x1f6   : > { %8520 = vmatprep.mubr.msk.f32.mxu0 %vm658_vm1, %v2502_v62 }
 0x1f9   : > { %8521 = vmatmul.mubr.msk.f32.vlgmr.msra.gmra.mrb[0].mxu0 %vm658_vm1, %v2503_v4 }
 0x1fa   : > { %8523 = vmatprep.mubr.msk.f32.mxu0 %vm658_vm1, %v10747_v21  ;;  %8569 = vmatpush3.msk.msra.mxu0 %vm905_vm0, %v10759_v43 }
 0x1fd   : > { %8524 = vmatmul.mubr.msk.f32.gmra.mrb[2].mxu0 %vm658_vm1, %v10752_v41 }
 0x1fe   : > { %8526 = vmatprep.mubr.msk.f32.mxu0 %vm658_vm1, %v10754_v0 }
 0x201   : > { %8527 = vmatmul.mubr.msk.f32.gmra.mrb[4].mxu0 %vm658_vm1, %v10765_v44 }
 0x202   : > { %8529 = vmatprep.mubr.msk.f32.mxu0 %vm658_vm1, %v10768_v17 }
 0x205   : > { %8530 = vmatmul.mubr.msk.f32.gmra.mrb[6].mxu0 %vm658_vm1, %v10776_v28 }
 0x206   : > { %8532 = vmatprep.mubr.msk.f32.mxu0 %vm658_vm1, %v10778_v39 }
 0x209   : > { %8533 = vmatmul.mubr.msk.f32.gmra.mrb[8].mxu0 %vm658_vm1, %v10784_v40 }
 0x20a   : > { %8535 = vmatprep.mubr.msk.f32.mxu0 %vm658_vm1, %v10786_v45 }
 0x20d   : > { %8536 = vmatmul.mubr.msk.f32.gmra.mrb[10].mxu0 %vm658_vm1, %v10792_v47 }
 0x20e   : > { %8538 = vmatprep.mubr.msk.f32.mxu0 %vm658_vm1, %v10794_v63 }
 0x211   : > { %8539 = vmatmul.mubr.msk.f32.gmra.mrb[12].mxu0 %vm658_vm1, %v10800_v20 }
 0x212   : > { %8541 = vmatprep.mubr.msk.f32.mxu0 %vm658_vm1, %v10802_v2 }
 0x215   : > { %8542 = vmatmul.mubr.msk.f32.gmra.mrb[14].mxu0 %vm658_vm1, %v10808_v9 }
 0x216   : > { %8544 = vmatprep.mubr.msk.f32.mxu0 %vm658_vm1, %v10810_v27 }
 0x219   : > { %8545 = vmatmul.mubr.msk.f32.gmra.mrb[16].mxu0 %vm658_vm1, %v10816_v32 }
 0x21a   : > { %8547 = vmatprep.mubr.msk.f32.mxu0 %vm658_vm1, %v10818_v46 }
 0x21d   : > { %8548 = vmatmul.mubr.msk.f32.gmra.mrb[18].mxu0 %vm658_vm1, %v10824_v34 }
 0x21e   : > { %8550 = vmatprep.mubr.msk.f32.mxu0 %vm658_vm1, %v10826_v48 }
 0x221   : > { %8551 = vmatmul.mubr.msk.f32.gmra.mrb[20].mxu0 %vm658_vm1, %v10832_v52 }
 0x222   : > { %8553 = vmatprep.mubr.msk.f32.mxu0 %vm658_vm1, %v10834_v53 }
 0x225   : > { %8554 = vmatmul.mubr.msk.f32.gmra.mrb[22].mxu0 %vm658_vm1, %v10840_v55 }
 0x226   : > { %8556 = vmatprep.mubr.msk.f32.mxu0 %vm658_vm1, %v10842_v57 }
 0x229   : > { %8557 = vmatmul.mubr.msk.f32.gmra.mrb[24].mxu0 %vm658_vm1, %v10848_v26 }
 0x22a   : > { %8559 = vmatprep.mubr.msk.f32.mxu0 %vm658_vm1, %v10850_v58 }
 0x22d   : > { %8560 = vmatmul.mubr.msk.f32.gmra.mrb[26].mxu0 %vm658_vm1, %v10856_v49 }
 0x22e   : > { %8562 = vmatprep.mubr.msk.f32.mxu0 %vm658_vm1, %v10858_v59 }
 0x231   : > { %8563 = vmatmul.mubr.msk.f32.gmra.mrb[28].mxu0 %vm658_vm1, %v10864_v60 }
 0x232   : > { %8565 = vmatprep.mubr.msk.f32.mxu0 %vm658_vm1, %v10866_v18 }
 0x235   : > { %8566 = vmatmul.mubr.msk.f32.gmra.mrb[30].mxu0 %vm658_vm1, %v10873_v42 }
 0x236   : > { %8570 = vmatprep.mubr.msk.f32.mxu0 %vm658_vm1, %v10754_v0 }
 0x239   : > { %8571 = vmatmul.mubr.msk.f32.vlgmr.msra.gmra.mrb[0].mxu0 %vm658_vm1, %v10765_v44 }
 0x23a   : > { %8573 = vmatprep.mubr.msk.f32.mxu0 %vm658_vm1, %v10768_v17 }
 0x23d   : > { %8574 = vmatmul.mubr.msk.f32.gmra.mrb[2].mxu0 %vm658_vm1, %v10776_v28 }
 0x23e   : > { %8576 = vmatprep.mubr.msk.f32.mxu0 %vm658_vm1, %v10778_v39 }
 0x241   : > { %8577 = vmatmul.mubr.msk.f32.gmra.mrb[4].mxu0 %vm658_vm1, %v10784_v40 }
 0x242   : > { %8579 = vmatprep.mubr.msk.f32.mxu0 %vm658_vm1, %v10786_v45 }
 0x245   : > { %8580 = vmatmul.mubr.msk.f32.gmra.mrb[6].mxu0 %vm658_vm1, %v10792_v47 }
 0x246   : > { %8582 = vmatprep.mubr.msk.f32.mxu0 %vm658_vm1, %v10794_v63 }
 0x249   : > { %8583 = vmatmul.mubr.msk.f32.gmra.mrb[8].mxu0 %vm658_vm1, %v10800_v20 }
 0x24a   : > { %8585 = vmatprep.mubr.msk.f32.mxu0 %vm658_vm1, %v10802_v2 }
 0x24d   : > { %8586 = vmatmul.mubr.msk.f32.gmra.mrb[10].mxu0 %vm658_vm1, %v10808_v9 }
 0x24e   : > { %8588 = vmatprep.mubr.msk.f32.mxu0 %vm658_vm1, %v10810_v27 }
 0x251   : > { %8589 = vmatmul.mubr.msk.f32.gmra.mrb[12].mxu0 %vm658_vm1, %v10816_v32 }
 0x252   : > { %8591 = vmatprep.mubr.msk.f32.mxu0 %vm658_vm1, %v10818_v46 }
 0x255   : > { %8592 = vmatmul.mubr.msk.f32.gmra.mrb[14].mxu0 %vm658_vm1, %v10824_v34 }
 0x256   : > { %8594 = vmatprep.mubr.msk.f32.mxu0 %vm658_vm1, %v10826_v48 }
 0x259   : > { %8595 = vmatmul.mubr.msk.f32.gmra.mrb[16].mxu0 %vm658_vm1, %v10832_v52 }
 0x25a   : > { %8597 = vmatprep.mubr.msk.f32.mxu0 %vm658_vm1, %v10834_v53 }
 0x25d   : > { %8598 = vmatmul.mubr.msk.f32.gmra.mrb[18].mxu0 %vm658_vm1, %v10840_v55 }
 0x25e   : > { %8600 = vmatprep.mubr.msk.f32.mxu0 %vm658_vm1, %v10842_v57 }
 0x261   : > { %8601 = vmatmul.mubr.msk.f32.gmra.mrb[20].mxu0 %vm658_vm1, %v10848_v26 }
 0x262   : > { %8603 = vmatprep.mubr.msk.f32.mxu0 %vm658_vm1, %v10850_v58 }
 0x265   : > { %8604 = vmatmul.mubr.msk.f32.gmra.mrb[22].mxu0 %vm658_vm1, %v10856_v49 }
 0x266   : > { %8606 = vmatprep.mubr.msk.f32.mxu0 %vm658_vm1, %v10858_v59 }
 0x269   : > { %8607 = vmatmul.mubr.msk.f32.gmra.mrb[24].mxu0 %vm658_vm1, %v10864_v60 }
 0x26a   : > { %8609 = vmatprep.mubr.msk.f32.mxu0 %vm658_vm1, %v10866_v18 }
 0x26d   : > { %8610 = vmatmul.mubr.msk.f32.gmra.mrb[26].mxu0 %vm658_vm1, %v10873_v42 }
 0x26e   : > { %8612 = vmatprep.mubr.msk.f32.mxu0 %vm658_vm1, %v10875_v19 }
 0x271   : > { %8613 = vmatmul.mubr.msk.f32.gmra.mrb[28].mxu0 %vm658_vm1, %v10881_v50 }
 0x272   : > { %8615 = vmatprep.mubr.msk.f32.mxu0 %vm658_vm1, %v2536_v51 }
 0x275   : > { %8616 = vmatmul.mubr.msk.f32.gmra.mrb[30].mxu0 %vm658_vm1, %v2537_v6 }
 0x30c   : > { %v8572_v22 = vpop.f32.mrb[0].mxu0 }
 0x30d   : > { %v3439_v8 = vadd.f32 %v8572_v22, %v11026_v54  ;;  %v3177_v11 = vpop.f32.mrb[1].mxu0 }
 0x30e   : > { %v3438_v15 = vadd.f32 %v11026_v54, %v3177_v11 }
 0x30f   : > { %v3478_v5 = vmul.f32 %v11031_v1, %v3439_v8 }
 0x310   : > { %v3477_v56 = vmul.f32 %v11031_v1, %v3438_v15  ;;  %v8575_v23 = vpop.f32.mrb[2].mxu0 }
 0x311   : > { %v11043_v16 = vadd.f32 %v11037_v14, %v3478_v5  ;;  %v3441_v25 = vadd.f32 %v8575_v23, %v11026_v54  ;;  %v3187_v35 = vpop.f32.mrb[3].mxu0 }
 0x312   : > { %v11047_v24 = vadd.f32 %v11037_v14, %v3477_v56  ;;  %v3440_v3 = vadd.f32 %v11026_v54, %v3187_v35 }
 0x313   : > { %v3549_v10 = vmul.f32 0.5, %v11043_v16  ;;  %v3480_v29 = vmul.f32 %v11031_v1, %v3441_v25 }
 0x314   : > { %v3548_v30 = vmul.f32 0.5, %v11047_v24  ;;  %v3479_v12 = vmul.f32 %v11031_v1, %v3440_v3  ;;  %v8578_v31 = vpop.f32.mrb[4].mxu0 }
 0x315   : > { %9697 = vtanh.f32 %v3549_v10  ;;  %v11055_v33 = vadd.f32 %v11037_v14, %v3480_v29  ;;  %v3443_v13 = vadd.f32 %v8578_v31, %v11026_v54  ;;  %v3197_v38 = vpop.f32.mrb[5].mxu0 }
 0x316   : > { %9699 = vtanh.f32 %v3548_v30  ;;  %v11059_v37 = vadd.f32 %v11037_v14, %v3479_v12  ;;  %v3442_v21 = vadd.f32 %v11026_v54, %v3197_v38 }
 0x317   : > { %v3551_v41 = vmul.f32 0.5, %v11055_v33  ;;  %v3482_v0 = vmul.f32 %v11031_v1, %v3443_v13 }
 0x318   : > { %v3550_v43 = vmul.f32 0.5, %v11059_v37  ;;  %v3481_v44 = vmul.f32 %v11031_v1, %v3442_v21  ;;  %v8581_v17 = vpop.f32.mrb[6].mxu0 }
 0x319   : > { %9701 = vtanh.f32 %v3551_v41  ;;  %v11067_v28 = vadd.f32 %v11037_v14, %v3482_v0  ;;  %v3445_v39 = vadd.f32 %v8581_v17, %v11026_v54  ;;  %v3207_v40 = vpop.f32.mrb[7].mxu0 }
 0x31a   : > { %9703 = vtanh.f32 %v3550_v43  ;;  %v11071_v45 = vadd.f32 %v11037_v14, %v3481_v44  ;;  %v3444_v47 = vadd.f32 %v11026_v54, %v3207_v40 }
 0x31b   : > { %v3553_v63 = vmul.f32 0.5, %v11067_v28  ;;  %v3484_v20 = vmul.f32 %v11031_v1, %v3445_v39 }
 0x31c   : > { %v3552_v2 = vmul.f32 0.5, %v11071_v45  ;;  %v3483_v9 = vmul.f32 %v11031_v1, %v3444_v47  ;;  %v8584_v27 = vpop.f32.mrb[8].mxu0 }
 0x31d   : > { %9705 = vtanh.f32 %v3553_v63  ;;  %v11079_v32 = vadd.f32 %v11037_v14, %v3484_v20  ;;  %v3447_v46 = vadd.f32 %v8584_v27, %v11026_v54  ;;  %v3217_v34 = vpop.f32.mrb[9].mxu0 }
 0x31e   : > { %9707 = vtanh.f32 %v3552_v2  ;;  %v11083_v48 = vadd.f32 %v11037_v14, %v3483_v9  ;;  %v3446_v52 = vadd.f32 %v11026_v54, %v3217_v34 }
 0x31f   : > { %v9698_v53 = vpop.eup %9697  ;;  %v3555_v55 = vmul.f32 0.5, %v11079_v32  ;;  %v3486_v57 = vmul.f32 %v11031_v1, %v3447_v46 }
 0x320   : > { %v9700_v26 = vpop.eup %9699  ;;  %v3613_v58 = vmul.f32 0.5, %v9698_v53  ;;  %v3554_v49 = vmul.f32 0.5, %v11083_v48  ;;  %v3485_v59 = vmul.f32 %v11031_v1, %v3446_v52  ;;  %v8587_v60 = vpop.f32.mrb[10].mxu0 }
 0x321   : > { %v3612_v18 = vmul.f32 0.5, %v9700_v26  ;;  %9709 = vtanh.f32 %v3555_v55  ;;  %v11091_v36 = vadd.f32 %v11037_v14, %v3486_v57  ;;  %v3449_v42 = vadd.f32 %v8587_v60, %v11026_v54  ;;  %v3227_v19 = vpop.f32.mrb[11].mxu0 }
 0x322   : > { %v3645_v50 = vadd.f32 0.5, %v3613_v58  ;;  %9711 = vtanh.f32 %v3554_v49  ;;  %v11095_v62 = vadd.f32 %v11037_v14, %v3485_v59  ;;  %v3448_v4 = vadd.f32 %v11026_v54, %v3227_v19 }
 0x323   : > { %v9702_v51 = vpop.eup %9701  ;;  %v3644_v6 = vadd.f32 0.5, %v3612_v18  ;;  %v3557_v7 = vmul.f32 0.5, %v11091_v36  ;;  %v3488_v22 = vmul.f32 %v11031_v1, %v3449_v42 }
 0x324   : > { %v9704_v8 = vpop.eup %9703  ;;  %v3677_v11 = vmul.f32 %v3645_v50, %v11043_v16  ;;  %v3615_v15 = vmul.f32 0.5, %v9702_v51  ;;  %v3556_v5 = vmul.f32 0.5, %v11095_v62  ;;  %v3487_v56 = vmul.f32 %v11031_v1, %v3448_v4  ;;  %v8590_v23 = vpop.f32.mrb[12].mxu0 }
 0x325   : > { %v3676_v25 = vmul.f32 %v3644_v6, %v11047_v24  ;;  %v3614_v35 = vmul.f32 0.5, %v9704_v8  ;;  %9713 = vtanh.f32 %v3557_v7  ;;  %v11105_v3 = vadd.f32 %v11037_v14, %v3488_v22  ;;  %v3237_v10 = vpop.f32.mrb[13].mxu0 }
 0x326   : > { %3741 = vst.msk [vmem:[#allocation2 + $0x9] sm:$0xff] %vm658_vm1, %v3677_v11  ;;  %3709 = vst.msk [vmem:[#allocation2 + $0x21] sm:$0xff] %vm658_vm1, %v3677_v11  ;;  %v3647_v29 = vadd.f32 0.5, %v3615_v15  ;;  %9715 = vtanh.f32 %v3556_v5  ;;  %v11110_v16 = vadd.f32 %v11037_v14, %v3487_v56  ;;  %v3451_v30 = vadd.f32 %v8590_v23, %v11026_v54 }
 0x327   : > { %v9706_v12 = vpop.eup %9705  ;;  %3708 = vst.msk [vmem:[#allocation2 + $0x19] sm:$0xff] %vm658_vm1, %v3676_v25  ;;  %3740 = vst.msk [vmem:[#allocation2 + $0x1] sm:$0xff] %vm658_vm1, %v3676_v25  ;;  %v3646_v24 = vadd.f32 0.5, %v3614_v35  ;;  %v3559_v31 = vmul.f32 0.5, %v11105_v3  ;;  %v3450_v13 = vadd.f32 %v11026_v54, %v3237_v10 }
 0x328   : > { %v9708_v38 = vpop.eup %9707  ;;  %v3679_v21 = vmul.f32 %v3647_v29, %v11055_v33  ;;  %v3617_v41 = vmul.f32 0.5, %v9706_v12  ;;  %v3558_v0 = vmul.f32 0.5, %v11110_v16  ;;  %v3490_v43 = vmul.f32 %v11031_v1, %v3451_v30  ;;  %v8593_v44 = vpop.f32.mrb[14].mxu0 }
 0x329   : > { %v3678_v17 = vmul.f32 %v3646_v24, %v11059_v37  ;;  %v3616_v39 = vmul.f32 0.5, %v9708_v38  ;;  %9717 = vtanh.f32 %v3559_v31  ;;  %v3489_v40 = vmul.f32 %v11031_v1, %v3450_v13  ;;  %v3247_v47 = vpop.f32.mrb[15].mxu0 }
 0x32a   : > { %3711 = vst.msk [vmem:[#allocation2 + $0x39] sm:$0xff] %vm658_vm1, %v3679_v21  ;;  %v3649_v63 = vadd.f32 0.5, %v3617_v41  ;;  %9719 = vtanh.f32 %v3558_v0  ;;  %v11124_v20 = vadd.f32 %v11037_v14, %v3490_v43  ;;  %v3453_v33 = vadd.f32 %v8593_v44, %v11026_v54 }
 0x32b   : > { %v9710_v2 = vpop.eup %9709  ;;  %3710 = vst.msk [vmem:[#allocation2 + $0x31] sm:$0xff] %vm658_vm1, %v3678_v17  ;;  %v3648_v9 = vadd.f32 0.5, %v3616_v39  ;;  %v11129_v37 = vadd.f32 %v11037_v14, %v3489_v40  ;;  %v3452_v27 = vadd.f32 %v11026_v54, %v3247_v47 }
 0x32c   : > { %v9712_v46 = vpop.eup %9711  ;;  %v3681_v34 = vmul.f32 %v3649_v63, %v11067_v28  ;;  %v3619_v52 = vmul.f32 0.5, %v9710_v2  ;;  %v3561_v53 = vmul.f32 0.5, %v11124_v20  ;;  %v3492_v55 = vmul.f32 %v11031_v1, %v3453_v33  ;;  %v8596_v57 = vpop.f32.mrb[16].mxu0 }
 0x32d   : > { %v3680_v26 = vmul.f32 %v3648_v9, %v11071_v45  ;;  %v3618_v58 = vmul.f32 0.5, %v9712_v46  ;;  %v3560_v49 = vmul.f32 0.5, %v11129_v37  ;;  %v3491_v59 = vmul.f32 %v11031_v1, %v3452_v27  ;;  %v3257_v60 = vpop.f32.mrb[17].mxu0  ;;  %v3781_v56 = vld [vmem:[#allocation2 + $0x28] sm:$0x1] }
 0x32e   : > { %3713 = vst.msk [vmem:[#allocation2 + $0x51] sm:$0xff] %vm658_vm1, %v3681_v34  ;;  %v3651_v18 = vadd.f32 0.5, %v3619_v52  ;;  %9721 = vtanh.f32 %v3561_v53  ;;  %v11140_v28 = vadd.f32 %v11037_v14, %v3492_v55  ;;  %v3455_v42 = vadd.f32 %v8596_v57, %v11026_v54  ;;  %v3745_v19 = vld [vmem:[#allocation2 + $0x19] sm:$0x1]  ;;  %v3744_v50 = vld [vmem:[#allocation2 + $0x1] sm:$0x1] }
 0x32f   : > { %v9714_v4 = vpop.eup %9713  ;;  %3712 = vst.msk [vmem:[#allocation2 + $0x49] sm:$0xff] %vm658_vm1, %v3680_v26  ;;  %v3650_v45 = vadd.f32 0.5, %v3618_v58  ;;  %9723 = vtanh.f32 %v3560_v49  ;;  %v11145_v51 = vadd.f32 %v11037_v14, %v3491_v59  ;;  %v3454_v6 = vadd.f32 %v11026_v54, %v3257_v60  ;;  %v3780_v41 = vld [vmem:[#allocation2 + $0x10] sm:$0x1]  ;;  %v11191_v26 = vld [vmem:[#allocation2 + $0x20] sm:$0xff] }
 0x330   : > { %3763 = vst.msk [vmem:[#allocation2 + $0x18] sm:$0x1] %vm714_vm2, %v3745_v19  ;;  %3762 = vst.msk [vmem:[#allocation2] sm:$0x1] %vm714_vm2, %v3744_v50  ;;  %v9716_v7 = vpop.eup %9715  ;;  %v3683_v22 = vmul.f32 %v3651_v18, %v11079_v32  ;;  %v3621_v8 = vmul.f32 0.5, %v9714_v4  ;;  %v3563_v11 = vmul.f32 0.5, %v11140_v28  ;;  %v3494_v15 = vmul.f32 %v11031_v1, %v3455_v42 }
 0x331   : > { %v8599_v5 = vpop.f32.mrb[18].mxu0  ;;  %v3682_v23 = vmul.f32 %v3650_v45, %v11083_v48  ;;  %v3620_v25 = vmul.f32 0.5, %v9716_v7  ;;  %v3562_v35 = vmul.f32 0.5, %v11145_v51  ;;  %v3493_v10 = vmul.f32 %v11031_v1, %v3454_v6  ;;  %3799 = vst.msk [vmem:[#allocation2 + $0x29] sm:$0x1] %vm714_vm2, %v3781_v56 }
 0x332   : > { %v3267_v29 = vpop.f32.mrb[19].mxu0  ;;  %v3782_v30 = vld [vmem:[#allocation2 + $0x40] sm:$0x1]  ;;  %3715 = vst.msk [vmem:[#allocation2 + $0x69] sm:$0xff] %vm658_vm1, %v3683_v22  ;;  %v3653_v32 = vadd.f32 0.5, %v3621_v8  ;;  %9725 = vtanh.f32 %v3563_v11  ;;  %v11159_v12 = vadd.f32 %v11037_v14, %v3494_v15  ;;  %v3457_v24 = vadd.f32 %v8599_v5, %v11026_v54  ;;  %v11225_v56 = vld [vmem:[#allocation2 + $0x38] sm:$0xff] }
 0x333   : > { %v3746_v31 = vld [vmem:[#allocation2 + $0x31] sm:$0x1]  ;;  %3800 = vst.msk [vmem:[#allocation2 + $0x41] sm:$0x1] %vm714_vm2, %v3782_v30  ;;  %v9718_v48 = vpop.eup %9717  ;;  %v3652_v13 = vadd.f32 0.5, %v3620_v25  ;;  %9727 = vtanh.f32 %v3562_v35  ;;  %v11165_v38 = vadd.f32 %v11037_v14, %v3493_v10  ;;  %v3456_v21 = vadd.f32 %v11026_v54, %v3267_v29 }
 0x334   : > { %3714 = vst.msk [vmem:[#allocation2 + $0x61] sm:$0xff] %vm658_vm1, %v3682_v23  ;;  %v9720_v0 = vpop.eup %9719  ;;  %v3685_v43 = vmul.f32 %v3653_v32, %v11091_v36  ;;  %v3623_v44 = vmul.f32 0.5, %v9718_v48  ;;  %v3565_v17 = vmul.f32 0.5, %v11159_v12  ;;  %v3496_v39 = vmul.f32 %v11031_v1, %v3457_v24  ;;  %v8602_v40 = vpop.f32.mrb[20].mxu0  ;;  %v11197_v58 = vld [vmem:[%s12463_s7 + $0x18] sm:$0xf] }
 0x335   : > { %3764 = vst.msk [vmem:[#allocation2 + $0x30] sm:$0x1] %vm714_vm2, %v3746_v31  ;;  %3798 = vst.msk [vmem:[#allocation2 + $0x11] sm:$0x1] %vm714_vm2, %v3780_v41  ;;  %v3684_v47 = vmul.f32 %v3652_v13, %v11095_v62  ;;  %v3622_v63 = vmul.f32 0.5, %v9720_v0  ;;  %v3564_v33 = vmul.f32 0.5, %v11165_v38  ;;  %v3495_v2 = vmul.f32 %v11031_v1, %v3456_v21 }
 0x336   : > { %v3277_v9 = vpop.f32.mrb[21].mxu0  ;;  %v3783_v27 = vld [vmem:[#allocation2 + $0x58] sm:$0x1]  ;;  %3717 = vst.msk [vmem:[#allocation2 + $0x81] sm:$0xff] %vm658_vm1, %v3685_v43  ;;  %v3655_v36 = vadd.f32 0.5, %v3623_v44  ;;  %9729 = vtanh.f32 %v3565_v17  ;;  %v11178_v46 = vadd.f32 %v11037_v14, %v3496_v39  ;;  %v3459_v34 = vadd.f32 %v8602_v40, %v11026_v54 }
 0x337   : > { %v11181_v52 = vld [vmem:[#allocation2 + $0x18] sm:$0xff]  ;;  %v3747_v53 = vld [vmem:[#allocation2 + $0x49] sm:$0x1]  ;;  %3801 = vst.msk [vmem:[#allocation2 + $0x59] sm:$0x1] %vm714_vm2, %v3783_v27  ;;  %v3654_v62 = vadd.f32 0.5, %v3622_v63  ;;  %9731 = vtanh.f32 %v3564_v33  ;;  %v11186_v55 = vadd.f32 %v11037_v14, %v3495_v2  ;;  %v3458_v57 = vadd.f32 %v11026_v54, %v3277_v9 }
 0x338   : > { %3716 = vst.msk [vmem:[#allocation2 + $0x79] sm:$0xff] %vm658_vm1, %v3684_v47  ;;  %8620 = vmatprep.mubr.msk.f32.mxu1 %vm658_vm1, %v11181_v52  ;;  %v9722_v49 = vpop.eup %9721  ;;  %v3687_v59 = vmul.f32 %v3655_v36, %v11105_v3  ;;  %v3567_v60 = vmul.f32 0.5, %v11178_v46  ;;  %v3498_v18 = vmul.f32 %v11031_v1, %v3459_v34  ;;  %v8605_v42 = vpop.f32.mrb[22].mxu0 }
 0x339   : > { %3765 = vst.msk [vmem:[#allocation2 + $0x48] sm:$0x1] %vm714_vm2, %v3747_v53  ;;  %8621 = vmatmul.mubr.msk.f32.vlgmr.msra.gmra.mrb[0].mxu1 %vm658_vm1, %v11191_v26  ;;  %v9724_v19 = vpop.eup %9723  ;;  %v3686_v50 = vmul.f32 %v3654_v62, %v11110_v16  ;;  %v3625_v4 = vmul.f32 0.5, %v9722_v49  ;;  %v3566_v45 = vmul.f32 0.5, %v11186_v55  ;;  %v3497_v6 = vmul.f32 %v11031_v1, %v3458_v57  ;;  %v3287_v7 = vpop.f32.mrb[23].mxu0 }
 0x33a   : > { %8669 = vmatpush3.msk.msra.mxu1 %vm905_vm0, %v11019_v61  ;;  %3719 = vst.msk [vmem:[#allocation2 + $0x99] sm:$0xff] %vm658_vm1, %v3687_v59  ;;  %v3624_v3 = vmul.f32 0.5, %v9724_v19  ;;  %9733 = vtanh.f32 %v3567_v60  ;;  %v11211_v22 = vadd.f32 %v11037_v14, %v3498_v18  ;;  %v3461_v8 = vadd.f32 %v8605_v42, %v11026_v54  ;;  %v3784_v23 = vld [vmem:[#allocation2 + $0x70] sm:$0x1] }
 0x33b   : > { %v3748_v16 = vld [vmem:[#allocation2 + $0x61] sm:$0x1]  ;;  %8718 = vmatprep.subr.msk.mxu1 %vm905_vm0, %v11197_v58  ;;  %3718 = vst.msk [vmem:[#allocation2 + $0x91] sm:$0xff] %vm658_vm1, %v3686_v50  ;;  %v3657_v15 = vadd.f32 0.5, %v3625_v4  ;;  %9735 = vtanh.f32 %v3566_v45  ;;  %v11220_v61 = vadd.f32 %v11037_v14, %v3497_v6  ;;  %v3460_v5 = vadd.f32 %v11026_v54, %v3287_v7 }
 0x33c   : > { %v11214_v11 = vld [vmem:[#allocation2 + $0x30] sm:$0xff]  ;;  %3766 = vst.msk [vmem:[#allocation2 + $0x60] sm:$0x1] %vm714_vm2, %v3748_v16  ;;  %v9726_v25 = vpop.eup %9725  ;;  %v3656_v35 = vadd.f32 0.5, %v3624_v3  ;;  %v3569_v10 = vmul.f32 0.5, %v11211_v22  ;;  %v3500_v29 = vmul.f32 %v11031_v1, %v3461_v8  ;;  %v8608_v30 = vpop.f32.mrb[24].mxu0 }
 0x33d   : > { %8623 = vmatprep.mubr.msk.f32.mxu1 %vm658_vm1, %v11214_v11  ;;  %3802 = vst.msk [vmem:[#allocation2 + $0x71] sm:$0x1] %vm714_vm2, %v3784_v23  ;;  %v9728_v32 = vpop.eup %9727  ;;  %v3689_v24 = vmul.f32 %v3657_v15, %v11124_v20  ;;  %v3627_v31 = vmul.f32 0.5, %v9726_v25  ;;  %v3568_v48 = vmul.f32 0.5, %v11220_v61  ;;  %v3499_v13 = vmul.f32 %v11031_v1, %v3460_v5  ;;  %v3297_v21 = vpop.f32.mrb[25].mxu0 }
 0x33e   : > { %8624 = vmatmul.mubr.msk.f32.gmra.mrb[2].mxu1 %vm658_vm1, %v11225_v56  ;;  %v3688_v41 = vmul.f32 %v3656_v35, %v11129_v37  ;;  %v3626_v0 = vmul.f32 0.5, %v9728_v32  ;;  %9737 = vtanh.f32 %v3569_v10  ;;  %v11238_v43 = vadd.f32 %v11037_v14, %v3500_v29  ;;  %v11249_v37 = vld [vmem:[#allocation2 + $0x50] sm:$0xff]  ;;  %v3785_v47 = vld [vmem:[#allocation2 + $0x88] sm:$0x1] }
 0x33f   : > { %v3749_v17 = vld [vmem:[#allocation2 + $0x79] sm:$0x1]  ;;  %3721 = vst.msk [vmem:[#allocation2 + $0xb1] sm:$0xff] %vm658_vm1, %v3689_v24  ;;  %v3659_v39 = vadd.f32 0.5, %v3627_v31  ;;  %9739 = vtanh.f32 %v3568_v48  ;;  %v11244_v20 = vadd.f32 %v11037_v14, %v3499_v13  ;;  %v3463_v40 = vadd.f32 %v8608_v30, %v11026_v54 }
 0x340   : > { %v11240_v44 = vld [vmem:[#allocation2 + $0x48] sm:$0xff]  ;;  %3767 = vst.msk [vmem:[#allocation2 + $0x78] sm:$0x1] %vm714_vm2, %v3749_v17  ;;  %v9730_v63 = vpop.eup %9729  ;;  %v3658_v33 = vadd.f32 0.5, %v3626_v0  ;;  %v3571_v2 = vmul.f32 0.5, %v11238_v43  ;;  %v3462_v9 = vadd.f32 %v11026_v54, %v3297_v21  ;;  %v8611_v27 = vpop.f32.mrb[26].mxu0 }
 0x341   : > { %8626 = vmatprep.mubr.msk.f32.mxu1 %vm658_vm1, %v11240_v44  ;;  %3720 = vst.msk [vmem:[#allocation2 + $0xa9] sm:$0xff] %vm658_vm1, %v3688_v41  ;;  %v9732_v36 = vpop.eup %9731  ;;  %v3691_v34 = vmul.f32 %v3659_v39, %v11140_v28  ;;  %v3629_v53 = vmul.f32 0.5, %v9730_v63  ;;  %v3570_v62 = vmul.f32 0.5, %v11244_v20  ;;  %v3502_v57 = vmul.f32 %v11031_v1, %v3463_v40  ;;  %v3307_v49 = vpop.f32.mrb[27].mxu0  ;;  %v3786_v59 = vld [vmem:[#allocation2 + $0xa0] sm:$0x1] }
 0x342   : > { %8627 = vmatmul.mubr.msk.f32.gmra.mrb[4].mxu1 %vm658_vm1, %v11249_v37  ;;  %3803 = vst.msk [vmem:[#allocation2 + $0x89] sm:$0x1] %vm714_vm2, %v3785_v47  ;;  %v3690_v60 = vmul.f32 %v3658_v33, %v11145_v51  ;;  %v3628_v18 = vmul.f32 0.5, %v9732_v36  ;;  %9741 = vtanh.f32 %v3571_v2  ;;  %v3501_v42 = vmul.f32 %v11031_v1, %v3462_v9  ;;  %v3750_v50 = vld [vmem:[#allocation2 + $0x91] sm:$0x1]  ;;  %v11273_v51 = vld [vmem:[#allocation2 + $0x68] sm:$0xff] }
 0x343   : > { %v11263_v19 = vld [vmem:[#allocation2 + $0x60] sm:$0xff]  ;;  %3804 = vst.msk [vmem:[#allocation2 + $0xa1] sm:$0x1] %vm714_vm2, %v3786_v59  ;;  %v3661_v28 = vadd.f32 0.5, %v3629_v53  ;;  %9743 = vtanh.f32 %v3570_v62  ;;  %v11268_v4 = vadd.f32 %v11037_v14, %v3502_v57  ;;  %v3465_v45 = vadd.f32 %v8611_v27, %v11026_v54  ;;  %3768 = vst.msk [vmem:[#allocation2 + $0x90] sm:$0x1] %vm714_vm2, %v3750_v50 }
 0x344   : > { %3723 = vst.msk [vmem:[#allocation2 + $0xc9] sm:$0xff] %vm658_vm1, %v3691_v34  ;;  %8629 = vmatprep.mubr.msk.f32.mxu1 %vm658_vm1, %v11263_v19  ;;  %v9734_v6 = vpop.eup %9733  ;;  %3722 = vst.msk [vmem:[#allocation2 + $0xc1] sm:$0xff] %vm658_vm1, %v3690_v60  ;;  %v3660_v7 = vadd.f32 0.5, %v3628_v18  ;;  %v11278_v3 = vadd.f32 %v11037_v14, %v3501_v42  ;;  %v3464_v8 = vadd.f32 %v11026_v54, %v3307_v49  ;;  %v8614_v16 = vpop.f32.mrb[28].mxu0 }
 0x345   : > { %v9736_v15 = vpop.eup %9735  ;;  %v3693_v5 = vmul.f32 %v3661_v28, %v11159_v12  ;;  %v3631_v23 = vmul.f32 0.5, %v9734_v6  ;;  %v3573_v25 = vmul.f32 0.5, %v11268_v4  ;;  %v3504_v35 = vmul.f32 %v11031_v1, %v3465_v45  ;;  %v3317_v10 = vpop.f32.mrb[29].mxu0 }
 0x346   : > { %8630 = vmatmul.mubr.msk.f32.gmra.mrb[6].mxu1 %vm658_vm1, %v11273_v51  ;;  %v3692_v29 = vmul.f32 %v3660_v7, %v11165_v38  ;;  %v3630_v30 = vmul.f32 0.5, %v9736_v15  ;;  %v3572_v32 = vmul.f32 0.5, %v11278_v3  ;;  %v3503_v24 = vmul.f32 %v11031_v1, %v3464_v8  ;;  %v3787_v48 = vld [vmem:[#allocation2 + $0xb8] sm:$0x1]  ;;  %v11298_v38 = vld [vmem:[#allocation2 + $0x80] sm:$0xff] }
 0x347   : > { %v11289_v31 = vld [vmem:[#allocation2 + $0x78] sm:$0xff]  ;;  %3725 = vst.msk [vmem:[#allocation2 + $0xe1] sm:$0xff] %vm658_vm1, %v3693_v5  ;;  %v3663_v13 = vadd.f32 0.5, %v3631_v23  ;;  %9745 = vtanh.f32 %v3573_v25  ;;  %v11293_v12 = vadd.f32 %v11037_v14, %v3504_v35  ;;  %v3467_v21 = vadd.f32 %v8614_v16, %v11026_v54 }
 0x348   : > { %8632 = vmatprep.mubr.msk.f32.mxu1 %vm658_vm1, %v11289_v31  ;;  %v3751_v41 = vld [vmem:[#allocation2 + $0xa9] sm:$0x1]  ;;  %3805 = vst.msk [vmem:[#allocation2 + $0xb9] sm:$0x1] %vm714_vm2, %v3787_v48  ;;  %v9738_v0 = vpop.eup %9737  ;;  %v3662_v17 = vadd.f32 0.5, %v3630_v30  ;;  %9747 = vtanh.f32 %v3572_v32  ;;  %v11303_v39 = vadd.f32 %v11037_v14, %v3503_v24  ;;  %v3466_v40 = vadd.f32 %v11026_v54, %v3317_v10  ;;  %v8617_v47 = vpop.f32.mrb[30].mxu0 }
 0x349   : > { %3724 = vst.msk [vmem:[#allocation2 + $0xd9] sm:$0xff] %vm658_vm1, %v3692_v29  ;;  %v9740_v63 = vpop.eup %9739  ;;  %v3695_v33 = vmul.f32 %v3663_v13, %v11178_v46  ;;  %v3633_v2 = vmul.f32 0.5, %v9738_v0  ;;  %v3575_v9 = vmul.f32 0.5, %v11293_v12  ;;  %v3506_v27 = vmul.f32 %v11031_v1, %v3467_v21  ;;  %v3327_v36 = vpop.f32.mrb[31].mxu0 }
 0x34a   : > { %8633 = vmatmul.mubr.msk.f32.gmra.mrb[8].mxu1 %vm658_vm1, %v11298_v38  ;;  %3769 = vst.msk [vmem:[#allocation2 + $0xa8] sm:$0x1] %vm714_vm2, %v3751_v41  ;;  %v3694_v34 = vmul.f32 %v3662_v17, %v11186_v55  ;;  %v3632_v53 = vmul.f32 0.5, %v9740_v63  ;;  %v3574_v62 = vmul.f32 0.5, %v11303_v39  ;;  %v3505_v57 = vmul.f32 %v11031_v1, %v3466_v40  ;;  %v11315_v49 = vld [vmem:[#allocation2 + $0x90] sm:$0xff]  ;;  %v11324_v55 = vld [vmem:[#allocation2 + $0x98] sm:$0xff] }
 0x34b   : > { %v3788_v59 = vld [vmem:[#allocation2 + $0xd0] sm:$0x1]  ;;  %3727 = vst.msk [vmem:[#allocation2 + $0xf9] sm:$0xff] %vm658_vm1, %v3695_v33  ;;  %v3665_v60 = vadd.f32 0.5, %v3633_v2  ;;  %9749 = vtanh.f32 %v3575_v9  ;;  %v11319_v46 = vadd.f32 %v11037_v14, %v3506_v27  ;;  %v3469_v18 = vadd.f32 %v8617_v47, %v11026_v54  ;;  %8635 = vmatprep.mubr.msk.f32.mxu1 %vm658_vm1, %v11315_v49  ;;  %v3752_v42 = vld [vmem:[#allocation2 + $0xc1] sm:$0x1] }
 0x34c   : > { %3806 = vst.msk [vmem:[#allocation2 + $0xd1] sm:$0x1] %vm714_vm2, %v3788_v59  ;;  %v9742_v50 = vpop.eup %9741  ;;  %v3664_v28 = vadd.f32 0.5, %v3632_v53  ;;  %9751 = vtanh.f32 %v3574_v62  ;;  %v11329_v45 = vadd.f32 %v11037_v14, %v3505_v57  ;;  %v3468_v6 = vadd.f32 %v11026_v54, %v3327_v36  ;;  %3770 = vst.msk [vmem:[#allocation2 + $0xc0] sm:$0x1] %vm714_vm2, %v3752_v42 }
 0x34d   : > { %3726 = vst.msk [vmem:[#allocation2 + $0xf1] sm:$0xff] %vm658_vm1, %v3694_v34  ;;  %v9744_v7 = vpop.eup %9743  ;;  %v3697_v8 = vmul.f32 %v3665_v60, %v11211_v22  ;;  %v3635_v16 = vmul.f32 0.5, %v9742_v50  ;;  %v3577_v15 = vmul.f32 0.5, %v11319_v46  ;;  %v3508_v5 = vmul.f32 %v11031_v1, %v3469_v18 }
 0x34e   : > { %8636 = vmatmul.mubr.msk.f32.gmra.mrb[10].mxu1 %vm658_vm1, %v11324_v55  ;;  %v3696_v23 = vmul.f32 %v3664_v28, %v11220_v61  ;;  %v3634_v25 = vmul.f32 0.5, %v9744_v7  ;;  %v3576_v35 = vmul.f32 0.5, %v11329_v45  ;;  %v3507_v54 = vmul.f32 %v11031_v1, %v3468_v6  ;;  %v3789_v10 = vld [vmem:[#allocation2 + $0xe8] sm:$0x1]  ;;  %v11354_v1 = vld [vmem:[#allocation2 + $0xb0] sm:$0xff] }
 0x34f   : > { %3729 = vst.msk [vmem:[#allocation2 + $0x111] sm:$0xff] %vm658_vm1, %v3697_v8  ;;  %v3667_v29 = vadd.f32 0.5, %v3635_v16  ;;  %9753 = vtanh.f32 %v3577_v15  ;;  %v11343_v30 = vadd.f32 %v11037_v14, %v3508_v5 }
 0x350   : > { %v3753_v32 = vld [vmem:[#allocation2 + $0xd9] sm:$0x1]  ;;  %3807 = vst.msk [vmem:[#allocation2 + $0xe9] sm:$0x1] %vm714_vm2, %v3789_v10  ;;  %v3666_v61 = vadd.f32 0.5, %v3634_v25  ;;  %9755 = vtanh.f32 %v3576_v35  ;;  %v11350_v24 = vadd.f32 %v11037_v14, %v3507_v54  ;;  %v11383_v42 = vld [vmem:[#allocation2 + $0xe0] sm:$0xff] }
 0x351   : > { %v11345_v22 = vld [vmem:[#allocation2 + $0xa8] sm:$0xff]  ;;  %3728 = vst.msk [vmem:[#allocation2 + $0x109] sm:$0xff] %vm658_vm1, %v3696_v23  ;;  %v9746_v48 = vpop.eup %9745  ;;  %v3699_v13 = vmul.f32 %v3667_v29, %v11238_v43  ;;  %v3579_v21 = vmul.f32 0.5, %v11343_v30 }
 0x352   : > { %8638 = vmatprep.mubr.msk.f32.mxu1 %vm658_vm1, %v11345_v22  ;;  %3771 = vst.msk [vmem:[#allocation2 + $0xd8] sm:$0x1] %vm714_vm2, %v3753_v32  ;;  %v9748_v41 = vpop.eup %9747  ;;  %v3698_v0 = vmul.f32 %v3666_v61, %v11244_v20  ;;  %v3637_v14 = vmul.f32 0.5, %v9746_v48  ;;  %v3578_v17 = vmul.f32 0.5, %v11350_v24  ;;  %v3790_v40 = vld [vmem:[#allocation2 + $0x100] sm:$0x1] }
 0x353   : > { %8639 = vmatmul.mubr.msk.f32.gmra.mrb[12].mxu1 %vm658_vm1, %v11354_v1  ;;  %3731 = vst.msk [vmem:[#allocation2 + $0x129] sm:$0xff] %vm658_vm1, %v3699_v13  ;;  %v3636_v47 = vmul.f32 0.5, %v9748_v41  ;;  %9757 = vtanh.f32 %v3579_v21  ;;  %v11364_v63 = vld [vmem:[#allocation2 + $0xc0] sm:$0xff]  ;;  %v11370_v20 = vld [vmem:[#allocation2 + $0xc8] sm:$0xff] }
 0x354   : > { %v3754_v33 = vld [vmem:[#allocation2 + $0xf1] sm:$0x1]  ;;  %3808 = vst.msk [vmem:[#allocation2 + $0x101] sm:$0x1] %vm714_vm2, %v3790_v40  ;;  %v3669_v43 = vadd.f32 0.5, %v3637_v14  ;;  %9759 = vtanh.f32 %v3578_v17  ;;  %8641 = vmatprep.mubr.msk.f32.mxu1 %vm658_vm1, %v11364_v63  ;;  %v11396_v23 = vld [vmem:[#allocation2 + $0xf8] sm:$0xff] }
 0x355   : > { %3730 = vst.msk [vmem:[#allocation2 + $0x121] sm:$0xff] %vm658_vm1, %v3698_v0  ;;  %v9750_v2 = vpop.eup %9749  ;;  %v3668_v9 = vadd.f32 0.5, %v3636_v47 }
 0x356   : > { %3772 = vst.msk [vmem:[#allocation2 + $0xf0] sm:$0x1] %vm714_vm2, %v3754_v33  ;;  %v9752_v27 = vpop.eup %9751  ;;  %v3701_v36 = vmul.f32 %v3669_v43, %v11268_v4  ;;  %v3639_v34 = vmul.f32 0.5, %v9750_v2  ;;  %v3791_v53 = vld [vmem:[#allocation2 + $0x118] sm:$0x1] }
 0x357   : > { %8642 = vmatmul.mubr.msk.f32.gmra.mrb[14].mxu1 %vm658_vm1, %v11370_v20  ;;  %v3700_v62 = vmul.f32 %v3668_v9, %v11278_v3  ;;  %v3638_v57 = vmul.f32 0.5, %v9752_v27  ;;  %3809 = vst.msk [vmem:[#allocation2 + $0x119] sm:$0x1] %vm714_vm2, %v3791_v53 }
 0x358   : > { %v3755_v60 = vld [vmem:[#allocation2 + $0x109] sm:$0x1]  ;;  %3733 = vst.msk [vmem:[#allocation2 + $0x141] sm:$0xff] %vm658_vm1, %v3701_v36  ;;  %v3671_v18 = vadd.f32 0.5, %v3639_v34  ;;  %v11410_v21 = vld [vmem:[#allocation2 + $0x110] sm:$0xff] }
 0x359   : > { %v11377_v59 = vld [vmem:[#allocation2 + $0xd8] sm:$0xff]  ;;  %3773 = vst.msk [vmem:[#allocation2 + $0x108] sm:$0x1] %vm714_vm2, %v3755_v60  ;;  %v9754_v4 = vpop.eup %9753  ;;  %v3670_v3 = vadd.f32 0.5, %v3638_v57 }
 0x35a   : > { %8644 = vmatprep.mubr.msk.f32.mxu1 %vm658_vm1, %v11377_v59  ;;  %3732 = vst.msk [vmem:[#allocation2 + $0x139] sm:$0xff] %vm658_vm1, %v3700_v62  ;;  %v9756_v50 = vpop.eup %9755  ;;  %v3703_v28 = vmul.f32 %v3671_v18, %v11293_v12  ;;  %v3641_v6 = vmul.f32 0.5, %v9754_v4  ;;  %v3792_v25 = vld [vmem:[#allocation2 + $0x130] sm:$0x1]  ;;  %v3817_v4 = vld [vmem:[#allocation2] sm:$0xff] }
 0x35b   : > { %8645 = vmatmul.mubr.msk.f32.gmra.mrb[16].mxu1 %vm658_vm1, %v11383_v42  ;;  %v3702_v7 = vmul.f32 %v3670_v3, %v11303_v39  ;;  %v3640_v8 = vmul.f32 0.5, %v9756_v50  ;;  %3810 = vst.msk [vmem:[#allocation2 + $0x131] sm:$0x1] %vm714_vm2, %v3792_v25  ;;  %v3818_v3 = vld [vmem:[#allocation2 + $0x8] sm:$0xff]  ;;  %v7323_v50 = vld [vmem:[%s12463_s7 + $0x10] sm:$0xf] }
 0x35c   : > { %v3756_v15 = vld [vmem:[#allocation2 + $0x121] sm:$0x1]  ;;  %3735 = vst.msk [vmem:[#allocation2 + $0x159] sm:$0xff] %vm658_vm1, %v3703_v28  ;;  %v3673_v5 = vadd.f32 0.5, %v3641_v6  ;;  %v11425_v40 = vld [vmem:[#allocation2 + $0x128] sm:$0xff]  ;;  %v11678_v6 = vld [vmem:[#allocation2 + $0xd9] sm:$0xff] }
 0x35d   : > { %v11391_v16 = vld [vmem:[#allocation2 + $0xf0] sm:$0xff]  ;;  %3774 = vst.msk [vmem:[#allocation2 + $0x120] sm:$0x1] %vm714_vm2, %v3756_v15  ;;  %v9758_v35 = vpop.eup %9757  ;;  %v3672_v12 = vadd.f32 0.5, %v3640_v8 }
 0x35e   : > { %8647 = vmatprep.mubr.msk.f32.mxu1 %vm658_vm1, %v11391_v16  ;;  %3734 = vst.msk [vmem:[#allocation2 + $0x151] sm:$0xff] %vm658_vm1, %v3702_v7  ;;  %v9760_v39 = vpop.eup %9759  ;;  %v3705_v54 = vmul.f32 %v3673_v5, %v11319_v46  ;;  %v3643_v10 = vmul.f32 0.5, %v9758_v35  ;;  %v11674_v28 = vld [vmem:[#allocation2 + $0xc9] sm:$0xff]  ;;  %v11682_v7 = vld [vmem:[#allocation2 + $0xe1] sm:$0xff]  ;;  %v11686_v8 = vld [vmem:[#allocation2 + $0xf1] sm:$0xff] }
 0x35f   : > { %8648 = vmatmul.mubr.msk.f32.gmra.mrb[18].mxu1 %vm658_vm1, %v11396_v23  ;;  %v3704_v29 = vmul.f32 %v3672_v12, %v11329_v45  ;;  %v3642_v32 = vmul.f32 0.5, %v9760_v39  ;;  %v3793_v48 = vld [vmem:[#allocation2 + $0x148] sm:$0x1]  ;;  %v11694_v15 = vld [vmem:[#allocation2 + $0x109] sm:$0xff]  ;;  %v11698_v5 = vld [vmem:[#allocation2 + $0x111] sm:$0xff] }
 0x360   : > { %v11405_v61 = vld [vmem:[#allocation2 + $0x108] sm:$0xff]  ;;  %3737 = vst.msk [vmem:[#allocation2 + $0x171] sm:$0xff] %vm658_vm1, %v3705_v54  ;;  %v3675_v13 = vadd.f32 0.5, %v3643_v10 }
 0x361   : > { %8650 = vmatprep.mubr.msk.f32.mxu1 %vm658_vm1, %v11405_v61  ;;  %v3757_v41 = vld [vmem:[#allocation2 + $0x139] sm:$0x1]  ;;  %3811 = vst.msk [vmem:[#allocation2 + $0x149] sm:$0x1] %vm714_vm2, %v3793_v48  ;;  %v3674_v46 = vadd.f32 0.5, %v3642_v32  ;;  %v11438_v43 = vld [vmem:[#allocation2 + $0x140] sm:$0xff] }
 0x362   : > { %3736 = vst.msk [vmem:[#allocation2 + $0x169] sm:$0xff] %vm658_vm1, %v3704_v29  ;;  %v3707_v45 = vmul.f32 %v3675_v13, %v11343_v30  ;;  %v11706_v25 = vld [vmem:[#allocation2 + $0x129] sm:$0xff]  ;;  %v11710_v35 = vld [vmem:[#allocation2 + $0x139] sm:$0xff]  ;;  %v11714_v12 = vld [vmem:[#allocation2 + $0x141] sm:$0xff] }
 0x363   : > { %8651 = vmatmul.mubr.msk.f32.gmra.mrb[20].mxu1 %vm658_vm1, %v11410_v21  ;;  %3775 = vst.msk [vmem:[#allocation2 + $0x138] sm:$0x1] %vm714_vm2, %v3757_v41  ;;  %v3706_v0 = vmul.f32 %v3674_v46, %v11350_v24  ;;  %v3794_v17 = vld [vmem:[#allocation2 + $0x160] sm:$0x1]  ;;  %v4682_v48 = vld [vmem:[#allocation2 + $0x1] sm:$0xff]  ;;  %v4683_v13 = vld [vmem:[#allocation2 + $0x9] sm:$0xff] }
 0x364   : > { %v11419_v14 = vld [vmem:[#allocation2 + $0x120] sm:$0xff]  ;;  %3739 = vst.msk [vmem:[#allocation2 + $0x189] sm:$0xff] %vm658_vm1, %v3707_v45  ;;  %3743 = vst.msk [vmem:[#allocation2 + $0x1a1] sm:$0xff] %vm658_vm1, %v3707_v45  ;;  %v7424_v41 = vld [vmem:[%s12463_s7 + $0x8] sm:$0xf] }
 0x365   : > { %8653 = vmatprep.mubr.msk.f32.mxu1 %vm658_vm1, %v11419_v14  ;;  %v3758_v47 = vld [vmem:[#allocation2 + $0x151] sm:$0x1]  ;;  %3812 = vst.msk [vmem:[#allocation2 + $0x161] sm:$0x1] %vm714_vm2, %v3794_v17  ;;  %v11447_v27 = vld [vmem:[#allocation2 + $0x158] sm:$0xff] }
 0x366   : > { %3738 = vst.msk [vmem:[#allocation2 + $0x181] sm:$0xff] %vm658_vm1, %v3706_v0  ;;  %3742 = vst.msk [vmem:[#allocation2 + $0x199] sm:$0xff] %vm658_vm1, %v3706_v0  ;;  %v11718_v39 = vld [vmem:[#allocation2 + $0x151] sm:$0xff]  ;;  %v11722_v54 = vld [vmem:[#allocation2 + $0x159] sm:$0xff] }
 0x367   : > { %8654 = vmatmul.mubr.msk.f32.gmra.mrb[22].mxu1 %vm658_vm1, %v11425_v40  ;;  %3776 = vst.msk [vmem:[#allocation2 + $0x150] sm:$0x1] %vm714_vm2, %v3758_v47  ;;  %v3795_v30 = vld [vmem:[#allocation2 + $0x178] sm:$0x1]  ;;  %v11877_v0 = vld [vmem:[#allocation2 + $0x1a] sm:$0xff] }
 0x368   : > { %3813 = vst.msk [vmem:[#allocation2 + $0x179] sm:$0x1] %vm714_vm2, %v3795_v30  ;;  %v11730_v29 = vld [vmem:[#allocation2 + $0x171] sm:$0xff]  ;;  %v11886_v17 = vld [vmem:[%s12463_s7 + $0x20] sm:$0xf] }
 0x369   : > { %v3759_v33 = vld [vmem:[#allocation2 + $0x169] sm:$0x1]  ;;  %v11459_v57 = vld [vmem:[#allocation2 + $0x170] sm:$0xff]  ;;  %v11897_v47 = vld [vmem:[#allocation2 + $0x3a] sm:$0xff] }
 0x36a   : > { %v11433_v24 = vld [vmem:[#allocation2 + $0x138] sm:$0xff]  ;;  %3777 = vst.msk [vmem:[#allocation2 + $0x168] sm:$0x1] %vm714_vm2, %v3759_v33  ;;  %v11726_v10 = vld [vmem:[#allocation2 + $0x169] sm:$0xff] }
 0x36b   : > { %8656 = vmatprep.mubr.msk.f32.mxu1 %vm658_vm1, %v11433_v24  ;;  %v3796_v34 = vld [vmem:[#allocation2 + $0x190] sm:$0x1]  ;;  %v3797_v53 = vld [vmem:[#allocation2 + $0x1a8] sm:$0x1] }
 0x36c   : > { %8657 = vmatmul.mubr.msk.f32.gmra.mrb[24].mxu1 %vm658_vm1, %v11438_v43  ;;  %3814 = vst.msk [vmem:[#allocation2 + $0x191] sm:$0x1] %vm714_vm2, %v3796_v34  ;;  %3815 = vst.msk [vmem:[#allocation2 + $0x1a9] sm:$0x1] %vm714_vm2, %v3797_v53  ;;  %v4717_v45 = vld [vmem:[#allocation2 + $0x1a1] sm:$0xff]  ;;  %v11901_v30 = vld [vmem:[#allocation2 + $0x4a] sm:$0xff] }
 0x36d   : > { %v3760_v9 = vld [vmem:[#allocation2 + $0x181] sm:$0x1]  ;;  %v3761_v36 = vld [vmem:[#allocation2 + $0x199] sm:$0x1]  ;;  %v11467_v18 = vld [vmem:[#allocation2 + $0x188] sm:$0xff] }
 0x36e   : > { %v11443_v2 = vld [vmem:[#allocation2 + $0x150] sm:$0xff]  ;;  %3778 = vst.msk [vmem:[#allocation2 + $0x180] sm:$0x1] %vm714_vm2, %v3760_v9  ;;  %3779 = vst.msk [vmem:[#allocation2 + $0x198] sm:$0x1] %vm714_vm2, %v3761_v36  ;;  %v11734_v32 = vld [vmem:[#allocation2 + $0x181] sm:$0xff] }
 0x36f   : > { %8659 = vmatprep.mubr.msk.f32.mxu1 %vm658_vm1, %v11443_v2  ;;  %v4716_v46 = vld [vmem:[#allocation2 + $0x199] sm:$0xff]  ;;  %v11909_v33 = vld [vmem:[#allocation2 + $0x62] sm:$0xff]  ;;  %v11933_v34 = vld [vmem:[#allocation2 + $0xaa] sm:$0xff] }
 0x370   : > { %8660 = vmatmul.mubr.msk.f32.gmra.mrb[26].mxu1 %vm658_vm1, %v11447_v27  ;;  %v11921_v9 = vld [vmem:[#allocation2 + $0x82] sm:$0xff]  ;;  %v11929_v36 = vld [vmem:[#allocation2 + $0x9a] sm:$0xff]  ;;  %v11937_v53 = vld [vmem:[#allocation2 + $0xb2] sm:$0xff] }
 0x371   : > { %v11454_v62 = vld [vmem:[#allocation2 + $0x168] sm:$0xff] }
 0x372   : > { %8662 = vmatprep.mubr.msk.f32.mxu1 %vm658_vm1, %v11454_v62 }
 0x374   : > { %8663 = vmatmul.mubr.msk.f32.gmra.mrb[28].mxu1 %vm658_vm1, %v11459_v57 }
 0x375   : > { %v11463_v60 = vld [vmem:[#allocation2 + $0x180] sm:$0xff] }
 0x376   : > { %8665 = vmatprep.mubr.msk.f32.mxu1 %vm658_vm1, %v11463_v60 }
 0x378   : > { %8666 = vmatmul.mubr.msk.f32.gmra.mrb[30].mxu1 %vm658_vm1, %v11467_v18 }
 0x379   : > { %8670 = vmatprep.mubr.msk.f32.mxu1 %vm658_vm1, %v3817_v4  ;;  %v11957_v4 = vld [vmem:[#allocation2 + $0xf2] sm:$0xff] }
 0x37c   : > { %8671 = vmatmul.mubr.msk.f32.vlgmr.msra.gmra.mrb[0].mxu1 %vm658_vm1, %v3818_v3  ;;  %v11961_v3 = vld [vmem:[#allocation2 + $0xfa] sm:$0xff] }
 0x37d   : > { %8673 = vmatprep.mubr.msk.f32.mxu1 %vm658_vm1, %v11181_v52  ;;  %8719 = vmatpush3.msk.msra.mxu1 %vm905_vm0, %v11197_v58  ;;  %v7322_v52 = vld [vmem:[%s12463_s7 + $0x4] sm:$0xf] }
 0x37e   : > { %8768 = vmatprep.subr.msk.mxu1 %vm905_vm0, %v7323_v50  ;;  %v3852_v58 = vld [vmem:[#allocation2 + $0x1a0] sm:$0xff] }
 0x380   : > { %8674 = vmatmul.mubr.msk.f32.gmra.mrb[2].mxu1 %vm658_vm1, %v11191_v26  ;;  %v3851_v26 = vld [vmem:[#allocation2 + $0x198] sm:$0xff] }
 0x381   : > { %8676 = vmatprep.mubr.msk.f32.mxu1 %vm658_vm1, %v11214_v11 }
 0x384   : > { %8677 = vmatmul.mubr.msk.f32.gmra.mrb[4].mxu1 %vm658_vm1, %v11225_v56 }
 0x385   : > { %8679 = vmatprep.mubr.msk.f32.mxu1 %vm658_vm1, %v11240_v44 }
 0x388   : > { %8680 = vmatmul.mubr.msk.f32.gmra.mrb[6].mxu1 %vm658_vm1, %v11249_v37 }
 0x389   : > { %8682 = vmatprep.mubr.msk.f32.mxu1 %vm658_vm1, %v11263_v19 }
 0x38c   : > { %8683 = vmatmul.mubr.msk.f32.gmra.mrb[8].mxu1 %vm658_vm1, %v11273_v51 }
 0x38d   : > { %8685 = vmatprep.mubr.msk.f32.mxu1 %vm658_vm1, %v11289_v31 }
 0x390   : > { %8686 = vmatmul.mubr.msk.f32.gmra.mrb[10].mxu1 %vm658_vm1, %v11298_v38 }
 0x391   : > { %8688 = vmatprep.mubr.msk.f32.mxu1 %vm658_vm1, %v11315_v49 }
 0x394   : > { %8689 = vmatmul.mubr.msk.f32.gmra.mrb[12].mxu1 %vm658_vm1, %v11324_v55 }
 0x395   : > { %8691 = vmatprep.mubr.msk.f32.mxu1 %vm658_vm1, %v11345_v22 }
 0x398   : > { %8692 = vmatmul.mubr.msk.f32.gmra.mrb[14].mxu1 %vm658_vm1, %v11354_v1 }
 0x399   : > { %8694 = vmatprep.mubr.msk.f32.mxu1 %vm658_vm1, %v11364_v63 }
 0x39c   : > { %8695 = vmatmul.mubr.msk.f32.gmra.mrb[16].mxu1 %vm658_vm1, %v11370_v20 }
 0x39d   : > { %8697 = vmatprep.mubr.msk.f32.mxu1 %vm658_vm1, %v11377_v59 }
 0x3a0   : > { %8698 = vmatmul.mubr.msk.f32.gmra.mrb[18].mxu1 %vm658_vm1, %v11383_v42 }
 0x3a1   : > { %8700 = vmatprep.mubr.msk.f32.mxu1 %vm658_vm1, %v11391_v16 }
 0x3a4   : > { %8701 = vmatmul.mubr.msk.f32.gmra.mrb[20].mxu1 %vm658_vm1, %v11396_v23 }
 0x3a5   : > { %8703 = vmatprep.mubr.msk.f32.mxu1 %vm658_vm1, %v11405_v61 }
 0x3a8   : > { %8704 = vmatmul.mubr.msk.f32.gmra.mrb[22].mxu1 %vm658_vm1, %v11410_v21 }
 0x3a9   : > { %8706 = vmatprep.mubr.msk.f32.mxu1 %vm658_vm1, %v11419_v14 }
 0x3ac   : > { %8707 = vmatmul.mubr.msk.f32.gmra.mrb[24].mxu1 %vm658_vm1, %v11425_v40 }
 0x3ad   : > { %8709 = vmatprep.mubr.msk.f32.mxu1 %vm658_vm1, %v11433_v24 }
 0x3b0   : > { %8710 = vmatmul.mubr.msk.f32.gmra.mrb[26].mxu1 %vm658_vm1, %v11438_v43 }
 0x3b1   : > { %8712 = vmatprep.mubr.msk.f32.mxu1 %vm658_vm1, %v11443_v2 }
 0x3b4   : > { %8713 = vmatmul.mubr.msk.f32.gmra.mrb[28].mxu1 %vm658_vm1, %v11447_v27 }
 0x3b5   : > { %8715 = vmatprep.mubr.msk.f32.mxu1 %vm658_vm1, %v11454_v62 }
 0x3b8   : > { %8716 = vmatmul.mubr.msk.f32.gmra.mrb[30].mxu1 %vm658_vm1, %v11459_v57 }
 0x3b9   : > { %8720 = vmatprep.mubr.msk.f32.mxu1 %vm658_vm1, %v11214_v11  ;;  %v11606_v11 = vld [vmem:[#allocation2 + $0x19] sm:$0xff] }
 0x3bc   : > { %8721 = vmatmul.mubr.msk.f32.vlgmr.msra.gmra.mrb[0].mxu1 %vm658_vm1, %v11225_v56  ;;  %v11610_v56 = vld [vmem:[#allocation2 + $0x21] sm:$0xff] }
 0x3bd   : > { %8723 = vmatprep.mubr.msk.f32.mxu1 %vm658_vm1, %v11240_v44  ;;  %8769 = vmatpush3.msk.msra.mxu1 %vm905_vm0, %v7323_v50  ;;  %v11615_v44 = vld [vmem:[%s12463_s7 + $0x1c] sm:$0xf]  ;;  %v11965_v50 = vld [vmem:[#allocation2 + $0x10a] sm:$0xff] }
 0x3be   : > { %8818 = vmatprep.subr.msk.mxu1 %vm905_vm0, %v7322_v52 }
 0x3c0   : > { %8724 = vmatmul.mubr.msk.f32.gmra.mrb[2].mxu1 %vm658_vm1, %v11249_v37  ;;  %v11619_v37 = vld [vmem:[#allocation2 + $0x31] sm:$0xff] }
 0x3c1   : > { %8726 = vmatprep.mubr.msk.f32.mxu1 %vm658_vm1, %v11263_v19  ;;  %v11626_v19 = vld [vmem:[#allocation2 + $0x39] sm:$0xff] }
 0x3c4   : > { %8727 = vmatmul.mubr.msk.f32.gmra.mrb[4].mxu1 %vm658_vm1, %v11273_v51  ;;  %v11630_v51 = vld [vmem:[#allocation2 + $0x49] sm:$0xff] }
 0x3c5   : > { %8729 = vmatprep.mubr.msk.f32.mxu1 %vm658_vm1, %v11289_v31  ;;  %v11634_v31 = vld [vmem:[#allocation2 + $0x51] sm:$0xff] }
 0x3c8   : > { %8730 = vmatmul.mubr.msk.f32.gmra.mrb[6].mxu1 %vm658_vm1, %v11298_v38  ;;  %v11638_v38 = vld [vmem:[#allocation2 + $0x61] sm:$0xff] }
 0x3c9   : > { %8732 = vmatprep.mubr.msk.f32.mxu1 %vm658_vm1, %v11315_v49  ;;  %v11642_v49 = vld [vmem:[#allocation2 + $0x69] sm:$0xff] }
 0x3cc   : > { %8733 = vmatmul.mubr.msk.f32.gmra.mrb[8].mxu1 %vm658_vm1, %v11324_v55  ;;  %v11646_v55 = vld [vmem:[#allocation2 + $0x79] sm:$0xff] }
 0x3cd   : > { %8735 = vmatprep.mubr.msk.f32.mxu1 %vm658_vm1, %v11345_v22  ;;  %v11650_v22 = vld [vmem:[#allocation2 + $0x81] sm:$0xff] }
 0x3d0   : > { %8736 = vmatmul.mubr.msk.f32.gmra.mrb[10].mxu1 %vm658_vm1, %v11354_v1  ;;  %v11654_v1 = vld [vmem:[#allocation2 + $0x91] sm:$0xff] }
 0x3d1   : > { %8738 = vmatprep.mubr.msk.f32.mxu1 %vm658_vm1, %v11364_v63  ;;  %v11658_v63 = vld [vmem:[#allocation2 + $0x99] sm:$0xff] }
 0x3d4   : > { %8739 = vmatmul.mubr.msk.f32.gmra.mrb[12].mxu1 %vm658_vm1, %v11370_v20  ;;  %v11662_v20 = vld [vmem:[#allocation2 + $0xa9] sm:$0xff] }
 0x3d5   : > { %8741 = vmatprep.mubr.msk.f32.mxu1 %vm658_vm1, %v11377_v59  ;;  %v11666_v59 = vld [vmem:[#allocation2 + $0xb1] sm:$0xff] }
 0x3d8   : > { %8742 = vmatmul.mubr.msk.f32.gmra.mrb[14].mxu1 %vm658_vm1, %v11383_v42  ;;  %v11670_v42 = vld [vmem:[#allocation2 + $0xc1] sm:$0xff] }
 0x3d9   : > { %8744 = vmatprep.mubr.msk.f32.mxu1 %vm658_vm1, %v11391_v16  ;;  %v11690_v16 = vld [vmem:[#allocation2 + $0xf9] sm:$0xff] }
 0x3dc   : > { %8745 = vmatmul.mubr.msk.f32.gmra.mrb[16].mxu1 %vm658_vm1, %v11396_v23  ;;  %v11702_v23 = vld [vmem:[#allocation2 + $0x121] sm:$0xff] }
 0x3dd   : > { %8747 = vmatprep.mubr.msk.f32.mxu1 %vm658_vm1, %v11405_v61  ;;  %v11738_v61 = vld [vmem:[#allocation2 + $0x189] sm:$0xff] }
 0x3e0   : > { %8748 = vmatmul.mubr.msk.f32.gmra.mrb[18].mxu1 %vm658_vm1, %v11410_v21  ;;  %v7425_v21 = vld [vmem:[%s12463_s7 + $0x14] sm:$0xf] }
 0x3e1   : > { %8750 = vmatprep.mubr.msk.f32.mxu1 %vm658_vm1, %v11419_v14  ;;  %v11881_v14 = vld [vmem:[#allocation2 + $0x22] sm:$0xff] }
 0x3e4   : > { %8751 = vmatmul.mubr.msk.f32.gmra.mrb[20].mxu1 %vm658_vm1, %v11425_v40  ;;  %v11890_v40 = vld [vmem:[#allocation2 + $0x32] sm:$0xff] }
 0x3e5   : > { %8753 = vmatprep.mubr.msk.f32.mxu1 %vm658_vm1, %v11433_v24  ;;  %v11905_v24 = vld [vmem:[#allocation2 + $0x52] sm:$0xff] }
 0x3e8   : > { %8754 = vmatmul.mubr.msk.f32.gmra.mrb[22].mxu1 %vm658_vm1, %v11438_v43  ;;  %v11913_v43 = vld [vmem:[#allocation2 + $0x6a] sm:$0xff] }
 0x3e9   : > { %8756 = vmatprep.mubr.msk.f32.mxu1 %vm658_vm1, %v11443_v2  ;;  %v11917_v2 = vld [vmem:[#allocation2 + $0x7a] sm:$0xff] }
 0x3ec   : > { %8757 = vmatmul.mubr.msk.f32.gmra.mrb[24].mxu1 %vm658_vm1, %v11447_v27  ;;  %v11925_v27 = vld [vmem:[#allocation2 + $0x92] sm:$0xff] }
 0x3ed   : > { %8759 = vmatprep.mubr.msk.f32.mxu1 %vm658_vm1, %v11454_v62  ;;  %v11941_v62 = vld [vmem:[#allocation2 + $0xc2] sm:$0xff] }
 0x3f0   : > { %8760 = vmatmul.mubr.msk.f32.gmra.mrb[26].mxu1 %vm658_vm1, %v11459_v57  ;;  %v11945_v57 = vld [vmem:[#allocation2 + $0xca] sm:$0xff] }
 0x3f1   : > { %8762 = vmatprep.mubr.msk.f32.mxu1 %vm658_vm1, %v11463_v60  ;;  %v11949_v60 = vld [vmem:[#allocation2 + $0xda] sm:$0xff] }
 0x3f4   : > { %8763 = vmatmul.mubr.msk.f32.gmra.mrb[28].mxu1 %vm658_vm1, %v11467_v18  ;;  %v11953_v18 = vld [vmem:[#allocation2 + $0xe2] sm:$0xff] }
 0x3f5   : > { %8765 = vmatprep.mubr.msk.f32.mxu1 %vm658_vm1, %v3851_v26  ;;  %v11973_v26 = vld [vmem:[#allocation2 + $0x122] sm:$0xff] }
 0x3f8   : > { %8766 = vmatmul.mubr.msk.f32.gmra.mrb[30].mxu1 %vm658_vm1, %v3852_v58  ;;  %v11977_v58 = vld [vmem:[#allocation2 + $0x12a] sm:$0xff] }
 0x3f9   : > { %8770 = vmatprep.mubr.msk.f32.mxu1 %vm658_vm1, %v11606_v11 }
 0x3fc   : > { %8771 = vmatmul.mubr.msk.f32.vlgmr.msra.gmra.mrb[0].mxu1 %vm658_vm1, %v11610_v56 }
 0x3fd   : > { %8773 = vmatprep.mubr.msk.f32.mxu1 %vm658_vm1, %v11619_v37  ;;  %8819 = vmatpush3.msk.msra.mxu1 %vm905_vm0, %v7322_v52  ;;  %v11969_v52 = vld [vmem:[#allocation2 + $0x112] sm:$0xff] }
 0x3fe   : > { %8868 = vmatprep.subr.msk.mxu1 %vm905_vm0, %v11615_v44 }
 0x400   : > { %8774 = vmatmul.mubr.msk.f32.gmra.mrb[2].mxu1 %vm658_vm1, %v11626_v19 }
 0x401   : > { %8776 = vmatprep.mubr.msk.f32.mxu1 %vm658_vm1, %v11630_v51 }
 0x404   : > { %8777 = vmatmul.mubr.msk.f32.gmra.mrb[4].mxu1 %vm658_vm1, %v11634_v31 }
 0x405   : > { %8779 = vmatprep.mubr.msk.f32.mxu1 %vm658_vm1, %v11638_v38 }
 0x408   : > { %8780 = vmatmul.mubr.msk.f32.gmra.mrb[6].mxu1 %vm658_vm1, %v11642_v49 }
 0x409   : > { %8782 = vmatprep.mubr.msk.f32.mxu1 %vm658_vm1, %v11646_v55 }
 0x40c   : > { %8783 = vmatmul.mubr.msk.f32.gmra.mrb[8].mxu1 %vm658_vm1, %v11650_v22 }
 0x40d   : > { %8785 = vmatprep.mubr.msk.f32.mxu1 %vm658_vm1, %v11654_v1 }
 0x410   : > { %8786 = vmatmul.mubr.msk.f32.gmra.mrb[10].mxu1 %vm658_vm1, %v11658_v63 }
 0x411   : > { %8788 = vmatprep.mubr.msk.f32.mxu1 %vm658_vm1, %v11662_v20 }
 0x414   : > { %8789 = vmatmul.mubr.msk.f32.gmra.mrb[12].mxu1 %vm658_vm1, %v11666_v59 }
 0x415   : > { %8791 = vmatprep.mubr.msk.f32.mxu1 %vm658_vm1, %v11670_v42 }
 0x418   : > { %8792 = vmatmul.mubr.msk.f32.gmra.mrb[14].mxu1 %vm658_vm1, %v11674_v28 }
 0x419   : > { %8794 = vmatprep.mubr.msk.f32.mxu1 %vm658_vm1, %v11678_v6 }
 0x41c   : > { %8795 = vmatmul.mubr.msk.f32.gmra.mrb[16].mxu1 %vm658_vm1, %v11682_v7 }
 0x41d   : > { %8797 = vmatprep.mubr.msk.f32.mxu1 %vm658_vm1, %v11686_v8 }
 0x420   : > { %8798 = vmatmul.mubr.msk.f32.gmra.mrb[18].mxu1 %vm658_vm1, %v11690_v16 }
 0x421   : > { %8800 = vmatprep.mubr.msk.f32.mxu1 %vm658_vm1, %v11694_v15 }
 0x424   : > { %8801 = vmatmul.mubr.msk.f32.gmra.mrb[20].mxu1 %vm658_vm1, %v11698_v5 }
 0x425   : > { %8803 = vmatprep.mubr.msk.f32.mxu1 %vm658_vm1, %v11702_v23 }
 0x428   : > { %8804 = vmatmul.mubr.msk.f32.gmra.mrb[22].mxu1 %vm658_vm1, %v11706_v25 }
 0x429   : > { %8806 = vmatprep.mubr.msk.f32.mxu1 %vm658_vm1, %v11710_v35 }
 0x42c   : > { %8807 = vmatmul.mubr.msk.f32.gmra.mrb[24].mxu1 %vm658_vm1, %v11714_v12 }
 0x42d   : > { %8809 = vmatprep.mubr.msk.f32.mxu1 %vm658_vm1, %v11718_v39 }
 0x430   : > { %8810 = vmatmul.mubr.msk.f32.gmra.mrb[26].mxu1 %vm658_vm1, %v11722_v54 }
 0x431   : > { %8812 = vmatprep.mubr.msk.f32.mxu1 %vm658_vm1, %v11726_v10 }
 0x434   : > { %8813 = vmatmul.mubr.msk.f32.gmra.mrb[28].mxu1 %vm658_vm1, %v11730_v29 }
 0x435   : > { %8815 = vmatprep.mubr.msk.f32.mxu1 %vm658_vm1, %v11734_v32 }
 0x438   : > { %8816 = vmatmul.mubr.msk.f32.gmra.mrb[30].mxu1 %vm658_vm1, %v11738_v61 }
 0x439   : > { %8820 = vmatprep.mubr.msk.f32.mxu1 %vm658_vm1, %v4682_v48 }
 0x43c   : > { %8821 = vmatmul.mubr.msk.f32.vlgmr.msra.gmra.mrb[0].mxu1 %vm658_vm1, %v4683_v13 }
 0x43d   : > { %8823 = vmatprep.mubr.msk.f32.mxu1 %vm658_vm1, %v11606_v11  ;;  %8869 = vmatpush3.msk.msra.mxu1 %vm905_vm0, %v11615_v44  ;;  %v11981_v11 = vld [vmem:[#allocation2 + $0x13a] sm:$0xff]  ;;  %v11989_v44 = vld [vmem:[#allocation2 + $0x152] sm:$0xff] }
 0x43e   : > { %8918 = vmatprep.subr.msk.mxu1 %vm905_vm0, %v7425_v21 }
 0x440   : > { %8824 = vmatmul.mubr.msk.f32.gmra.mrb[2].mxu1 %vm658_vm1, %v11610_v56  ;;  %v11985_v56 = vld [vmem:[#allocation2 + $0x142] sm:$0xff] }
 0x441   : > { %8826 = vmatprep.mubr.msk.f32.mxu1 %vm658_vm1, %v11619_v37 }
 0x444   : > { %8827 = vmatmul.mubr.msk.f32.gmra.mrb[4].mxu1 %vm658_vm1, %v11626_v19 }
 0x445   : > { %8829 = vmatprep.mubr.msk.f32.mxu1 %vm658_vm1, %v11630_v51 }
 0x448   : > { %8830 = vmatmul.mubr.msk.f32.gmra.mrb[6].mxu1 %vm658_vm1, %v11634_v31 }
 0x449   : > { %8832 = vmatprep.mubr.msk.f32.mxu1 %vm658_vm1, %v11638_v38 }
 0x44c   : > { %8833 = vmatmul.mubr.msk.f32.gmra.mrb[8].mxu1 %vm658_vm1, %v11642_v49 }
 0x44d   : > { %8835 = vmatprep.mubr.msk.f32.mxu1 %vm658_vm1, %v11646_v55 }
 0x450   : > { %8836 = vmatmul.mubr.msk.f32.gmra.mrb[10].mxu1 %vm658_vm1, %v11650_v22 }
 0x451   : > { %8838 = vmatprep.mubr.msk.f32.mxu1 %vm658_vm1, %v11654_v1 }
 0x454   : > { %8839 = vmatmul.mubr.msk.f32.gmra.mrb[12].mxu1 %vm658_vm1, %v11658_v63 }
 0x455   : > { %8841 = vmatprep.mubr.msk.f32.mxu1 %vm658_vm1, %v11662_v20 }
 0x458   : > { %8842 = vmatmul.mubr.msk.f32.gmra.mrb[14].mxu1 %vm658_vm1, %v11666_v59 }
 0x459   : > { %8844 = vmatprep.mubr.msk.f32.mxu1 %vm658_vm1, %v11670_v42 }
 0x45c   : > { %8845 = vmatmul.mubr.msk.f32.gmra.mrb[16].mxu1 %vm658_vm1, %v11674_v28 }
 0x45d   : > { %8847 = vmatprep.mubr.msk.f32.mxu1 %vm658_vm1, %v11678_v6 }
 0x460   : > { %8848 = vmatmul.mubr.msk.f32.gmra.mrb[18].mxu1 %vm658_vm1, %v11682_v7 }
 0x461   : > { %8850 = vmatprep.mubr.msk.f32.mxu1 %vm658_vm1, %v11686_v8 }
 0x464   : > { %8851 = vmatmul.mubr.msk.f32.gmra.mrb[20].mxu1 %vm658_vm1, %v11690_v16 }
 0x465   : > { %8853 = vmatprep.mubr.msk.f32.mxu1 %vm658_vm1, %v11694_v15 }
 0x468   : > { %8854 = vmatmul.mubr.msk.f32.gmra.mrb[22].mxu1 %vm658_vm1, %v11698_v5 }
 0x469   : > { %8856 = vmatprep.mubr.msk.f32.mxu1 %vm658_vm1, %v11702_v23 }
 0x46c   : > { %8857 = vmatmul.mubr.msk.f32.gmra.mrb[24].mxu1 %vm658_vm1, %v11706_v25 }
 0x46d   : > { %8859 = vmatprep.mubr.msk.f32.mxu1 %vm658_vm1, %v11710_v35 }
 0x470   : > { %8860 = vmatmul.mubr.msk.f32.gmra.mrb[26].mxu1 %vm658_vm1, %v11714_v12 }
 0x471   : > { %8862 = vmatprep.mubr.msk.f32.mxu1 %vm658_vm1, %v11718_v39 }
 0x474   : > { %8863 = vmatmul.mubr.msk.f32.gmra.mrb[28].mxu1 %vm658_vm1, %v11722_v54 }
 0x475   : > { %8865 = vmatprep.mubr.msk.f32.mxu1 %vm658_vm1, %v11726_v10 }
 0x478   : > { %8866 = vmatmul.mubr.msk.f32.gmra.mrb[30].mxu1 %vm658_vm1, %v11730_v29 }
 0x479   : > { %8870 = vmatprep.mubr.msk.f32.mxu1 %vm658_vm1, %v11619_v37  ;;  %v11993_v37 = vld [vmem:[#allocation2 + $0x15a] sm:$0xff] }
 0x47c   : > { %8871 = vmatmul.mubr.msk.f32.vlgmr.msra.gmra.mrb[0].mxu1 %vm658_vm1, %v11626_v19  ;;  %v11997_v19 = vld [vmem:[#allocation2 + $0x16a] sm:$0xff] }
 0x47d   : > { %8873 = vmatprep.mubr.msk.f32.mxu1 %vm658_vm1, %v11630_v51  ;;  %8919 = vmatpush3.msk.msra.mxu1 %vm905_vm0, %v7425_v21  ;;  %v12001_v51 = vld [vmem:[#allocation2 + $0x172] sm:$0xff] }
 0x47e   : > { %8968 = vmatprep.subr.msk.mxu1 %vm905_vm0, %v7424_v41 }
 0x480   : > { %8874 = vmatmul.mubr.msk.f32.gmra.mrb[2].mxu1 %vm658_vm1, %v11634_v31  ;;  %v12005_v31 = vld [vmem:[#allocation2 + $0x182] sm:$0xff] }
 0x481   : > { %8876 = vmatprep.mubr.msk.f32.mxu1 %vm658_vm1, %v11638_v38  ;;  %v12009_v38 = vld [vmem:[#allocation2 + $0x18a] sm:$0xff] }
 0x484   : > { %8877 = vmatmul.mubr.msk.f32.gmra.mrb[4].mxu1 %vm658_vm1, %v11642_v49  ;;  %v5548_v49 = vld [vmem:[#allocation2 + $0x2] sm:$0xff] }
 0x485   : > { %8879 = vmatprep.mubr.msk.f32.mxu1 %vm658_vm1, %v11646_v55  ;;  %v5549_v55 = vld [vmem:[#allocation2 + $0xa] sm:$0xff] }
 0x488   : > { %8880 = vmatmul.mubr.msk.f32.gmra.mrb[6].mxu1 %vm658_vm1, %v11650_v22  ;;  %v5582_v22 = vld [vmem:[#allocation2 + $0x19a] sm:$0xff] }
 0x489   : > { %8882 = vmatprep.mubr.msk.f32.mxu1 %vm658_vm1, %v11654_v1  ;;  %v5583_v1 = vld [vmem:[#allocation2 + $0x1a2] sm:$0xff] }
 0x48c   : > { %8883 = vmatmul.mubr.msk.f32.gmra.mrb[8].mxu1 %vm658_vm1, %v11658_v63  ;;  %v9803_v63 = vmov 1.0  }
 0x48d   : > { %8885 = vmatprep.mubr.msk.f32.mxu1 %vm658_vm1, %v11662_v20  ;;  %6580 = vmatprep.mubr.f32.mxu0 %v9803_v63  ;;  %v6586_v20 = vld [vmem:[%s12465_s9] sm:$0xf] }
 0x490   : > { %8886 = vmatmul.mubr.msk.f32.gmra.mrb[10].mxu1 %vm658_vm1, %v11666_v59  ;;  %v9804_v59 = vmov 0.0  }
 0x491   : > { %8888 = vmatprep.mubr.msk.f32.mxu1 %vm658_vm1, %v11670_v42 }
 0x494   : > { %8889 = vmatmul.mubr.msk.f32.gmra.mrb[12].mxu1 %vm658_vm1, %v11674_v28 }
 0x495   : > { %8891 = vmatprep.mubr.msk.f32.mxu1 %vm658_vm1, %v11678_v6 }
 0x498   : > { %8892 = vmatmul.mubr.msk.f32.gmra.mrb[14].mxu1 %vm658_vm1, %v11682_v7 }
 0x499   : > { %8894 = vmatprep.mubr.msk.f32.mxu1 %vm658_vm1, %v11686_v8 }
 0x49c   : > { %8895 = vmatmul.mubr.msk.f32.gmra.mrb[16].mxu1 %vm658_vm1, %v11690_v16 }
 0x49d   : > { %8897 = vmatprep.mubr.msk.f32.mxu1 %vm658_vm1, %v11694_v15 }
 0x4a0   : > { %8898 = vmatmul.mubr.msk.f32.gmra.mrb[18].mxu1 %vm658_vm1, %v11698_v5 }
 0x4a1   : > { %8900 = vmatprep.mubr.msk.f32.mxu1 %vm658_vm1, %v11702_v23 }
 0x4a4   : > { %8901 = vmatmul.mubr.msk.f32.gmra.mrb[20].mxu1 %vm658_vm1, %v11706_v25 }
 0x4a5   : > { %8903 = vmatprep.mubr.msk.f32.mxu1 %vm658_vm1, %v11710_v35 }
 0x4a8   : > { %8904 = vmatmul.mubr.msk.f32.gmra.mrb[22].mxu1 %vm658_vm1, %v11714_v12 }
 0x4a9   : > { %8906 = vmatprep.mubr.msk.f32.mxu1 %vm658_vm1, %v11718_v39 }
 0x4ac   : > { %8907 = vmatmul.mubr.msk.f32.gmra.mrb[24].mxu1 %vm658_vm1, %v11722_v54 }
 0x4ad   : > { %8909 = vmatprep.mubr.msk.f32.mxu1 %vm658_vm1, %v11726_v10 }
 0x4b0   : > { %8910 = vmatmul.mubr.msk.f32.gmra.mrb[26].mxu1 %vm658_vm1, %v11730_v29 }
 0x4b1   : > { %8912 = vmatprep.mubr.msk.f32.mxu1 %vm658_vm1, %v11734_v32  ;;  %v12156_v32 = vld [vmem:[%s12464_s8] ss:$0 sm:$0xff] }
 0x4b4   : > { %8913 = vmatmul.mubr.msk.f32.gmra.mrb[28].mxu1 %vm658_vm1, %v11738_v61 }
 0x4b5   : > { %8915 = vmatprep.mubr.msk.f32.mxu1 %vm658_vm1, %v4716_v46 }
 0x4b8   : > { %8916 = vmatmul.mubr.msk.f32.gmra.mrb[30].mxu1 %vm658_vm1, %v4717_v45 }
 0x4b9   : > { %8920 = vmatprep.mubr.msk.f32.mxu1 %vm658_vm1, %v11877_v0 }
 0x4bc   : > { %8921 = vmatmul.mubr.msk.f32.vlgmr.msra.gmra.mrb[0].mxu1 %vm658_vm1, %v11881_v14 }
 0x4bd   : > { %8923 = vmatprep.mubr.msk.f32.mxu1 %vm658_vm1, %v11890_v40  ;;  %8969 = vmatpush3.msk.msra.mxu1 %vm905_vm0, %v7424_v41 }
 0x4be   : > { %9018 = vmatprep.subr.msk.mxu1 %vm905_vm0, %v11886_v17 }
 0x4c0   : > { %8924 = vmatmul.mubr.msk.f32.gmra.mrb[2].mxu1 %vm658_vm1, %v11897_v47 }
 0x4c1   : > { %8926 = vmatprep.mubr.msk.f32.mxu1 %vm658_vm1, %v11901_v30 }
 0x4c4   : > { %8927 = vmatmul.mubr.msk.f32.gmra.mrb[4].mxu1 %vm658_vm1, %v11905_v24 }
 0x4c5   : > { %8929 = vmatprep.mubr.msk.f32.mxu1 %vm658_vm1, %v11909_v33 }
 0x4c8   : > { %8930 = vmatmul.mubr.msk.f32.gmra.mrb[6].mxu1 %vm658_vm1, %v11913_v43 }
 0x4c9   : > { %8932 = vmatprep.mubr.msk.f32.mxu1 %vm658_vm1, %v11917_v2 }
 0x4cc   : > { %8933 = vmatmul.mubr.msk.f32.gmra.mrb[8].mxu1 %vm658_vm1, %v11921_v9 }
 0x4cd   : > { %8935 = vmatprep.mubr.msk.f32.mxu1 %vm658_vm1, %v11925_v27 }
 0x4d0   : > { %8936 = vmatmul.mubr.msk.f32.gmra.mrb[10].mxu1 %vm658_vm1, %v11929_v36 }
 0x4d1   : > { %8938 = vmatprep.mubr.msk.f32.mxu1 %vm658_vm1, %v11933_v34 }
 0x4d4   : > { %8939 = vmatmul.mubr.msk.f32.gmra.mrb[12].mxu1 %vm658_vm1, %v11937_v53 }
 0x4d5   : > { %8941 = vmatprep.mubr.msk.f32.mxu1 %vm658_vm1, %v11941_v62 }
 0x4d8   : > { %8942 = vmatmul.mubr.msk.f32.gmra.mrb[14].mxu1 %vm658_vm1, %v11945_v57 }
 0x4d9   : > { %8944 = vmatprep.mubr.msk.f32.mxu1 %vm658_vm1, %v11949_v60 }
 0x4dc   : > { %8945 = vmatmul.mubr.msk.f32.gmra.mrb[16].mxu1 %vm658_vm1, %v11953_v18 }
 0x4dd   : > { %8947 = vmatprep.mubr.msk.f32.mxu1 %vm658_vm1, %v11957_v4 }
 0x4e0   : > { %8948 = vmatmul.mubr.msk.f32.gmra.mrb[18].mxu1 %vm658_vm1, %v11961_v3 }
 0x4e1   : > { %8950 = vmatprep.mubr.msk.f32.mxu1 %vm658_vm1, %v11965_v50 }
 0x4e4   : > { %8951 = vmatmul.mubr.msk.f32.gmra.mrb[20].mxu1 %vm658_vm1, %v11969_v52 }
 0x4e5   : > { %8953 = vmatprep.mubr.msk.f32.mxu1 %vm658_vm1, %v11973_v26 }
 0x4e8   : > { %8954 = vmatmul.mubr.msk.f32.gmra.mrb[22].mxu1 %vm658_vm1, %v11977_v58 }
 0x4e9   : > { %8956 = vmatprep.mubr.msk.f32.mxu1 %vm658_vm1, %v11981_v11 }
 0x4ec   : > { %8957 = vmatmul.mubr.msk.f32.gmra.mrb[24].mxu1 %vm658_vm1, %v11985_v56 }
 0x4ed   : > { %8959 = vmatprep.mubr.msk.f32.mxu1 %vm658_vm1, %v11989_v44 }
 0x4f0   : > { %8960 = vmatmul.mubr.msk.f32.gmra.mrb[26].mxu1 %vm658_vm1, %v11993_v37 }
 0x4f1   : > { %8962 = vmatprep.mubr.msk.f32.mxu1 %vm658_vm1, %v11997_v19 }
 0x4f4   : > { %8963 = vmatmul.mubr.msk.f32.gmra.mrb[28].mxu1 %vm658_vm1, %v12001_v51 }
 0x4f5   : > { %8965 = vmatprep.mubr.msk.f32.mxu1 %vm658_vm1, %v12005_v31 }
 0x4f8   : > { %8966 = vmatmul.mubr.msk.f32.gmra.mrb[30].mxu1 %vm658_vm1, %v12009_v38 }
 0x4f9   : > { %8970 = vmatprep.mubr.msk.f32.mxu1 %vm658_vm1, %v5548_v49 }
 0x4fc   : > { %8971 = vmatmul.mubr.msk.f32.vlgmr.msra.gmra.mrb[0].mxu1 %vm658_vm1, %v5549_v55 }
 0x4fd   : > { %8973 = vmatprep.mubr.msk.f32.mxu1 %vm658_vm1, %v11877_v0  ;;  %9019 = vmatpush3.msk.msra.mxu1 %vm905_vm0, %v11886_v17 }
 0x4fe   : > { %9068 = vmatprep.subr.mxu1 %v9804_v59 }
 0x500   : > { %8974 = vmatmul.mubr.msk.f32.gmra.mrb[2].mxu1 %vm658_vm1, %v11881_v14 }
 0x501   : > { %8976 = vmatprep.mubr.msk.f32.mxu1 %vm658_vm1, %v11890_v40 }
 0x504   : > { %8977 = vmatmul.mubr.msk.f32.gmra.mrb[4].mxu1 %vm658_vm1, %v11897_v47 }
 0x505   : > { %8979 = vmatprep.mubr.msk.f32.mxu1 %vm658_vm1, %v11901_v30 }
 0x508   : > { %8980 = vmatmul.mubr.msk.f32.gmra.mrb[6].mxu1 %vm658_vm1, %v11905_v24 }
 0x509   : > { %8982 = vmatprep.mubr.msk.f32.mxu1 %vm658_vm1, %v11909_v33 }
 0x50c   : > { %8983 = vmatmul.mubr.msk.f32.gmra.mrb[8].mxu1 %vm658_vm1, %v11913_v43 }
 0x50d   : > { %8985 = vmatprep.mubr.msk.f32.mxu1 %vm658_vm1, %v11917_v2 }
 0x510   : > { %8986 = vmatmul.mubr.msk.f32.gmra.mrb[10].mxu1 %vm658_vm1, %v11921_v9 }
 0x511   : > { %8988 = vmatprep.mubr.msk.f32.mxu1 %vm658_vm1, %v11925_v27 }
 0x514   : > { %8989 = vmatmul.mubr.msk.f32.gmra.mrb[12].mxu1 %vm658_vm1, %v11929_v36 }
 0x515   : > { %8991 = vmatprep.mubr.msk.f32.mxu1 %vm658_vm1, %v11933_v34 }
 0x518   : > { %8992 = vmatmul.mubr.msk.f32.gmra.mrb[14].mxu1 %vm658_vm1, %v11937_v53 }
 0x519   : > { %8994 = vmatprep.mubr.msk.f32.mxu1 %vm658_vm1, %v11941_v62 }
 0x51c   : > { %8995 = vmatmul.mubr.msk.f32.gmra.mrb[16].mxu1 %vm658_vm1, %v11945_v57 }
 0x51d   : > { %8997 = vmatprep.mubr.msk.f32.mxu1 %vm658_vm1, %v11949_v60 }
 0x520   : > { %8998 = vmatmul.mubr.msk.f32.gmra.mrb[18].mxu1 %vm658_vm1, %v11953_v18 }
 0x521   : > { %9000 = vmatprep.mubr.msk.f32.mxu1 %vm658_vm1, %v11957_v4 }
 0x524   : > { %9001 = vmatmul.mubr.msk.f32.gmra.mrb[20].mxu1 %vm658_vm1, %v11961_v3 }
 0x525   : > { %9003 = vmatprep.mubr.msk.f32.mxu1 %vm658_vm1, %v11965_v50 }
 0x528   : > { %9004 = vmatmul.mubr.msk.f32.gmra.mrb[22].mxu1 %vm658_vm1, %v11969_v52 }
 0x529   : > { %9006 = vmatprep.mubr.msk.f32.mxu1 %vm658_vm1, %v11973_v26 }
 0x52c   : > { %9007 = vmatmul.mubr.msk.f32.gmra.mrb[24].mxu1 %vm658_vm1, %v11977_v58 }
 0x52d   : > { %9009 = vmatprep.mubr.msk.f32.mxu1 %vm658_vm1, %v11981_v11 }
 0x530   : > { %9010 = vmatmul.mubr.msk.f32.gmra.mrb[26].mxu1 %vm658_vm1, %v11985_v56 }
 0x531   : > { %9012 = vmatprep.mubr.msk.f32.mxu1 %vm658_vm1, %v11989_v44 }
 0x534   : > { %9013 = vmatmul.mubr.msk.f32.gmra.mrb[28].mxu1 %vm658_vm1, %v11993_v37 }
 0x535   : > { %9015 = vmatprep.mubr.msk.f32.mxu1 %vm658_vm1, %v11997_v19 }
 0x538   : > { %9016 = vmatmul.mubr.msk.f32.gmra.mrb[30].mxu1 %vm658_vm1, %v12001_v51 }
 0x539   : > { %9020 = vmatprep.mubr.msk.f32.mxu1 %vm658_vm1, %v11890_v40 }
 0x53c   : > { %9021 = vmatmul.mubr.msk.f32.vlgmr.msra.gmra.mrb[0].mxu1 %vm658_vm1, %v11897_v47 }
 0x53d   : > { %9023 = vmatprep.mubr.msk.f32.mxu1 %vm658_vm1, %v11901_v30  ;;  %9069 = vmatpush3.msk.msra.mxu1 %vm905_vm0, %v6586_v20 }
 0x540   : > { %9024 = vmatmul.mubr.msk.f32.gmra.mrb[2].mxu1 %vm658_vm1, %v11905_v24 }
 0x541   : > { %9026 = vmatprep.mubr.msk.f32.mxu1 %vm658_vm1, %v11909_v33 }
 0x544   : > { %9027 = vmatmul.mubr.msk.f32.gmra.mrb[4].mxu1 %vm658_vm1, %v11913_v43 }
 0x545   : > { %9029 = vmatprep.mubr.msk.f32.mxu1 %vm658_vm1, %v11917_v2 }
 0x548   : > { %9030 = vmatmul.mubr.msk.f32.gmra.mrb[6].mxu1 %vm658_vm1, %v11921_v9 }
 0x549   : > { %9032 = vmatprep.mubr.msk.f32.mxu1 %vm658_vm1, %v11925_v27 }
 0x54c   : > { %9033 = vmatmul.mubr.msk.f32.gmra.mrb[8].mxu1 %vm658_vm1, %v11929_v36 }
 0x54d   : > { %9035 = vmatprep.mubr.msk.f32.mxu1 %vm658_vm1, %v11933_v34 }
 0x550   : > { %9036 = vmatmul.mubr.msk.f32.gmra.mrb[10].mxu1 %vm658_vm1, %v11937_v53 }
 0x551   : > { %9038 = vmatprep.mubr.msk.f32.mxu1 %vm658_vm1, %v11941_v62 }
 0x554   : > { %9039 = vmatmul.mubr.msk.f32.gmra.mrb[12].mxu1 %vm658_vm1, %v11945_v57 }
 0x555   : > { %9041 = vmatprep.mubr.msk.f32.mxu1 %vm658_vm1, %v11949_v60 }
 0x558   : > { %9042 = vmatmul.mubr.msk.f32.gmra.mrb[14].mxu1 %vm658_vm1, %v11953_v18 }
 0x559   : > { %9044 = vmatprep.mubr.msk.f32.mxu1 %vm658_vm1, %v11957_v4 }
 0x55c   : > { %9045 = vmatmul.mubr.msk.f32.gmra.mrb[16].mxu1 %vm658_vm1, %v11961_v3 }
 0x55d   : > { %9047 = vmatprep.mubr.msk.f32.mxu1 %vm658_vm1, %v11965_v50 }
 0x560   : > { %9048 = vmatmul.mubr.msk.f32.gmra.mrb[18].mxu1 %vm658_vm1, %v11969_v52 }
 0x561   : > { %9050 = vmatprep.mubr.msk.f32.mxu1 %vm658_vm1, %v11973_v26 }
 0x564   : > { %9051 = vmatmul.mubr.msk.f32.gmra.mrb[20].mxu1 %vm658_vm1, %v11977_v58 }
 0x565   : > { %9053 = vmatprep.mubr.msk.f32.mxu1 %vm658_vm1, %v11981_v11 }
 0x568   : > { %9054 = vmatmul.mubr.msk.f32.gmra.mrb[22].mxu1 %vm658_vm1, %v11985_v56 }
 0x569   : > { %9056 = vmatprep.mubr.msk.f32.mxu1 %vm658_vm1, %v11989_v44 }
 0x56c   : > { %9057 = vmatmul.mubr.msk.f32.gmra.mrb[24].mxu1 %vm658_vm1, %v11993_v37 }
 0x56d   : > { %9059 = vmatprep.mubr.msk.f32.mxu1 %vm658_vm1, %v11997_v19 }
 0x570   : > { %9060 = vmatmul.mubr.msk.f32.gmra.mrb[26].mxu1 %vm658_vm1, %v12001_v51 }
 0x571   : > { %9062 = vmatprep.mubr.msk.f32.mxu1 %vm658_vm1, %v12005_v31 }
 0x574   : > { %9063 = vmatmul.mubr.msk.f32.gmra.mrb[28].mxu1 %vm658_vm1, %v12009_v38 }
 0x575   : > { %9065 = vmatprep.mubr.msk.f32.mxu1 %vm658_vm1, %v5582_v22 }
 0x578   : > { %9066 = vmatmul.mubr.msk.f32.gmra.mrb[30].mxu1 %vm658_vm1, %v5583_v1 }
 0x579   : > { %9070 = vmatprep.mubr.msk.f32.mxu1 %vm9805_vm3, %v9804_v59 }
 0x60f   : > { %v9022_v42 = vpop.f32.mrb[0].mxu1 }
 0x610   : > { %v6223_v28 = vpop.f32.mrb[1].mxu1  ;;  %v12159_v48 = vadd.f32 %v9022_v42, %v12156_v32 }
 0x611   : > { %v12162_v13 = vadd.f32 %v12156_v32, %v6223_v28 }
 0x613   : > { %v9025_v6 = vpop.f32.mrb[2].mxu1  ;;  %v9080_v14 = vpack.c.bf16 %v12159_v48, %v12162_v13 }
 0x614   : > { %v6233_v7 = vpop.f32.mrb[3].mxu1  ;;  %v12175_v17 = vadd.f32 %v9025_v6, %v12156_v32 }
 0x615   : > { %v12178_v40 = vadd.f32 %v12156_v32, %v6233_v7 }
 0x617   : > { %v9028_v8 = vpop.f32.mrb[4].mxu1  ;;  %v9084_v2 = vpack.c.bf16 %v12175_v17, %v12178_v40 }
 0x618   : > { %v6243_v16 = vpop.f32.mrb[5].mxu1  ;;  %v12191_v9 = vadd.f32 %v9028_v8, %v12156_v32 }
 0x619   : > { %v12194_v27 = vadd.f32 %v12156_v32, %v6243_v16 }
 0x61b   : > { %v9031_v15 = vpop.f32.mrb[6].mxu1  ;;  %v9088_v60 = vpack.c.bf16 %v12191_v9, %v12194_v27 }
 0x61c   : > { %v6253_v5 = vpop.f32.mrb[7].mxu1  ;;  %v12207_v18 = vadd.f32 %v9031_v15, %v12156_v32 }
 0x61d   : > { %v12210_v4 = vadd.f32 %v12156_v32, %v6253_v5 }
 0x61f   : > { %v9034_v23 = vpop.f32.mrb[8].mxu1  ;;  %v9092_v11 = vpack.c.bf16 %v12207_v18, %v12210_v4 }
 0x620   : > { %v6263_v25 = vpop.f32.mrb[9].mxu1  ;;  %v12223_v56 = vadd.f32 %v9034_v23, %v12156_v32 }
 0x621   : > { %v12226_v44 = vadd.f32 %v12156_v32, %v6263_v25 }
 0x623   : > { %v9037_v35 = vpop.f32.mrb[10].mxu1  ;;  %v9096_v49 = vpack.c.bf16 %v12223_v56, %v12226_v44 }
 0x624   : > { %v6273_v12 = vpop.f32.mrb[11].mxu1  ;;  %v12239_v55 = vadd.f32 %v9037_v35, %v12156_v32 }
 0x625   : > { %v12242_v22 = vadd.f32 %v12156_v32, %v6273_v12 }
 0x627   : > { %v12145_v39 = vpop.f32.mrb[12].mxu1  ;;  %v9100_v7 = vpack.c.bf16 %v12239_v55, %v12242_v22 }
 0x628   : > { %v12147_v54 = vpop.f32.mrb[13].mxu1  ;;  %v6497_v8 = vadd.f32 %v12145_v39, %v12156_v32 }
 0x629   : > { %v6496_v16 = vadd.f32 %v12156_v32, %v12147_v54 }
 0x62b   : > { %v12149_v10 = vpop.f32.mrb[14].mxu1  ;;  %v9104_v12 = vpack.c.bf16 %v6497_v8, %v6496_v16 }
 0x62c   : > { %v12151_v29 = vpop.f32.mrb[15].mxu1  ;;  %v6499_v39 = vadd.f32 %v12149_v10, %v12156_v32 }
 0x62d   : > { %v6498_v54 = vadd.f32 %v12156_v32, %v12151_v29 }
 0x62f   : > { %v9046_v61 = vpop.f32.mrb[16].mxu1 }
 0x630   : > { %v12165_v21 = vadd.f32 %v9046_v61, %v12156_v32  ;;  %v6303_v41 = vpop.f32.mrb[17].mxu1 }
 0x631   : > { %v12168_v46 = vadd.f32 %v12156_v32, %v6303_v41 }
 0x633   : > { %v9078_v45 = vpack.c.bf16 %v12165_v21, %v12168_v46  ;;  %v9049_v0 = vpop.f32.mrb[18].mxu1 }
 0x634   : > { %v12181_v47 = vadd.f32 %v9049_v0, %v12156_v32  ;;  %v6313_v30 = vpop.f32.mrb[19].mxu1 }
 0x635   : > { %v12184_v24 = vadd.f32 %v12156_v32, %v6313_v30  ;;  %9079 = vmatprep.subr.bf16.mxu0 %v9078_v45  ;;  %v6664_v30 = vld [vmem:[%s12466_s10] sm:$0x1] }
 0x636   : > { %9081 = vmatpush3.bf16.msra.mxu0 %v9080_v14  ;;  %v9108_v14 = vpack.c.bf16 %v6499_v39, %v6498_v54 }
 0x637   : > { %v9082_v33 = vpack.c.bf16 %v12181_v47, %v12184_v24  ;;  %v9052_v43 = vpop.f32.mrb[20].mxu1 }
 0x638   : > { %v12197_v36 = vadd.f32 %v9052_v43, %v12156_v32  ;;  %v6323_v34 = vpop.f32.mrb[21].mxu1 }
 0x639   : > { %v12200_v53 = vadd.f32 %v12156_v32, %v6323_v34  ;;  %9083 = vmatprep.subr.bf16.mxu0 %v9082_v33 }
 0x63a   : > { %9085 = vmatpush3.bf16.msra.mxu0 %v9084_v2 }
 0x63b   : > { %v9086_v62 = vpack.c.bf16 %v12197_v36, %v12200_v53  ;;  %v9055_v57 = vpop.f32.mrb[22].mxu1 }
 0x63c   : > { %v12213_v3 = vadd.f32 %v9055_v57, %v12156_v32  ;;  %v6333_v50 = vpop.f32.mrb[23].mxu1 }
 0x63d   : > { %v12216_v52 = vadd.f32 %v12156_v32, %v6333_v50  ;;  %9087 = vmatprep.subr.bf16.mxu0 %v9086_v62 }
 0x63e   : > { %9089 = vmatpush3.bf16.msra.mxu0 %v9088_v60 }
 0x63f   : > { %v9090_v26 = vpack.c.bf16 %v12213_v3, %v12216_v52  ;;  %v9058_v58 = vpop.f32.mrb[24].mxu1 }
 0x640   : > { %v12229_v37 = vadd.f32 %v9058_v58, %v12156_v32  ;;  %v6343_v19 = vpop.f32.mrb[25].mxu1 }
 0x641   : > { %v12232_v51 = vadd.f32 %v12156_v32, %v6343_v19  ;;  %9091 = vmatprep.subr.bf16.mxu0 %v9090_v26 }
 0x642   : > { %9093 = vmatpush3.bf16.msra.mxu0 %v9092_v11 }
 0x643   : > { %v9094_v31 = vpack.c.bf16 %v12229_v37, %v12232_v51  ;;  %v9061_v38 = vpop.f32.mrb[26].mxu1 }
 0x644   : > { %v12245_v1 = vadd.f32 %v9061_v38, %v12156_v32  ;;  %v6353_v20 = vpop.f32.mrb[27].mxu1 }
 0x645   : > { %v12248_v42 = vadd.f32 %v12156_v32, %v6353_v20  ;;  %9095 = vmatprep.subr.bf16.mxu0 %v9094_v31 }
 0x646   : > { %9097 = vmatpush3.bf16.msra.mxu0 %v9096_v49 }
 0x647   : > { %v9098_v28 = vpack.c.bf16 %v12245_v1, %v12248_v42  ;;  %v9064_v6 = vpop.f32.mrb[28].mxu1 }
 0x648   : > { %v12259_v15 = vadd.f32 %v9064_v6, %v12156_v32  ;;  %v6363_v5 = vpop.f32.mrb[29].mxu1 }
 0x649   : > { %v12262_v23 = vadd.f32 %v12156_v32, %v6363_v5  ;;  %9099 = vmatprep.subr.bf16.mxu0 %v9098_v28 }
 0x64a   : > { %9101 = vmatpush3.bf16.msra.mxu0 %v9100_v7 }
 0x64b   : > { %v9102_v25 = vpack.c.bf16 %v12259_v15, %v12262_v23  ;;  %v9067_v35 = vpop.f32.mrb[30].mxu1 }
 0x64c   : > { %v12271_v61 = vadd.f32 %v9067_v35, %v12156_v32  ;;  %v6373_v41 = vpop.f32.mrb[31].mxu1 }
 0x64d   : > { %v12274_v45 = vadd.f32 %v12156_v32, %v6373_v41  ;;  %9103 = vmatprep.subr.bf16.mxu0 %v9102_v25  ;;  %v9768_v41 = vld [vmem:[%s9899_s28 + $0x28] sm:$0xff] }
 0x64e   : > { %9105 = vmatpush3.bf16.msra.mxu0 %v9104_v12 }
 0x64f   : > { %v9106_v0 = vpack.c.bf16 %v12271_v61, %v12274_v45 }
 0x651   : > { %9107 = vmatprep.subr.bf16.mxu0 %v9106_v0 }
 0x652   : > { %9109 = vmatpush3.bf16.msra.mxu0 %v9108_v14  ;;  %v9770_v14 = vld [vmem:[%s9899_s28 + $0x38] sm:$0xff] }
 0x653   : > { %9073 = vmatprep.subr.mxu0 %v9804_v59 }
 0x655   : > { %6581 = vmatmul.mubr.f32.vlgmr.msra.gmra.mrb[32].mxu0 %v9803_v63 }
 0x656   : > { %9075 = vmatprep.mubr.msk.f32.mxu0 %vm9805_vm3, %v9804_v59  ;;  %9074 = vmatpush3.msk.msra.mxu0 %vm6669_vm4, %v6664_v30  ;;  %v6747_v59 = vlaneseq  ;;  %v9772_v30 = vld [vmem:[%s9899_s28 + $0x48] sm:$0xff] }
 0x658   : > { %v6748_v57 = vshrl.u32 %v6747_v59, 7 }
 0x65a   : > { %v6749_v26 = vsub.s32 0, %v6748_v57  ;;  %v9776_v57 = vld [vmem:[%s9899_s28 + $0x68] sm:$0xff] }
 0x728   : > { %v8161_v10 = vpop.f32.mrb[32].mxu0 }
 0x729   : > { %v8162_v29 = vpop.f32.mrb[33].mxu0 }
 0x72a   : > { %v8163_v32 = vadd.f32 %v8162_v29, %v8161_v10  ;;  %v9771_v29 = vld [vmem:[%s9899_s28 + $0x40] sm:$0xff] }
 0x72c   : > { %9071 = vmatmul.mubr.msk.f32.vlgmr.msra.gmra.mrb[32].mxu1 %vm658_vm1, %v8163_v32 }
 0x7ff   : > { %v6659_v33 = vpop.f32.mrb[32].mxu1 }
 0x800   : > { %v6663_v43 = vmax.f32 %v6659_v33, 0.0  ;;  %v9072_v63 = vpop.f32.mrb[33].mxu1 }
 0x802   : > { %9076 = vmatmul.mubr.msk.f32.vlgmr.msra.gmra.mrb[34].mxu0 %vm6665_vm5, %v6663_v43  ;;  %v9773_v43 = vld [vmem:[%s9899_s28 + $0x50] sm:$0xff] }
 0x8d5   : > { %v6739_v2 = vpop.f32.mrb[34].mxu0 }
 0x8d6   : > { %v6743_v34 = vmul.f32 0.5, %v6739_v2  ;;  %v9077_v62 = vpop.f32.mrb[35].mxu0  ;;  %v9774_v2 = vld [vmem:[%s9899_s28 + $0x58] sm:$0xff] }
 0x8d7   : > { %v9775_v62 = vld [vmem:[%s9899_s28 + $0x60] sm:$0xff] }
 0x8d8   : > { %9761 = vtanh.f32 %v6743_v34 }
 0x8e2   : > { %v9762_v60 = vpop.eup %9761 }
 0x8e3   : > { %v6745_v50 = vmul.f32 0.5, %v9762_v60 }
 0x8e5   : > { %v6746_v58 = vadd.f32 0.5, %v6745_v50  ;;  %v9777_v50 = vld [vmem:[%s9899_s28 + $0x70] sm:$0xff] }
 0x8e7   : > { %v6750_v11 = vrot.slane %v6746_v58, %v6749_v26  ;;  %v9778_v58 = vld [vmem:[%s9899_s28 + $0x78] sm:$0xff] }
 0x8e9   : > { %v6751_v19 = vmul.f32 %v6750_v11, %v12162_v13  ;;  %v6752_v31 = vmul.f32 %v6750_v11, %v12159_v48  ;;  %v6753_v38 = vmul.f32 %v6750_v11, %v12178_v40  ;;  %v6754_v49 = vmul.f32 %v6750_v11, %v12175_v17 }
 0x8ea   : > { %v6755_v20 = vmul.f32 %v6750_v11, %v12194_v27  ;;  %v6756_v28 = vmul.f32 %v6750_v11, %v12191_v9  ;;  %v6757_v6 = vmul.f32 %v6750_v11, %v12210_v4  ;;  %v6758_v7 = vmul.f32 %v6750_v11, %v12207_v18 }
 0x8eb   : > { %v6759_v5 = vmul.f32 %v6750_v11, %v12226_v44  ;;  %v6760_v25 = vmul.f32 %v6750_v11, %v12223_v56  ;;  %v6761_v13 = vmul.f32 %v6750_v11, %v12242_v22  ;;  %v6762_v48 = vmul.f32 %v6750_v11, %v12239_v55 }
 0x8ec   : > { %v6763_v35 = vmul.f32 %v6750_v11, %v6496_v16  ;;  %v6764_v40 = vmul.f32 %v6750_v11, %v6497_v8  ;;  %v6765_v17 = vmul.f32 %v6750_v11, %v6498_v54  ;;  %v6766_v12 = vmul.f32 %v6750_v11, %v6499_v39  ;;  %v9765_v8 = vld [vmem:[%s9899_s28 + $0x10] sm:$0xff]  ;;  %v9767_v39 = vld [vmem:[%s9899_s28 + $0x20] sm:$0xff] }
 0x8ed   : > { %v6767_v27 = vmul.f32 %v6750_v11, %v12168_v46  ;;  %v6768_v9 = vmul.f32 %v6750_v11, %v12165_v21  ;;  %v6769_v18 = vmul.f32 %v6750_v11, %v12184_v24  ;;  %v6770_v4 = vmul.f32 %v6750_v11, %v12181_v47 }
 0x8ee   : > { %v12303_v56 = vmul.f32 %v6750_v11, %v12200_v53  ;;  %v12306_v44 = vmul.f32 %v6750_v11, %v12197_v36  ;;  %v12309_v55 = vmul.f32 %v6750_v11, %v12216_v52  ;;  %v12312_v46 = vmul.f32 %v6750_v11, %v12213_v3 }
 0x8ef   : > { %v12315_v21 = vmul.f32 %v6750_v11, %v12232_v51  ;;  %v12318_v47 = vmul.f32 %v6750_v11, %v12229_v37  ;;  %v12321_v24 = vmul.f32 %v6750_v11, %v12248_v42  ;;  %v12324_v36 = vmul.f32 %v6750_v11, %v12245_v1  ;;  %v9763_v51 = vld [vmem:[%s9899_s28] sm:$0xff]  ;;  %v9764_v1 = vld [vmem:[%s9899_s28 + $0x8] sm:$0xff] }
 0x8f0   : > { %v12334_v53 = vmul.f32 %v6750_v11, %v12262_v23  ;;  %v12337_v3 = vmul.f32 %v6750_v11, %v12259_v15  ;;  %v12340_v52 = vmul.f32 %v6750_v11, %v12274_v45  ;;  %v12343_v37 = vmul.f32 %v6750_v11, %v12271_v61  ;;  %v9766_v23 = vld [vmem:[%s9899_s28 + $0x18] sm:$0xff]  ;;  %v9769_v45 = vld [vmem:[%s9899_s28 + $0x30] sm:$0xff] }
 0x8f1   : > { %v6783_v22 = vadd.f32 %v9763_v51, %v6751_v19  ;;  %v6784_v42 = vadd.f32 %v9764_v1, %v6752_v31  ;;  %v6785_v16 = vadd.f32 %v9765_v8, %v6753_v38  ;;  %v6786_v15 = vadd.f32 %v9766_v23, %v6754_v49  ;;  %v9779_v19 = vld [vmem:[%s9899_s28 + $0x80] sm:$0xff]  ;;  %v9780_v38 = vld [vmem:[%s9899_s28 + $0x88] sm:$0xff]  ;;  %v9793_v51 = vld [vmem:[%s9899_s28 + $0xf0] sm:$0xff] }
 0x8f2   : > { %v6787_v54 = vadd.f32 %v9767_v39, %v6755_v20  ;;  %v6788_v61 = vadd.f32 %v9768_v41, %v6756_v28  ;;  %v6789_v0 = vadd.f32 %v9769_v45, %v6757_v6  ;;  %v6790_v10 = vadd.f32 %v9770_v14, %v6758_v7  ;;  %v9781_v20 = vld [vmem:[%s9899_s28 + $0x90] sm:$0xff]  ;;  %v9782_v6 = vld [vmem:[%s9899_s28 + $0x98] sm:$0xff] }
 0x8f3   : > { %v6791_v32 = vadd.f32 %v9771_v29, %v6759_v5  ;;  %v6792_v33 = vadd.f32 %v9772_v30, %v6760_v25  ;;  %v6793_v63 = vadd.f32 %v9773_v43, %v6761_v13  ;;  %v6794_v34 = vadd.f32 %v9774_v2, %v6762_v48  ;;  %6815 = vst.msk [vmem:[%s12331_s13] sm:$0xff] %vm658_vm1, %v6783_v22  ;;  %v9783_v5 = vld [vmem:[%s9899_s28 + $0xa0] sm:$0xff]  ;;  %v9784_v13 = vld [vmem:[%s9899_s28 + $0xa8] sm:$0xff]  ;;  %v9794_v1 = vld [vmem:[%s9899_s28 + $0xf8] sm:$0xff] }
 0x8f4   : > { %6816 = vst.msk [vmem:[%s12331_s13 + $0x8] sm:$0xff] %vm658_vm1, %v6784_v42  ;;  %6817 = vst.msk [vmem:[%s12331_s13 + $0x10] sm:$0xff] %vm658_vm1, %v6785_v16  ;;  %v6795_v59 = vadd.f32 %v9775_v62, %v6763_v35  ;;  %v6796_v60 = vadd.f32 %v9776_v57, %v6764_v40  ;;  %v6797_v26 = vadd.f32 %v9777_v50, %v6765_v17  ;;  %v9785_v35 = vld [vmem:[%s9899_s28 + $0xb0] sm:$0xff]  ;;  %v9786_v17 = vld [vmem:[%s9899_s28 + $0xb8] sm:$0xff] }
 0x8f5   : > { %6818 = vst.msk [vmem:[%s12331_s13 + $0x18] sm:$0xff] %vm658_vm1, %v6786_v15  ;;  %v6798_v11 = vadd.f32 %v9778_v58, %v6766_v12  ;;  %6819 = vst.msk [vmem:[%s12331_s13 + $0x20] sm:$0xff] %vm658_vm1, %v6787_v54  ;;  %v6799_v31 = vadd.f32 %v9779_v19, %v6767_v27  ;;  %v6800_v49 = vadd.f32 %v9780_v38, %v6768_v9  ;;  %v9787_v27 = vld [vmem:[%s9899_s28 + $0xc0] sm:$0xff] }
 0x8f6   : > { %6820 = vst.msk [vmem:[%s12331_s13 + $0x28] sm:$0xff] %vm658_vm1, %v6788_v61  ;;  %6821 = vst.msk [vmem:[%s12331_s13 + $0x30] sm:$0xff] %vm658_vm1, %v6789_v0  ;;  %v6801_v28 = vadd.f32 %v9781_v20, %v6769_v18  ;;  %v6802_v7 = vadd.f32 %v9782_v6, %v6770_v4  ;;  %v6803_v25 = vadd.f32 %v9783_v5, %v12303_v56  ;;  %v9788_v18 = vld [vmem:[%s9899_s28 + $0xc8] sm:$0xff]  ;;  %v9789_v56 = vld [vmem:[%s9899_s28 + $0xd0] sm:$0xff] }
 0x8f7   : > { %6822 = vst.msk [vmem:[%s12331_s13 + $0x38] sm:$0xff] %vm658_vm1, %v6790_v10  ;;  %6823 = vst.msk [vmem:[%s12331_s13 + $0x40] sm:$0xff] %vm658_vm1, %v6791_v32  ;;  %v6804_v48 = vadd.f32 %v9784_v13, %v12306_v44  ;;  %v6805_v40 = vadd.f32 %v9785_v35, %v12309_v55  ;;  %v6806_v12 = vadd.f32 %v9786_v17, %v12312_v46  ;;  %v9790_v55 = vld [vmem:[%s9899_s28 + $0xd8] sm:$0xff] }
 0x8f8   : > { %6824 = vst.msk [vmem:[%s12331_s13 + $0x48] sm:$0xff] %vm658_vm1, %v6792_v33  ;;  %6825 = vst.msk [vmem:[%s12331_s13 + $0x50] sm:$0xff] %vm658_vm1, %v6793_v63  ;;  %v6807_v9 = vadd.f32 %v9787_v27, %v12315_v21  ;;  %v6808_v4 = vadd.f32 %v9788_v18, %v12318_v47  ;;  %v6809_v44 = vadd.f32 %v9789_v56, %v12321_v24  ;;  %v9791_v21 = vld [vmem:[%s9899_s28 + $0xe0] sm:$0xff]  ;;  %v9792_v24 = vld [vmem:[%s9899_s28 + $0xe8] sm:$0xff] }
 0x8f9   : > { %6826 = vst.msk [vmem:[%s12331_s13 + $0x58] sm:$0xff] %vm658_vm1, %v6794_v34  ;;  %6827 = vst.msk [vmem:[%s12331_s13 + $0x60] sm:$0xff] %vm658_vm1, %v6795_v59  ;;  %v6810_v46 = vadd.f32 %v9790_v55, %v12324_v36  ;;  %v6811_v47 = vadd.f32 %v9791_v21, %v12334_v53  ;;  %v6812_v36 = vadd.f32 %v9792_v24, %v12337_v3 }
 0x8fa   : > { %6828 = vst.msk [vmem:[%s12331_s13 + $0x68] sm:$0xff] %vm658_vm1, %v6796_v60  ;;  %6829 = vst.msk [vmem:[%s12331_s13 + $0x70] sm:$0xff] %vm658_vm1, %v6797_v26  ;;  %v6813_v22 = vadd.f32 %v9793_v51, %v12340_v52  ;;  %v6814_v42 = vadd.f32 %v9794_v1, %v12343_v37 }
 0x8fb   : > { %6830 = vst.msk [vmem:[%s12331_s13 + $0x78] sm:$0xff] %vm658_vm1, %v6798_v11  ;;  %6831 = vst.msk [vmem:[%s12331_s13 + $0x80] sm:$0xff] %vm658_vm1, %v6799_v31 }
 0x8fc   : > { %6832 = vst.msk [vmem:[%s12331_s13 + $0x88] sm:$0xff] %vm658_vm1, %v6800_v49  ;;  %6833 = vst.msk [vmem:[%s12331_s13 + $0x90] sm:$0xff] %vm658_vm1, %v6801_v28 }
 0x8fd   : > { %6834 = vst.msk [vmem:[%s12331_s13 + $0x98] sm:$0xff] %vm658_vm1, %v6802_v7  ;;  %6835 = vst.msk [vmem:[%s12331_s13 + $0xa0] sm:$0xff] %vm658_vm1, %v6803_v25 }
 0x8fe   : > { %6836 = vst.msk [vmem:[%s12331_s13 + $0xa8] sm:$0xff] %vm658_vm1, %v6804_v48  ;;  %6837 = vst.msk [vmem:[%s12331_s13 + $0xb0] sm:$0xff] %vm658_vm1, %v6805_v40 }
 0x8ff   : > { %6838 = vst.msk [vmem:[%s12331_s13 + $0xb8] sm:$0xff] %vm658_vm1, %v6806_v12  ;;  %6839 = vst.msk [vmem:[%s12331_s13 + $0xc0] sm:$0xff] %vm658_vm1, %v6807_v9 }
 0x900   : > { %6840 = vst.msk [vmem:[%s12331_s13 + $0xc8] sm:$0xff] %vm658_vm1, %v6808_v4  ;;  %6841 = vst.msk [vmem:[%s12331_s13 + $0xd0] sm:$0xff] %vm658_vm1, %v6809_v44 }
 0x901   : > { %6842 = vst.msk [vmem:[%s12331_s13 + $0xd8] sm:$0xff] %vm658_vm1, %v6810_v46  ;;  %6843 = vst.msk [vmem:[%s12331_s13 + $0xe0] sm:$0xff] %vm658_vm1, %v6811_v47 }
 0x902   : > { %6844 = vst.msk [vmem:[%s12331_s13 + $0xe8] sm:$0xff] %vm658_vm1, %v6812_v36  ;;  %6845 = vst.msk [vmem:[%s12331_s13 + $0xf0] sm:$0xff] %vm658_vm1, %v6813_v22 }
 0x903   : > { %6846 = vst.msk [vmem:[%s12331_s13 + $0xf8] sm:$0xff] %vm658_vm1, %v6814_v42 }
 0x904 PF: > { %s21_s17 = sadd.s32 1, %s9801_s17  }
 0x905   : > { %p18_p4 = scmp.ge.s32.totalorder %s21_s17, 4  }
 0x907   :  { %20 = sbr.rel (!%p18_p4) target bundleno = 1 (0x1), region = 112 }

</bundles_post_ra>
